<compile_context>
chip_gen: v5e
topology: v5e:2x2
jax: 0.10.0
libtpu: 0.0.40
codegen_flags: <defaults>
</compile_context>

<pallas_src>
import functools

import jax
import jax.numpy as jnp
import numpy as np
from jax.experimental import pallas as pl
from jax.experimental.pallas import tpu as pltpu

# bf16 halves weight DMA and uses the native MXU path on v6e/v7x (loosen the
# reference tolerances to ~2e-2 if enabled); f32 keeps the check bit-tight.
MATMUL_DTYPE = jnp.float32


def _round_up(x, m):
    return (x + m - 1) // m * m


def _sigmoid(x):
    # One EUP tanh per gate instead of exp + divide.
    return 0.5 * jnp.tanh(0.5 * x) + 0.5


# ----------------------------------------------------------------------------
# Pallas kernel: one LSTM layer, TS time steps per grid iteration.
# grid = (time_chunks,)   ["arbitrary"]
# ----------------------------------------------------------------------------
def _lstm_layer_kernel(seq_len,      # static python int (unpadded S)
                       x_ref,        # (TS*Bp, F)    layer-input chunk
                       wih_ref,      # (F, 4*Hp)     W_ih^T  (gate-padded)
                       whh_ref,      # (Hp, 4*Hp)    W_hh^T  (gate-padded)
                       bias_ref,     # (1, 4*Hp)     b_ih + b_hh
                       y_ref,        # (TS, Bp, Hp)  per-step h_t
                       hN_ref,       # (Bp, Hp)      final hidden
                       cN_ref,       # (Bp, Hp)      final cell
                       gx_sc,        # VMEM (TS*Bp, 4*Hp)  x-projection
                       h_sc,         # VMEM (Bp, Hp)       carried hidden
                       c_sc):        # VMEM (Bp, Hp)       carried cell
    chunk = pl.program_id(0)
    n_chunks = pl.num_programs(0)
    TS = y_ref.shape[0]
    Bp, Hp = h_sc.shape
    mm_dtype = whh_ref.dtype
    f32 = jnp.float32

    @pl.when(chunk == 0)
    def _():
        h_sc[...] = jnp.zeros_like(h_sc)
        c_sc[...] = jnp.zeros_like(c_sc)

    # Chunk-level input projection: one big MXU matmul with no serial
    # dependency (fills cycles otherwise idle on the h(t-1) chain); the
    # (S, B, 4*Hp) gx tensor never round-trips through HBM.
    gx_sc[...] = (jnp.dot(x_ref[...].astype(mm_dtype), wih_ref[...],
                          preferred_element_type=f32)
                  + bias_ref[...])

    def step(s, carry):
        h, c = carry
        r = pl.multiple_of(s * Bp, 8)                       # sublane-aligned
        gates = (jnp.dot(h.astype(mm_dtype), whh_ref[...],
                         preferred_element_type=f32)
                 + gx_sc[pl.ds(r, Bp), :])                  # (Bp, 4*Hp)
        i_g = _sigmoid(gates[:, 0 * Hp:1 * Hp])
        f_g = _sigmoid(gates[:, 1 * Hp:2 * Hp])
        g_g = jnp.tanh(gates[:, 2 * Hp:3 * Hp])
        o_g = _sigmoid(gates[:, 3 * Hp:4 * Hp])
        c_new = f_g * c + i_g * g_g
        h_new = o_g * jnp.tanh(c_new)
        if seq_len % TS != 0:             # only emitted if time axis is padded
            valid = (chunk * TS + s) < seq_len
            h_new = jnp.where(valid, h_new, h)
            c_new = jnp.where(valid, c_new, c)
        y_ref[s] = h_new.astype(y_ref.dtype)
        return h_new, c_new

    # Cap unroll at 8 to limit vreg pressure / spills at large Hp.
    unroll = True if TS <= 8 else 8
    h_fin, c_fin = jax.lax.fori_loop(0, TS, step, (h_sc[...], c_sc[...]),
                                     unroll=unroll)
    h_sc[...] = h_fin
    c_sc[...] = c_fin

    @pl.when(chunk == n_chunks - 1)       # write finals only once
    def _():
        hN_ref[...] = h_fin.astype(hN_ref.dtype)
        cN_ref[...] = c_fin.astype(cN_ref.dtype)


# ----------------------------------------------------------------------------
# VMEM planning
# ----------------------------------------------------------------------------
def _vmem_bytes_estimate(TS, Bp, F, Hp, mm_dtype):
    mmb = int(np.dtype(mm_dtype).itemsize)
    need = 2 * TS * Bp * F * 4            # x chunk (double-buffered, f32)
    need += 2 * F * 4 * Hp * mmb          # W_ih^T
    need += 2 * Hp * 4 * Hp * mmb         # W_hh^T
    need += 2 * 8 * 4 * Hp * 4            # bias (sublane-padded)
    need += 2 * TS * Bp * Hp * 4          # y chunk (double-buffered)
    need += 4 * Bp * Hp * 4               # hN / cN (resident)
    need += TS * Bp * 4 * Hp * 4          # gx scratch
    need += 2 * Bp * Hp * 4               # h / c scratch
    return need


def _choose_time_chunk(S, Bp, F_max, Hp, mm_dtype, ts_max=32,
                       budget=40 * 1024 * 1024):
    # Largest TS whose chunk plan fits comfortably on every generation
    # (v5e scoped default 16 MiB, v7x 64 MiB physical).
    TS = min(S, ts_max)
    while TS > 1 and _vmem_bytes_estimate(TS, Bp, F_max, Hp, mm_dtype) > budget:
        TS //= 2
    return max(TS, 1)


# ----------------------------------------------------------------------------
# One LSTM layer wrapper
# ----------------------------------------------------------------------------
def _prep_weights(w_ih, w_hh, b_ih, b_hh, F_in, Hp, mm_dtype):
    """W_ih^T (F_in, 4*Hp), W_hh^T (Hp, 4*Hp), bias (1, 4*Hp); gate-padded."""
    f32 = jnp.float32
    H = w_hh.shape[1]

    def pad_gate_cols(w_t):                       # (rows, 4H) -> (rows, 4*Hp)
        rows = w_t.shape[0]
        w4 = w_t.reshape(rows, 4, H)
        w4 = jnp.pad(w4, ((0, 0), (0, 0), (0, Hp - H)))
        return w4.reshape(rows, 4 * Hp)

    wih_t = pad_gate_cols(jnp.transpose(w_ih).astype(f32))       # (F, 4*Hp)
    if F_in > wih_t.shape[0]:
        wih_t = jnp.pad(wih_t, ((0, F_in - wih_t.shape[0]), (0, 0)))
    whh_t = pad_gate_cols(jnp.transpose(w_hh).astype(f32))       # (H, 4*Hp)
    whh_t = jnp.pad(whh_t, ((0, Hp - H), (0, 0)))                # (Hp, 4*Hp)
    bias = (b_ih + b_hh).astype(f32).reshape(4, H)
    bias = jnp.pad(bias, ((0, 0), (0, Hp - H))).reshape(1, 4 * Hp)
    return wih_t.astype(mm_dtype), whh_t.astype(mm_dtype), bias


def _lstm_layer(x_flat, p, *, seq_len, TS, Bp, Hp, mm_dtype):
    """x_flat: (Sp*Bp, F) padded, time-major, flattened.
       Returns y (Sp, Bp, Hp), h_N (Bp, Hp), c_N (Bp, Hp)."""
    f32 = jnp.float32
    SpBp, F = x_flat.shape
    n_chunks = SpBp // (TS * Bp)

    wih_t, whh_t, bias = _prep_weights(p["w_ih"], p["w_hh"], p["b_ih"],
                                       p["b_hh"], F, Hp, mm_dtype)

    est = _vmem_bytes_estimate(TS, Bp, F, Hp, mm_dtype)
    vmem_limit = int(min(max(est * 3 // 2 + (2 << 20), 16 << 20), 48 << 20))

    kernel = functools.partial(_lstm_layer_kernel, seq_len)
    y, hN, cN = pl.pallas_call(
        kernel,
        out_shape=(
            jax.ShapeDtypeStruct((n_chunks * TS, Bp, Hp), f32),
            jax.ShapeDtypeStruct((Bp, Hp), f32),
            jax.ShapeDtypeStruct((Bp, Hp), f32),
        ),
        grid=(n_chunks,),
        in_specs=[
            pl.BlockSpec((TS * Bp, F), lambda c: (c, 0)),
            pl.BlockSpec((F, 4 * Hp), lambda c: (0, 0)),       # constant
            pl.BlockSpec((Hp, 4 * Hp), lambda c: (0, 0)),      # constant
            pl.BlockSpec((1, 4 * Hp), lambda c: (0, 0)),       # constant
        ],
        out_specs=[
            pl.BlockSpec((TS, Bp, Hp), lambda c: (c, 0, 0)),
            pl.BlockSpec((Bp, Hp), lambda c: (0, 0)),
            pl.BlockSpec((Bp, Hp), lambda c: (0, 0)),
        ],
        scratch_shapes=[
            pltpu.VMEM((TS * Bp, 4 * Hp), f32),
            pltpu.VMEM((Bp, Hp), f32),
            pltpu.VMEM((Bp, Hp), f32),
        ],
        compiler_params=pltpu.CompilerParams(
            dimension_semantics=("arbitrary",),
            vmem_limit_bytes=vmem_limit),
    )(x_flat, wih_t, whh_t, bias)
    return y, hN, cN


# ----------------------------------------------------------------------------
# Seq2SeqEncoder forward (PyTorch nn.LSTM, batch_first=True, zero init state)
# ----------------------------------------------------------------------------
def init_params(key, embed_size, num_hiddens, num_layers, dtype=jnp.float32):
    """PyTorch-style U(-1/sqrt(H), 1/sqrt(H)) params, gate order (i,f,g,o)."""
    params = []
    k = 1.0 / np.sqrt(num_hiddens)
    for layer in range(num_layers):
        in_feat = embed_size if layer == 0 else num_hiddens
        key, k1, k2, k3, k4 = jax.random.split(key, 5)
        params.append(dict(
            w_ih=jax.random.uniform(k1, (4 * num_hiddens, in_feat), dtype, -k, k),
            w_hh=jax.random.uniform(k2, (4 * num_hiddens, num_hiddens), dtype, -k, k),
            b_ih=jax.random.uniform(k3, (4 * num_hiddens,), dtype, -k, k),
            b_hh=jax.random.uniform(k4, (4 * num_hiddens,), dtype, -k, k),
        ))
    return params


@jax.jit
def seq2seq_encoder_forward(X, params):
    """X: (batch, seq, embed).  Returns (output, (hidden, cell)) like PyTorch:
       output: (batch, seq, H); hidden/cell: (num_layers, batch, H)."""
    f32 = jnp.float32
    B, S, E = X.shape
    H = params[0]["w_hh"].shape[1]
    Hp = _round_up(H, 128)                              # lane-aligned gates
    Bp = _round_up(B, 8)                                # sublane-aligned batch
    TS = _choose_time_chunk(S, Bp, max(E, Hp), Hp, MATMUL_DTYPE)
    Sp = _round_up(S, TS)

    # Pad once; keep padded time-major layout between layers (no per-layer
    # pad/slice HBM round-trips).
    x = jnp.transpose(X, (1, 0, 2)).astype(f32)         # (S, B, E)
    x = jnp.pad(x, ((0, Sp - S), (0, Bp - B), (0, 0)))  # (Sp, Bp, E)
    x = x.reshape(Sp * Bp, E)

    hiddens, cells = [], []
    y = None
    for p in params:
        y, h_n, c_n = _lstm_layer(x, p, seq_len=S, TS=TS, Bp=Bp, Hp=Hp,
                                  mm_dtype=MATMUL_DTYPE)
        x = y.reshape(Sp * Bp, Hp)                      # next layer's input
        hiddens.append(h_n[:B, :H])
        cells.append(c_n[:B, :H])

    out = y[:S, :B, :H]                                 # slice once at the end
    output = jnp.transpose(out, (1, 0, 2)).astype(X.dtype)     # (B, S, H)
    hidden = jnp.stack(hiddens, axis=0).astype(X.dtype)        # (L, B, H)
    cell = jnp.stack(cells, axis=0).astype(X.dtype)            # (L, B, H)
    return output, (hidden, cell)


# ----------------------------------------------------------------------------
# Pure-JAX reference (correctness check only)
# ----------------------------------------------------------------------------
def _reference_forward(X, params):
    B, S, _ = X.shape
    x = X
    hs, cs = [], []
    for p in params:
        H = p["w_hh"].shape[1]
        h = jnp.zeros((B, H), jnp.float32)
        c = jnp.zeros((B, H), jnp.float32)
        outs = []
        for t in range(S):
            g = x[:, t, :] @ p["w_ih"].T + p["b_ih"] + h @ p["w_hh"].T + p["b_hh"]
            i = jax.nn.sigmoid(g[:, 0 * H:1 * H])
            f = jax.nn.sigmoid(g[:, 1 * H:2 * H])
            gg = jnp.tanh(g[:, 2 * H:3 * H])
            o = jax.nn.sigmoid(g[:, 3 * H:4 * H])
            c = f * c + i * gg
            h = o * jnp.tanh(c)
            outs.append(h)
        x = jnp.stack(outs, axis=1)
        hs.append(h)
        cs.append(c)
    return x, (jnp.stack(hs, 0), jnp.stack(cs, 0))


if __name__ == "__main__":
    batch, seq_len, embed_size, num_hiddens, num_layers = 2, 8, 16, 32, 2

    key = jax.random.PRNGKey(0)
    kx, kp = jax.random.split(key)
    X = jax.random.normal(kx, (batch, seq_len, embed_size), jnp.float32)
    params = init_params(kp, embed_size, num_hiddens, num_layers)

    output, (hidden, cell) = seq2seq_encoder_forward(X, params)
    jax.block_until_ready(output)
    jax.block_until_ready(hidden)
    jax.block_until_ready(cell)

    assert output.shape == (batch, seq_len, num_hiddens)
    assert hidden.shape == (num_layers, batch, num_hiddens)
    assert cell.shape == (num_layers, batch, num_hiddens)

    ref_out, (ref_h, ref_c) = _reference_forward(X, params)
    np.testing.assert_allclose(np.asarray(output), np.asarray(ref_out),
                               rtol=2e-5, atol=2e-5)
    np.testing.assert_allclose(np.asarray(hidden), np.asarray(ref_h),
                               rtol=2e-5, atol=2e-5)
    np.testing.assert_allclose(np.asarray(cell), np.asarray(ref_c),
                               rtol=2e-5, atol=2e-5)

    print("KERNEL_OK")
</pallas_src>

<mosaic_0001>
module attributes {stable_mosaic.version = 11 : i64} {
  func.func @_lstm_layer_kernel(%arg0: i32, %arg1: memref<64x128xf32, #tpu.memory_space<vmem>>, %arg2: memref<128x512xf32, #tpu.memory_space<vmem>>, %arg3: memref<128x512xf32, #tpu.memory_space<vmem>>, %arg4: memref<1x512xf32, #tpu.memory_space<vmem>>, %arg5: memref<8x8x128xf32, #tpu.memory_space<vmem>>, %arg6: memref<8x128xf32, #tpu.memory_space<vmem>>, %arg7: memref<8x128xf32, #tpu.memory_space<vmem>>, %arg8: memref<64x512xf32, #tpu.memory_space<vmem>>, %arg9: memref<8x128xf32, #tpu.memory_space<vmem>>, %arg10: memref<8x128xf32, #tpu.memory_space<vmem>>) attributes {dimension_semantics = [#tpu.dimension_semantics<arbitrary>], iteration_bounds = array<i64: 1>, scalar_prefetch = 0 : i64, scratch_operands = 3 : i64, tpu.core_type = #tpu.core_type<tc>, window_params = [{transform_indices = @transform_0, window_bounds = array<i64: 64, 128>}, {pipeline_mode = #tpu.pipeline_mode<synchronous>, transform_indices = @transform_1, window_bounds = array<i64: 128, 512>}, {pipeline_mode = #tpu.pipeline_mode<synchronous>, transform_indices = @transform_2, window_bounds = array<i64: 128, 512>}, {pipeline_mode = #tpu.pipeline_mode<synchronous>, transform_indices = @transform_3, window_bounds = array<i64: 1, 512>}, {transform_indices = @transform_4, window_bounds = array<i64: 8, 8, 128>}, {pipeline_mode = #tpu.pipeline_mode<synchronous>, transform_indices = @transform_5, window_bounds = array<i64: 8, 128>}, {pipeline_mode = #tpu.pipeline_mode<synchronous>, transform_indices = @transform_6, window_bounds = array<i64: 8, 128>}]} {
    %c0_i32 = arith.constant 0 : i32
    %0 = arith.cmpi eq, %arg0, %c0_i32 : i32
    %1 = arith.extui %0 : i1 to i32
    %c0_i32_0 = arith.constant 0 : i32
    %2 = arith.cmpi ne, %1, %c0_i32_0 : i32
    scf.if %2 {
      %cst_147 = arith.constant 0.000000e+00 : f32
      %353 = vector.broadcast %cst_147 : f32 to vector<8x128xf32>
      %c0_148 = arith.constant 0 : index
      %c0_149 = arith.constant 0 : index
      %354 = vector.load %arg9[%c0_148, %c0_149] : memref<8x128xf32, #tpu.memory_space<vmem>>, vector<8x128xf32>
      tpu.vector_store %arg9[%c0_148, %c0_149], %353 {strides = array<i32>} : memref<8x128xf32, #tpu.memory_space<vmem>>, vector<8x128xf32>,
      %cst_150 = arith.constant 0.000000e+00 : f32
      %355 = vector.broadcast %cst_150 : f32 to vector<8x128xf32>
      %c0_151 = arith.constant 0 : index
      %c0_152 = arith.constant 0 : index
      %356 = vector.load %arg10[%c0_151, %c0_152] : memref<8x128xf32, #tpu.memory_space<vmem>>, vector<8x128xf32>
      tpu.vector_store %arg10[%c0_151, %c0_152], %355 {strides = array<i32>} : memref<8x128xf32, #tpu.memory_space<vmem>>, vector<8x128xf32>,
    } else {
    }
    %c0 = arith.constant 0 : index
    %c0_1 = arith.constant 0 : index
    %3 = vector.load %arg1[%c0, %c0_1] : memref<64x128xf32, #tpu.memory_space<vmem>>, vector<64x128xf32>
    %c0_2 = arith.constant 0 : index
    %c0_3 = arith.constant 0 : index
    %4 = vector.load %arg2[%c0_2, %c0_3] : memref<128x512xf32, #tpu.memory_space<vmem>>, vector<128x512xf32>
    %cst = arith.constant dense<0.000000e+00> : vector<64x512xf32>
    %5 = tpu.matmul %3, %4, %cst {dimension_numbers = #tpu.dot_dimension_numbers<[1], [0], [0], [1], [0, 0, 1, 1], [], []>} : vector<64x128xf32>, vector<128x512xf32>, vector<64x512xf32> -> vector<64x512xf32>
    %c0_4 = arith.constant 0 : index
    %c0_5 = arith.constant 0 : index
    %6 = vector.load %arg4[%c0_4, %c0_5] : memref<1x512xf32, #tpu.memory_space<vmem>>, vector<1x512xf32>
    %7 = vector.broadcast %6 : vector<1x512xf32> to vector<64x512xf32>
    %8 = arith.addf %5, %7 : vector<64x512xf32>
    %c0_6 = arith.constant 0 : index
    %c0_7 = arith.constant 0 : index
    %9 = vector.load %arg8[%c0_6, %c0_7] : memref<64x512xf32, #tpu.memory_space<vmem>>, vector<64x512xf32>
    tpu.vector_store %arg8[%c0_6, %c0_7], %8 {strides = array<i32>} : memref<64x512xf32, #tpu.memory_space<vmem>>, vector<64x512xf32>,
    %c0_8 = arith.constant 0 : index
    %c0_9 = arith.constant 0 : index
    %10 = vector.load %arg9[%c0_8, %c0_9] : memref<8x128xf32, #tpu.memory_space<vmem>>, vector<8x128xf32>
    %c0_10 = arith.constant 0 : index
    %c0_11 = arith.constant 0 : index
    %11 = vector.load %arg10[%c0_10, %c0_11] : memref<8x128xf32, #tpu.memory_space<vmem>>, vector<8x128xf32>
    %c0_i32_12 = arith.constant 0 : i32
    %c8_i32 = arith.constant 8 : i32
    %12 = arith.muli %c0_i32_12, %c8_i32 : i32
    %13 = tpu.assume_multiple %12, 8 : i32
    %c0_13 = arith.constant 0 : index
    %c0_14 = arith.constant 0 : index
    %14 = vector.load %arg3[%c0_13, %c0_14] : memref<128x512xf32, #tpu.memory_space<vmem>>, vector<128x512xf32>
    %cst_15 = arith.constant dense<0.000000e+00> : vector<8x512xf32>
    %15 = tpu.matmul %10, %14, %cst_15 {dimension_numbers = #tpu.dot_dimension_numbers<[1], [0], [0], [1], [0, 0, 1, 1], [], []>} : vector<8x128xf32>, vector<128x512xf32>, vector<8x512xf32> -> vector<8x512xf32>
    %16 = arith.index_cast %13 : i32 to index
    %c0_16 = arith.constant 0 : index
    %17 = vector.load %arg8[%16, %c0_16] : memref<64x512xf32, #tpu.memory_space<vmem>>, vector<8x512xf32>
    %18 = arith.addf %15, %17 : vector<8x512xf32>
    %19 = vector.extract_strided_slice %18 {offsets = [0, 0], sizes = [8, 128], strides = [1, 1]} : vector<8x512xf32> to vector<8x128xf32>
    %cst_17 = arith.constant 5.000000e-01 : f32
    %20 = vector.broadcast %cst_17 : f32 to vector<8x128xf32>
    %21 = arith.mulf %20, %19 : vector<8x128xf32>
    %22 = math.tanh %21 : vector<8x128xf32>
    %cst_18 = arith.constant 5.000000e-01 : f32
    %23 = vector.broadcast %cst_18 : f32 to vector<8x128xf32>
    %24 = arith.mulf %23, %22 : vector<8x128xf32>
    %cst_19 = arith.constant 5.000000e-01 : f32
    %25 = vector.broadcast %cst_19 : f32 to vector<8x128xf32>
    %26 = arith.addf %24, %25 : vector<8x128xf32>
    %27 = vector.extract_strided_slice %18 {offsets = [0, 128], sizes = [8, 128], strides = [1, 1]} : vector<8x512xf32> to vector<8x128xf32>
    %cst_20 = arith.constant 5.000000e-01 : f32
    %28 = vector.broadcast %cst_20 : f32 to vector<8x128xf32>
    %29 = arith.mulf %28, %27 : vector<8x128xf32>
    %30 = math.tanh %29 : vector<8x128xf32>
    %cst_21 = arith.constant 5.000000e-01 : f32
    %31 = vector.broadcast %cst_21 : f32 to vector<8x128xf32>
    %32 = arith.mulf %31, %30 : vector<8x128xf32>
    %cst_22 = arith.constant 5.000000e-01 : f32
    %33 = vector.broadcast %cst_22 : f32 to vector<8x128xf32>
    %34 = arith.addf %32, %33 : vector<8x128xf32>
    %35 = vector.extract_strided_slice %18 {offsets = [0, 256], sizes = [8, 128], strides = [1, 1]} : vector<8x512xf32> to vector<8x128xf32>
    %36 = math.tanh %35 : vector<8x128xf32>
    %37 = vector.extract_strided_slice %18 {offsets = [0, 384], sizes = [8, 128], strides = [1, 1]} : vector<8x512xf32> to vector<8x128xf32>
    %cst_23 = arith.constant 5.000000e-01 : f32
    %38 = vector.broadcast %cst_23 : f32 to vector<8x128xf32>
    %39 = arith.mulf %38, %37 : vector<8x128xf32>
    %40 = math.tanh %39 : vector<8x128xf32>
    %cst_24 = arith.constant 5.000000e-01 : f32
    %41 = vector.broadcast %cst_24 : f32 to vector<8x128xf32>
    %42 = arith.mulf %41, %40 : vector<8x128xf32>
    %cst_25 = arith.constant 5.000000e-01 : f32
    %43 = vector.broadcast %cst_25 : f32 to vector<8x128xf32>
    %44 = arith.addf %42, %43 : vector<8x128xf32>
    %45 = arith.mulf %34, %11 : vector<8x128xf32>
    %46 = arith.mulf %26, %36 : vector<8x128xf32>
    %47 = arith.addf %45, %46 : vector<8x128xf32>
    %48 = math.tanh %47 : vector<8x128xf32>
    %49 = arith.mulf %44, %48 : vector<8x128xf32>
    %50 = arith.index_cast %c0_i32_12 : i32 to index
    %c0_26 = arith.constant 0 : index
    %c0_27 = arith.constant 0 : index
    %51 = vector.load %arg5[%50, %c0_26, %c0_27] : memref<8x8x128xf32, #tpu.memory_space<vmem>>, vector<1x8x128xf32>
    %52 = vector.shape_cast %51 : vector<1x8x128xf32> to vector<8x128xf32>
    %53 = vector.shape_cast %49 : vector<8x128xf32> to vector<1x8x128xf32>
    tpu.vector_store %arg5[%50, %c0_26, %c0_27], %53 {strides = array<i32>} : memref<8x8x128xf32, #tpu.memory_space<vmem>>, vector<1x8x128xf32>,
    %c1_i32 = arith.constant 1 : i32
    %c8_i32_28 = arith.constant 8 : i32
    %54 = arith.muli %c1_i32, %c8_i32_28 : i32
    %55 = tpu.assume_multiple %54, 8 : i32
    %c0_29 = arith.constant 0 : index
    %c0_30 = arith.constant 0 : index
    %56 = vector.load %arg3[%c0_29, %c0_30] : memref<128x512xf32, #tpu.memory_space<vmem>>, vector<128x512xf32>
    %cst_31 = arith.constant dense<0.000000e+00> : vector<8x512xf32>
    %57 = tpu.matmul %49, %56, %cst_31 {dimension_numbers = #tpu.dot_dimension_numbers<[1], [0], [0], [1], [0, 0, 1, 1], [], []>} : vector<8x128xf32>, vector<128x512xf32>, vector<8x512xf32> -> vector<8x512xf32>
    %58 = arith.index_cast %55 : i32 to index
    %c0_32 = arith.constant 0 : index
    %59 = vector.load %arg8[%58, %c0_32] : memref<64x512xf32, #tpu.memory_space<vmem>>, vector<8x512xf32>
    %60 = arith.addf %57, %59 : vector<8x512xf32>
    %61 = vector.extract_strided_slice %60 {offsets = [0, 0], sizes = [8, 128], strides = [1, 1]} : vector<8x512xf32> to vector<8x128xf32>
    %cst_33 = arith.constant 5.000000e-01 : f32
    %62 = vector.broadcast %cst_33 : f32 to vector<8x128xf32>
    %63 = arith.mulf %62, %61 : vector<8x128xf32>
    %64 = math.tanh %63 : vector<8x128xf32>
    %cst_34 = arith.constant 5.000000e-01 : f32
    %65 = vector.broadcast %cst_34 : f32 to vector<8x128xf32>
    %66 = arith.mulf %65, %64 : vector<8x128xf32>
    %cst_35 = arith.constant 5.000000e-01 : f32
    %67 = vector.broadcast %cst_35 : f32 to vector<8x128xf32>
    %68 = arith.addf %66, %67 : vector<8x128xf32>
    %69 = vector.extract_strided_slice %60 {offsets = [0, 128], sizes = [8, 128], strides = [1, 1]} : vector<8x512xf32> to vector<8x128xf32>
    %cst_36 = arith.constant 5.000000e-01 : f32
    %70 = vector.broadcast %cst_36 : f32 to vector<8x128xf32>
    %71 = arith.mulf %70, %69 : vector<8x128xf32>
    %72 = math.tanh %71 : vector<8x128xf32>
    %cst_37 = arith.constant 5.000000e-01 : f32
    %73 = vector.broadcast %cst_37 : f32 to vector<8x128xf32>
    %74 = arith.mulf %73, %72 : vector<8x128xf32>
    %cst_38 = arith.constant 5.000000e-01 : f32
    %75 = vector.broadcast %cst_38 : f32 to vector<8x128xf32>
    %76 = arith.addf %74, %75 : vector<8x128xf32>
    %77 = vector.extract_strided_slice %60 {offsets = [0, 256], sizes = [8, 128], strides = [1, 1]} : vector<8x512xf32> to vector<8x128xf32>
    %78 = math.tanh %77 : vector<8x128xf32>
    %79 = vector.extract_strided_slice %60 {offsets = [0, 384], sizes = [8, 128], strides = [1, 1]} : vector<8x512xf32> to vector<8x128xf32>
    %cst_39 = arith.constant 5.000000e-01 : f32
    %80 = vector.broadcast %cst_39 : f32 to vector<8x128xf32>
    %81 = arith.mulf %80, %79 : vector<8x128xf32>
    %82 = math.tanh %81 : vector<8x128xf32>
    %cst_40 = arith.constant 5.000000e-01 : f32
    %83 = vector.broadcast %cst_40 : f32 to vector<8x128xf32>
    %84 = arith.mulf %83, %82 : vector<8x128xf32>
    %cst_41 = arith.constant 5.000000e-01 : f32
    %85 = vector.broadcast %cst_41 : f32 to vector<8x128xf32>
    %86 = arith.addf %84, %85 : vector<8x128xf32>
    %87 = arith.mulf %76, %47 : vector<8x128xf32>
    %88 = arith.mulf %68, %78 : vector<8x128xf32>
    %89 = arith.addf %87, %88 : vector<8x128xf32>
    %90 = math.tanh %89 : vector<8x128xf32>
    %91 = arith.mulf %86, %90 : vector<8x128xf32>
    %92 = arith.index_cast %c1_i32 : i32 to index
    %c0_42 = arith.constant 0 : index
    %c0_43 = arith.constant 0 : index
    %93 = vector.load %arg5[%92, %c0_42, %c0_43] : memref<8x8x128xf32, #tpu.memory_space<vmem>>, vector<1x8x128xf32>
    %94 = vector.shape_cast %93 : vector<1x8x128xf32> to vector<8x128xf32>
    %95 = vector.shape_cast %91 : vector<8x128xf32> to vector<1x8x128xf32>
    tpu.vector_store %arg5[%92, %c0_42, %c0_43], %95 {strides = array<i32>} : memref<8x8x128xf32, #tpu.memory_space<vmem>>, vector<1x8x128xf32>,
    %c2_i32 = arith.constant 2 : i32
    %c8_i32_44 = arith.constant 8 : i32
    %96 = arith.muli %c2_i32, %c8_i32_44 : i32
    %97 = tpu.assume_multiple %96, 8 : i32
    %c0_45 = arith.constant 0 : index
    %c0_46 = arith.constant 0 : index
    %98 = vector.load %arg3[%c0_45, %c0_46] : memref<128x512xf32, #tpu.memory_space<vmem>>, vector<128x512xf32>
    %cst_47 = arith.constant dense<0.000000e+00> : vector<8x512xf32>
    %99 = tpu.matmul %91, %98, %cst_47 {dimension_numbers = #tpu.dot_dimension_numbers<[1], [0], [0], [1], [0, 0, 1, 1], [], []>} : vector<8x128xf32>, vector<128x512xf32>, vector<8x512xf32> -> vector<8x512xf32>
    %100 = arith.index_cast %97 : i32 to index
    %c0_48 = arith.constant 0 : index
    %101 = vector.load %arg8[%100, %c0_48] : memref<64x512xf32, #tpu.memory_space<vmem>>, vector<8x512xf32>
    %102 = arith.addf %99, %101 : vector<8x512xf32>
    %103 = vector.extract_strided_slice %102 {offsets = [0, 0], sizes = [8, 128], strides = [1, 1]} : vector<8x512xf32> to vector<8x128xf32>
    %cst_49 = arith.constant 5.000000e-01 : f32
    %104 = vector.broadcast %cst_49 : f32 to vector<8x128xf32>
    %105 = arith.mulf %104, %103 : vector<8x128xf32>
    %106 = math.tanh %105 : vector<8x128xf32>
    %cst_50 = arith.constant 5.000000e-01 : f32
    %107 = vector.broadcast %cst_50 : f32 to vector<8x128xf32>
    %108 = arith.mulf %107, %106 : vector<8x128xf32>
    %cst_51 = arith.constant 5.000000e-01 : f32
    %109 = vector.broadcast %cst_51 : f32 to vector<8x128xf32>
    %110 = arith.addf %108, %109 : vector<8x128xf32>
    %111 = vector.extract_strided_slice %102 {offsets = [0, 128], sizes = [8, 128], strides = [1, 1]} : vector<8x512xf32> to vector<8x128xf32>
    %cst_52 = arith.constant 5.000000e-01 : f32
    %112 = vector.broadcast %cst_52 : f32 to vector<8x128xf32>
    %113 = arith.mulf %112, %111 : vector<8x128xf32>
    %114 = math.tanh %113 : vector<8x128xf32>
    %cst_53 = arith.constant 5.000000e-01 : f32
    %115 = vector.broadcast %cst_53 : f32 to vector<8x128xf32>
    %116 = arith.mulf %115, %114 : vector<8x128xf32>
    %cst_54 = arith.constant 5.000000e-01 : f32
    %117 = vector.broadcast %cst_54 : f32 to vector<8x128xf32>
    %118 = arith.addf %116, %117 : vector<8x128xf32>
    %119 = vector.extract_strided_slice %102 {offsets = [0, 256], sizes = [8, 128], strides = [1, 1]} : vector<8x512xf32> to vector<8x128xf32>
    %120 = math.tanh %119 : vector<8x128xf32>
    %121 = vector.extract_strided_slice %102 {offsets = [0, 384], sizes = [8, 128], strides = [1, 1]} : vector<8x512xf32> to vector<8x128xf32>
    %cst_55 = arith.constant 5.000000e-01 : f32
    %122 = vector.broadcast %cst_55 : f32 to vector<8x128xf32>
    %123 = arith.mulf %122, %121 : vector<8x128xf32>
    %124 = math.tanh %123 : vector<8x128xf32>
    %cst_56 = arith.constant 5.000000e-01 : f32
    %125 = vector.broadcast %cst_56 : f32 to vector<8x128xf32>
    %126 = arith.mulf %125, %124 : vector<8x128xf32>
    %cst_57 = arith.constant 5.000000e-01 : f32
    %127 = vector.broadcast %cst_57 : f32 to vector<8x128xf32>
    %128 = arith.addf %126, %127 : vector<8x128xf32>
    %129 = arith.mulf %118, %89 : vector<8x128xf32>
    %130 = arith.mulf %110, %120 : vector<8x128xf32>
    %131 = arith.addf %129, %130 : vector<8x128xf32>
    %132 = math.tanh %131 : vector<8x128xf32>
    %133 = arith.mulf %128, %132 : vector<8x128xf32>
    %134 = arith.index_cast %c2_i32 : i32 to index
    %c0_58 = arith.constant 0 : index
    %c0_59 = arith.constant 0 : index
    %135 = vector.load %arg5[%134, %c0_58, %c0_59] : memref<8x8x128xf32, #tpu.memory_space<vmem>>, vector<1x8x128xf32>
    %136 = vector.shape_cast %135 : vector<1x8x128xf32> to vector<8x128xf32>
    %137 = vector.shape_cast %133 : vector<8x128xf32> to vector<1x8x128xf32>
    tpu.vector_store %arg5[%134, %c0_58, %c0_59], %137 {strides = array<i32>} : memref<8x8x128xf32, #tpu.memory_space<vmem>>, vector<1x8x128xf32>,
    %c3_i32 = arith.constant 3 : i32
    %c8_i32_60 = arith.constant 8 : i32
    %138 = arith.muli %c3_i32, %c8_i32_60 : i32
    %139 = tpu.assume_multiple %138, 8 : i32
    %c0_61 = arith.constant 0 : index
    %c0_62 = arith.constant 0 : index
    %140 = vector.load %arg3[%c0_61, %c0_62] : memref<128x512xf32, #tpu.memory_space<vmem>>, vector<128x512xf32>
    %cst_63 = arith.constant dense<0.000000e+00> : vector<8x512xf32>
    %141 = tpu.matmul %133, %140, %cst_63 {dimension_numbers = #tpu.dot_dimension_numbers<[1], [0], [0], [1], [0, 0, 1, 1], [], []>} : vector<8x128xf32>, vector<128x512xf32>, vector<8x512xf32> -> vector<8x512xf32>
    %142 = arith.index_cast %139 : i32 to index
    %c0_64 = arith.constant 0 : index
    %143 = vector.load %arg8[%142, %c0_64] : memref<64x512xf32, #tpu.memory_space<vmem>>, vector<8x512xf32>
    %144 = arith.addf %141, %143 : vector<8x512xf32>
    %145 = vector.extract_strided_slice %144 {offsets = [0, 0], sizes = [8, 128], strides = [1, 1]} : vector<8x512xf32> to vector<8x128xf32>
    %cst_65 = arith.constant 5.000000e-01 : f32
    %146 = vector.broadcast %cst_65 : f32 to vector<8x128xf32>
    %147 = arith.mulf %146, %145 : vector<8x128xf32>
    %148 = math.tanh %147 : vector<8x128xf32>
    %cst_66 = arith.constant 5.000000e-01 : f32
    %149 = vector.broadcast %cst_66 : f32 to vector<8x128xf32>
    %150 = arith.mulf %149, %148 : vector<8x128xf32>
    %cst_67 = arith.constant 5.000000e-01 : f32
    %151 = vector.broadcast %cst_67 : f32 to vector<8x128xf32>
    %152 = arith.addf %150, %151 : vector<8x128xf32>
    %153 = vector.extract_strided_slice %144 {offsets = [0, 128], sizes = [8, 128], strides = [1, 1]} : vector<8x512xf32> to vector<8x128xf32>
    %cst_68 = arith.constant 5.000000e-01 : f32
    %154 = vector.broadcast %cst_68 : f32 to vector<8x128xf32>
    %155 = arith.mulf %154, %153 : vector<8x128xf32>
    %156 = math.tanh %155 : vector<8x128xf32>
    %cst_69 = arith.constant 5.000000e-01 : f32
    %157 = vector.broadcast %cst_69 : f32 to vector<8x128xf32>
    %158 = arith.mulf %157, %156 : vector<8x128xf32>
    %cst_70 = arith.constant 5.000000e-01 : f32
    %159 = vector.broadcast %cst_70 : f32 to vector<8x128xf32>
    %160 = arith.addf %158, %159 : vector<8x128xf32>
    %161 = vector.extract_strided_slice %144 {offsets = [0, 256], sizes = [8, 128], strides = [1, 1]} : vector<8x512xf32> to vector<8x128xf32>
    %162 = math.tanh %161 : vector<8x128xf32>
    %163 = vector.extract_strided_slice %144 {offsets = [0, 384], sizes = [8, 128], strides = [1, 1]} : vector<8x512xf32> to vector<8x128xf32>
    %cst_71 = arith.constant 5.000000e-01 : f32
    %164 = vector.broadcast %cst_71 : f32 to vector<8x128xf32>
    %165 = arith.mulf %164, %163 : vector<8x128xf32>
    %166 = math.tanh %165 : vector<8x128xf32>
    %cst_72 = arith.constant 5.000000e-01 : f32
    %167 = vector.broadcast %cst_72 : f32 to vector<8x128xf32>
    %168 = arith.mulf %167, %166 : vector<8x128xf32>
    %cst_73 = arith.constant 5.000000e-01 : f32
    %169 = vector.broadcast %cst_73 : f32 to vector<8x128xf32>
    %170 = arith.addf %168, %169 : vector<8x128xf32>
    %171 = arith.mulf %160, %131 : vector<8x128xf32>
    %172 = arith.mulf %152, %162 : vector<8x128xf32>
    %173 = arith.addf %171, %172 : vector<8x128xf32>
    %174 = math.tanh %173 : vector<8x128xf32>
    %175 = arith.mulf %170, %174 : vector<8x128xf32>
    %176 = arith.index_cast %c3_i32 : i32 to index
    %c0_74 = arith.constant 0 : index
    %c0_75 = arith.constant 0 : index
    %177 = vector.load %arg5[%176, %c0_74, %c0_75] : memref<8x8x128xf32, #tpu.memory_space<vmem>>, vector<1x8x128xf32>
    %178 = vector.shape_cast %177 : vector<1x8x128xf32> to vector<8x128xf32>
    %179 = vector.shape_cast %175 : vector<8x128xf32> to vector<1x8x128xf32>
    tpu.vector_store %arg5[%176, %c0_74, %c0_75], %179 {strides = array<i32>} : memref<8x8x128xf32, #tpu.memory_space<vmem>>, vector<1x8x128xf32>,
    %c4_i32 = arith.constant 4 : i32
    %c8_i32_76 = arith.constant 8 : i32
    %180 = arith.muli %c4_i32, %c8_i32_76 : i32
    %181 = tpu.assume_multiple %180, 8 : i32
    %c0_77 = arith.constant 0 : index
    %c0_78 = arith.constant 0 : index
    %182 = vector.load %arg3[%c0_77, %c0_78] : memref<128x512xf32, #tpu.memory_space<vmem>>, vector<128x512xf32>
    %cst_79 = arith.constant dense<0.000000e+00> : vector<8x512xf32>
    %183 = tpu.matmul %175, %182, %cst_79 {dimension_numbers = #tpu.dot_dimension_numbers<[1], [0], [0], [1], [0, 0, 1, 1], [], []>} : vector<8x128xf32>, vector<128x512xf32>, vector<8x512xf32> -> vector<8x512xf32>
    %184 = arith.index_cast %181 : i32 to index
    %c0_80 = arith.constant 0 : index
    %185 = vector.load %arg8[%184, %c0_80] : memref<64x512xf32, #tpu.memory_space<vmem>>, vector<8x512xf32>
    %186 = arith.addf %183, %185 : vector<8x512xf32>
    %187 = vector.extract_strided_slice %186 {offsets = [0, 0], sizes = [8, 128], strides = [1, 1]} : vector<8x512xf32> to vector<8x128xf32>
    %cst_81 = arith.constant 5.000000e-01 : f32
    %188 = vector.broadcast %cst_81 : f32 to vector<8x128xf32>
    %189 = arith.mulf %188, %187 : vector<8x128xf32>
    %190 = math.tanh %189 : vector<8x128xf32>
    %cst_82 = arith.constant 5.000000e-01 : f32
    %191 = vector.broadcast %cst_82 : f32 to vector<8x128xf32>
    %192 = arith.mulf %191, %190 : vector<8x128xf32>
    %cst_83 = arith.constant 5.000000e-01 : f32
    %193 = vector.broadcast %cst_83 : f32 to vector<8x128xf32>
    %194 = arith.addf %192, %193 : vector<8x128xf32>
    %195 = vector.extract_strided_slice %186 {offsets = [0, 128], sizes = [8, 128], strides = [1, 1]} : vector<8x512xf32> to vector<8x128xf32>
    %cst_84 = arith.constant 5.000000e-01 : f32
    %196 = vector.broadcast %cst_84 : f32 to vector<8x128xf32>
    %197 = arith.mulf %196, %195 : vector<8x128xf32>
    %198 = math.tanh %197 : vector<8x128xf32>
    %cst_85 = arith.constant 5.000000e-01 : f32
    %199 = vector.broadcast %cst_85 : f32 to vector<8x128xf32>
    %200 = arith.mulf %199, %198 : vector<8x128xf32>
    %cst_86 = arith.constant 5.000000e-01 : f32
    %201 = vector.broadcast %cst_86 : f32 to vector<8x128xf32>
    %202 = arith.addf %200, %201 : vector<8x128xf32>
    %203 = vector.extract_strided_slice %186 {offsets = [0, 256], sizes = [8, 128], strides = [1, 1]} : vector<8x512xf32> to vector<8x128xf32>
    %204 = math.tanh %203 : vector<8x128xf32>
    %205 = vector.extract_strided_slice %186 {offsets = [0, 384], sizes = [8, 128], strides = [1, 1]} : vector<8x512xf32> to vector<8x128xf32>
    %cst_87 = arith.constant 5.000000e-01 : f32
    %206 = vector.broadcast %cst_87 : f32 to vector<8x128xf32>
    %207 = arith.mulf %206, %205 : vector<8x128xf32>
    %208 = math.tanh %207 : vector<8x128xf32>
    %cst_88 = arith.constant 5.000000e-01 : f32
    %209 = vector.broadcast %cst_88 : f32 to vector<8x128xf32>
    %210 = arith.mulf %209, %208 : vector<8x128xf32>
    %cst_89 = arith.constant 5.000000e-01 : f32
    %211 = vector.broadcast %cst_89 : f32 to vector<8x128xf32>
    %212 = arith.addf %210, %211 : vector<8x128xf32>
    %213 = arith.mulf %202, %173 : vector<8x128xf32>
    %214 = arith.mulf %194, %204 : vector<8x128xf32>
    %215 = arith.addf %213, %214 : vector<8x128xf32>
    %216 = math.tanh %215 : vector<8x128xf32>
    %217 = arith.mulf %212, %216 : vector<8x128xf32>
    %218 = arith.index_cast %c4_i32 : i32 to index
    %c0_90 = arith.constant 0 : index
    %c0_91 = arith.constant 0 : index
    %219 = vector.load %arg5[%218, %c0_90, %c0_91] : memref<8x8x128xf32, #tpu.memory_space<vmem>>, vector<1x8x128xf32>
    %220 = vector.shape_cast %219 : vector<1x8x128xf32> to vector<8x128xf32>
    %221 = vector.shape_cast %217 : vector<8x128xf32> to vector<1x8x128xf32>
    tpu.vector_store %arg5[%218, %c0_90, %c0_91], %221 {strides = array<i32>} : memref<8x8x128xf32, #tpu.memory_space<vmem>>, vector<1x8x128xf32>,
    %c5_i32 = arith.constant 5 : i32
    %c8_i32_92 = arith.constant 8 : i32
    %222 = arith.muli %c5_i32, %c8_i32_92 : i32
    %223 = tpu.assume_multiple %222, 8 : i32
    %c0_93 = arith.constant 0 : index
    %c0_94 = arith.constant 0 : index
    %224 = vector.load %arg3[%c0_93, %c0_94] : memref<128x512xf32, #tpu.memory_space<vmem>>, vector<128x512xf32>
    %cst_95 = arith.constant dense<0.000000e+00> : vector<8x512xf32>
    %225 = tpu.matmul %217, %224, %cst_95 {dimension_numbers = #tpu.dot_dimension_numbers<[1], [0], [0], [1], [0, 0, 1, 1], [], []>} : vector<8x128xf32>, vector<128x512xf32>, vector<8x512xf32> -> vector<8x512xf32>
    %226 = arith.index_cast %223 : i32 to index
    %c0_96 = arith.constant 0 : index
    %227 = vector.load %arg8[%226, %c0_96] : memref<64x512xf32, #tpu.memory_space<vmem>>, vector<8x512xf32>
    %228 = arith.addf %225, %227 : vector<8x512xf32>
    %229 = vector.extract_strided_slice %228 {offsets = [0, 0], sizes = [8, 128], strides = [1, 1]} : vector<8x512xf32> to vector<8x128xf32>
    %cst_97 = arith.constant 5.000000e-01 : f32
    %230 = vector.broadcast %cst_97 : f32 to vector<8x128xf32>
    %231 = arith.mulf %230, %229 : vector<8x128xf32>
    %232 = math.tanh %231 : vector<8x128xf32>
    %cst_98 = arith.constant 5.000000e-01 : f32
    %233 = vector.broadcast %cst_98 : f32 to vector<8x128xf32>
    %234 = arith.mulf %233, %232 : vector<8x128xf32>
    %cst_99 = arith.constant 5.000000e-01 : f32
    %235 = vector.broadcast %cst_99 : f32 to vector<8x128xf32>
    %236 = arith.addf %234, %235 : vector<8x128xf32>
    %237 = vector.extract_strided_slice %228 {offsets = [0, 128], sizes = [8, 128], strides = [1, 1]} : vector<8x512xf32> to vector<8x128xf32>
    %cst_100 = arith.constant 5.000000e-01 : f32
    %238 = vector.broadcast %cst_100 : f32 to vector<8x128xf32>
    %239 = arith.mulf %238, %237 : vector<8x128xf32>
    %240 = math.tanh %239 : vector<8x128xf32>
    %cst_101 = arith.constant 5.000000e-01 : f32
    %241 = vector.broadcast %cst_101 : f32 to vector<8x128xf32>
    %242 = arith.mulf %241, %240 : vector<8x128xf32>
    %cst_102 = arith.constant 5.000000e-01 : f32
    %243 = vector.broadcast %cst_102 : f32 to vector<8x128xf32>
    %244 = arith.addf %242, %243 : vector<8x128xf32>
    %245 = vector.extract_strided_slice %228 {offsets = [0, 256], sizes = [8, 128], strides = [1, 1]} : vector<8x512xf32> to vector<8x128xf32>
    %246 = math.tanh %245 : vector<8x128xf32>
    %247 = vector.extract_strided_slice %228 {offsets = [0, 384], sizes = [8, 128], strides = [1, 1]} : vector<8x512xf32> to vector<8x128xf32>
    %cst_103 = arith.constant 5.000000e-01 : f32
    %248 = vector.broadcast %cst_103 : f32 to vector<8x128xf32>
    %249 = arith.mulf %248, %247 : vector<8x128xf32>
    %250 = math.tanh %249 : vector<8x128xf32>
    %cst_104 = arith.constant 5.000000e-01 : f32
    %251 = vector.broadcast %cst_104 : f32 to vector<8x128xf32>
    %252 = arith.mulf %251, %250 : vector<8x128xf32>
    %cst_105 = arith.constant 5.000000e-01 : f32
    %253 = vector.broadcast %cst_105 : f32 to vector<8x128xf32>
    %254 = arith.addf %252, %253 : vector<8x128xf32>
    %255 = arith.mulf %244, %215 : vector<8x128xf32>
    %256 = arith.mulf %236, %246 : vector<8x128xf32>
    %257 = arith.addf %255, %256 : vector<8x128xf32>
    %258 = math.tanh %257 : vector<8x128xf32>
    %259 = arith.mulf %254, %258 : vector<8x128xf32>
    %260 = arith.index_cast %c5_i32 : i32 to index
    %c0_106 = arith.constant 0 : index
    %c0_107 = arith.constant 0 : index
    %261 = vector.load %arg5[%260, %c0_106, %c0_107] : memref<8x8x128xf32, #tpu.memory_space<vmem>>, vector<1x8x128xf32>
    %262 = vector.shape_cast %261 : vector<1x8x128xf32> to vector<8x128xf32>
    %263 = vector.shape_cast %259 : vector<8x128xf32> to vector<1x8x128xf32>
    tpu.vector_store %arg5[%260, %c0_106, %c0_107], %263 {strides = array<i32>} : memref<8x8x128xf32, #tpu.memory_space<vmem>>, vector<1x8x128xf32>,
    %c6_i32 = arith.constant 6 : i32
    %c8_i32_108 = arith.constant 8 : i32
    %264 = arith.muli %c6_i32, %c8_i32_108 : i32
    %265 = tpu.assume_multiple %264, 8 : i32
    %c0_109 = arith.constant 0 : index
    %c0_110 = arith.constant 0 : index
    %266 = vector.load %arg3[%c0_109, %c0_110] : memref<128x512xf32, #tpu.memory_space<vmem>>, vector<128x512xf32>
    %cst_111 = arith.constant dense<0.000000e+00> : vector<8x512xf32>
    %267 = tpu.matmul %259, %266, %cst_111 {dimension_numbers = #tpu.dot_dimension_numbers<[1], [0], [0], [1], [0, 0, 1, 1], [], []>} : vector<8x128xf32>, vector<128x512xf32>, vector<8x512xf32> -> vector<8x512xf32>
    %268 = arith.index_cast %265 : i32 to index
    %c0_112 = arith.constant 0 : index
    %269 = vector.load %arg8[%268, %c0_112] : memref<64x512xf32, #tpu.memory_space<vmem>>, vector<8x512xf32>
    %270 = arith.addf %267, %269 : vector<8x512xf32>
    %271 = vector.extract_strided_slice %270 {offsets = [0, 0], sizes = [8, 128], strides = [1, 1]} : vector<8x512xf32> to vector<8x128xf32>
    %cst_113 = arith.constant 5.000000e-01 : f32
    %272 = vector.broadcast %cst_113 : f32 to vector<8x128xf32>
    %273 = arith.mulf %272, %271 : vector<8x128xf32>
    %274 = math.tanh %273 : vector<8x128xf32>
    %cst_114 = arith.constant 5.000000e-01 : f32
    %275 = vector.broadcast %cst_114 : f32 to vector<8x128xf32>
    %276 = arith.mulf %275, %274 : vector<8x128xf32>
    %cst_115 = arith.constant 5.000000e-01 : f32
    %277 = vector.broadcast %cst_115 : f32 to vector<8x128xf32>
    %278 = arith.addf %276, %277 : vector<8x128xf32>
    %279 = vector.extract_strided_slice %270 {offsets = [0, 128], sizes = [8, 128], strides = [1, 1]} : vector<8x512xf32> to vector<8x128xf32>
    %cst_116 = arith.constant 5.000000e-01 : f32
    %280 = vector.broadcast %cst_116 : f32 to vector<8x128xf32>
    %281 = arith.mulf %280, %279 : vector<8x128xf32>
    %282 = math.tanh %281 : vector<8x128xf32>
    %cst_117 = arith.constant 5.000000e-01 : f32
    %283 = vector.broadcast %cst_117 : f32 to vector<8x128xf32>
    %284 = arith.mulf %283, %282 : vector<8x128xf32>
    %cst_118 = arith.constant 5.000000e-01 : f32
    %285 = vector.broadcast %cst_118 : f32 to vector<8x128xf32>
    %286 = arith.addf %284, %285 : vector<8x128xf32>
    %287 = vector.extract_strided_slice %270 {offsets = [0, 256], sizes = [8, 128], strides = [1, 1]} : vector<8x512xf32> to vector<8x128xf32>
    %288 = math.tanh %287 : vector<8x128xf32>
    %289 = vector.extract_strided_slice %270 {offsets = [0, 384], sizes = [8, 128], strides = [1, 1]} : vector<8x512xf32> to vector<8x128xf32>
    %cst_119 = arith.constant 5.000000e-01 : f32
    %290 = vector.broadcast %cst_119 : f32 to vector<8x128xf32>
    %291 = arith.mulf %290, %289 : vector<8x128xf32>
    %292 = math.tanh %291 : vector<8x128xf32>
    %cst_120 = arith.constant 5.000000e-01 : f32
    %293 = vector.broadcast %cst_120 : f32 to vector<8x128xf32>
    %294 = arith.mulf %293, %292 : vector<8x128xf32>
    %cst_121 = arith.constant 5.000000e-01 : f32
    %295 = vector.broadcast %cst_121 : f32 to vector<8x128xf32>
    %296 = arith.addf %294, %295 : vector<8x128xf32>
    %297 = arith.mulf %286, %257 : vector<8x128xf32>
    %298 = arith.mulf %278, %288 : vector<8x128xf32>
    %299 = arith.addf %297, %298 : vector<8x128xf32>
    %300 = math.tanh %299 : vector<8x128xf32>
    %301 = arith.mulf %296, %300 : vector<8x128xf32>
    %302 = arith.index_cast %c6_i32 : i32 to index
    %c0_122 = arith.constant 0 : index
    %c0_123 = arith.constant 0 : index
    %303 = vector.load %arg5[%302, %c0_122, %c0_123] : memref<8x8x128xf32, #tpu.memory_space<vmem>>, vector<1x8x128xf32>
    %304 = vector.shape_cast %303 : vector<1x8x128xf32> to vector<8x128xf32>
    %305 = vector.shape_cast %301 : vector<8x128xf32> to vector<1x8x128xf32>
    tpu.vector_store %arg5[%302, %c0_122, %c0_123], %305 {strides = array<i32>} : memref<8x8x128xf32, #tpu.memory_space<vmem>>, vector<1x8x128xf32>,
    %c7_i32 = arith.constant 7 : i32
    %c8_i32_124 = arith.constant 8 : i32
    %306 = arith.muli %c7_i32, %c8_i32_124 : i32
    %307 = tpu.assume_multiple %306, 8 : i32
    %c0_125 = arith.constant 0 : index
    %c0_126 = arith.constant 0 : index
    %308 = vector.load %arg3[%c0_125, %c0_126] : memref<128x512xf32, #tpu.memory_space<vmem>>, vector<128x512xf32>
    %cst_127 = arith.constant dense<0.000000e+00> : vector<8x512xf32>
    %309 = tpu.matmul %301, %308, %cst_127 {dimension_numbers = #tpu.dot_dimension_numbers<[1], [0], [0], [1], [0, 0, 1, 1], [], []>} : vector<8x128xf32>, vector<128x512xf32>, vector<8x512xf32> -> vector<8x512xf32>
    %310 = arith.index_cast %307 : i32 to index
    %c0_128 = arith.constant 0 : index
    %311 = vector.load %arg8[%310, %c0_128] : memref<64x512xf32, #tpu.memory_space<vmem>>, vector<8x512xf32>
    %312 = arith.addf %309, %311 : vector<8x512xf32>
    %313 = vector.extract_strided_slice %312 {offsets = [0, 0], sizes = [8, 128], strides = [1, 1]} : vector<8x512xf32> to vector<8x128xf32>
    %cst_129 = arith.constant 5.000000e-01 : f32
    %314 = vector.broadcast %cst_129 : f32 to vector<8x128xf32>
    %315 = arith.mulf %314, %313 : vector<8x128xf32>
    %316 = math.tanh %315 : vector<8x128xf32>
    %cst_130 = arith.constant 5.000000e-01 : f32
    %317 = vector.broadcast %cst_130 : f32 to vector<8x128xf32>
    %318 = arith.mulf %317, %316 : vector<8x128xf32>
    %cst_131 = arith.constant 5.000000e-01 : f32
    %319 = vector.broadcast %cst_131 : f32 to vector<8x128xf32>
    %320 = arith.addf %318, %319 : vector<8x128xf32>
    %321 = vector.extract_strided_slice %312 {offsets = [0, 128], sizes = [8, 128], strides = [1, 1]} : vector<8x512xf32> to vector<8x128xf32>
    %cst_132 = arith.constant 5.000000e-01 : f32
    %322 = vector.broadcast %cst_132 : f32 to vector<8x128xf32>
    %323 = arith.mulf %322, %321 : vector<8x128xf32>
    %324 = math.tanh %323 : vector<8x128xf32>
    %cst_133 = arith.constant 5.000000e-01 : f32
    %325 = vector.broadcast %cst_133 : f32 to vector<8x128xf32>
    %326 = arith.mulf %325, %324 : vector<8x128xf32>
    %cst_134 = arith.constant 5.000000e-01 : f32
    %327 = vector.broadcast %cst_134 : f32 to vector<8x128xf32>
    %328 = arith.addf %326, %327 : vector<8x128xf32>
    %329 = vector.extract_strided_slice %312 {offsets = [0, 256], sizes = [8, 128], strides = [1, 1]} : vector<8x512xf32> to vector<8x128xf32>
    %330 = math.tanh %329 : vector<8x128xf32>
    %331 = vector.extract_strided_slice %312 {offsets = [0, 384], sizes = [8, 128], strides = [1, 1]} : vector<8x512xf32> to vector<8x128xf32>
    %cst_135 = arith.constant 5.000000e-01 : f32
    %332 = vector.broadcast %cst_135 : f32 to vector<8x128xf32>
    %333 = arith.mulf %332, %331 : vector<8x128xf32>
    %334 = math.tanh %333 : vector<8x128xf32>
    %cst_136 = arith.constant 5.000000e-01 : f32
    %335 = vector.broadcast %cst_136 : f32 to vector<8x128xf32>
    %336 = arith.mulf %335, %334 : vector<8x128xf32>
    %cst_137 = arith.constant 5.000000e-01 : f32
    %337 = vector.broadcast %cst_137 : f32 to vector<8x128xf32>
    %338 = arith.addf %336, %337 : vector<8x128xf32>
    %339 = arith.mulf %328, %299 : vector<8x128xf32>
    %340 = arith.mulf %320, %330 : vector<8x128xf32>
    %341 = arith.addf %339, %340 : vector<8x128xf32>
    %342 = math.tanh %341 : vector<8x128xf32>
    %343 = arith.mulf %338, %342 : vector<8x128xf32>
    %344 = arith.index_cast %c7_i32 : i32 to index
    %c0_138 = arith.constant 0 : index
    %c0_139 = arith.constant 0 : index
    %345 = vector.load %arg5[%344, %c0_138, %c0_139] : memref<8x8x128xf32, #tpu.memory_space<vmem>>, vector<1x8x128xf32>
    %346 = vector.shape_cast %345 : vector<1x8x128xf32> to vector<8x128xf32>
    %347 = vector.shape_cast %343 : vector<8x128xf32> to vector<1x8x128xf32>
    tpu.vector_store %arg5[%344, %c0_138, %c0_139], %347 {strides = array<i32>} : memref<8x8x128xf32, #tpu.memory_space<vmem>>, vector<1x8x128xf32>,
    %c8_i32_140 = arith.constant 8 : i32
    %c0_141 = arith.constant 0 : index
    %c0_142 = arith.constant 0 : index
    %348 = vector.load %arg9[%c0_141, %c0_142] : memref<8x128xf32, #tpu.memory_space<vmem>>, vector<8x128xf32>
    tpu.vector_store %arg9[%c0_141, %c0_142], %343 {strides = array<i32>} : memref<8x128xf32, #tpu.memory_space<vmem>>, vector<8x128xf32>,
    %c0_143 = arith.constant 0 : index
    %c0_144 = arith.constant 0 : index
    %349 = vector.load %arg10[%c0_143, %c0_144] : memref<8x128xf32, #tpu.memory_space<vmem>>, vector<8x128xf32>
    tpu.vector_store %arg10[%c0_143, %c0_144], %341 {strides = array<i32>} : memref<8x128xf32, #tpu.memory_space<vmem>>, vector<8x128xf32>,
    %c0_i32_145 = arith.constant 0 : i32
    %350 = arith.cmpi eq, %arg0, %c0_i32_145 : i32
    %351 = arith.extui %350 : i1 to i32
    %c0_i32_146 = arith.constant 0 : i32
    %352 = arith.cmpi ne, %351, %c0_i32_146 : i32
    scf.if %352 {
      %c0_147 = arith.constant 0 : index
      %c0_148 = arith.constant 0 : index
      %353 = vector.load %arg6[%c0_147, %c0_148] : memref<8x128xf32, #tpu.memory_space<vmem>>, vector<8x128xf32>
      tpu.vector_store %arg6[%c0_147, %c0_148], %343 {strides = array<i32>} : memref<8x128xf32, #tpu.memory_space<vmem>>, vector<8x128xf32>,
      %c0_149 = arith.constant 0 : index
      %c0_150 = arith.constant 0 : index
      %354 = vector.load %arg7[%c0_149, %c0_150] : memref<8x128xf32, #tpu.memory_space<vmem>>, vector<8x128xf32>
      tpu.vector_store %arg7[%c0_149, %c0_150], %341 {strides = array<i32>} : memref<8x128xf32, #tpu.memory_space<vmem>>, vector<8x128xf32>,
    } else {
    }
    return
  }
  func.func @transform_0(%arg0: i32) -> (i32, i32) {
    %c0_i32 = arith.constant 0 : i32
    %c0_i32_0 = arith.constant 0 : i32
    return %arg0, %c0_i32 : i32, i32
  }
  func.func @transform_1(%arg0: i32) -> (i32, i32) {
    %c0_i32 = arith.constant 0 : i32
    %c0_i32_0 = arith.constant 0 : i32
    %c0_i32_1 = arith.constant 0 : i32
    return %c0_i32, %c0_i32_0 : i32, i32
  }
  func.func @transform_2(%arg0: i32) -> (i32, i32) {
    %c0_i32 = arith.constant 0 : i32
    %c0_i32_0 = arith.constant 0 : i32
    %c0_i32_1 = arith.constant 0 : i32
    return %c0_i32, %c0_i32_0 : i32, i32
  }
  func.func @transform_3(%arg0: i32) -> (i32, i32) {
    %c0_i32 = arith.constant 0 : i32
    %c0_i32_0 = arith.constant 0 : i32
    %c0_i32_1 = arith.constant 0 : i32
    return %c0_i32, %c0_i32_0 : i32, i32
  }
  func.func @transform_4(%arg0: i32) -> (i32, i32, i32) {
    %c0_i32 = arith.constant 0 : i32
    %c0_i32_0 = arith.constant 0 : i32
    %c0_i32_1 = arith.constant 0 : i32
    return %arg0, %c0_i32, %c0_i32_0 : i32, i32, i32
  }
  func.func @transform_5(%arg0: i32) -> (i32, i32) {
    %c0_i32 = arith.constant 0 : i32
    %c0_i32_0 = arith.constant 0 : i32
    %c0_i32_1 = arith.constant 0 : i32
    return %c0_i32, %c0_i32_0 : i32, i32
  }
  func.func @transform_6(%arg0: i32) -> (i32, i32) {
    %c0_i32 = arith.constant 0 : i32
    %c0_i32_0 = arith.constant 0 : i32
    %c0_i32_1 = arith.constant 0 : i32
    return %c0_i32, %c0_i32_0 : i32, i32
  }
}

module attributes {stable_mosaic.version = 11 : i64} {
  func.func @_lstm_layer_kernel(%arg0: i32, %arg1: memref<64x16xf32, #tpu.memory_space<vmem>>, %arg2: memref<16x512xf32, #tpu.memory_space<vmem>>, %arg3: memref<128x512xf32, #tpu.memory_space<vmem>>, %arg4: memref<1x512xf32, #tpu.memory_space<vmem>>, %arg5: memref<8x8x128xf32, #tpu.memory_space<vmem>>, %arg6: memref<8x128xf32, #tpu.memory_space<vmem>>, %arg7: memref<8x128xf32, #tpu.memory_space<vmem>>, %arg8: memref<64x512xf32, #tpu.memory_space<vmem>>, %arg9: memref<8x128xf32, #tpu.memory_space<vmem>>, %arg10: memref<8x128xf32, #tpu.memory_space<vmem>>) attributes {dimension_semantics = [#tpu.dimension_semantics<arbitrary>], iteration_bounds = array<i64: 1>, scalar_prefetch = 0 : i64, scratch_operands = 3 : i64, tpu.core_type = #tpu.core_type<tc>, window_params = [{transform_indices = @transform_0, window_bounds = array<i64: 64, 16>}, {pipeline_mode = #tpu.pipeline_mode<synchronous>, transform_indices = @transform_1, window_bounds = array<i64: 16, 512>}, {pipeline_mode = #tpu.pipeline_mode<synchronous>, transform_indices = @transform_2, window_bounds = array<i64: 128, 512>}, {pipeline_mode = #tpu.pipeline_mode<synchronous>, transform_indices = @transform_3, window_bounds = array<i64: 1, 512>}, {transform_indices = @transform_4, window_bounds = array<i64: 8, 8, 128>}, {pipeline_mode = #tpu.pipeline_mode<synchronous>, transform_indices = @transform_5, window_bounds = array<i64: 8, 128>}, {pipeline_mode = #tpu.pipeline_mode<synchronous>, transform_indices = @transform_6, window_bounds = array<i64: 8, 128>}]} {
    %c0_i32 = arith.constant 0 : i32
    %0 = arith.cmpi eq, %arg0, %c0_i32 : i32
    %1 = arith.extui %0 : i1 to i32
    %c0_i32_0 = arith.constant 0 : i32
    %2 = arith.cmpi ne, %1, %c0_i32_0 : i32
    scf.if %2 {
      %cst_147 = arith.constant 0.000000e+00 : f32
      %353 = vector.broadcast %cst_147 : f32 to vector<8x128xf32>
      %c0_148 = arith.constant 0 : index
      %c0_149 = arith.constant 0 : index
      %354 = vector.load %arg9[%c0_148, %c0_149] : memref<8x128xf32, #tpu.memory_space<vmem>>, vector<8x128xf32>
      tpu.vector_store %arg9[%c0_148, %c0_149], %353 {strides = array<i32>} : memref<8x128xf32, #tpu.memory_space<vmem>>, vector<8x128xf32>,
      %cst_150 = arith.constant 0.000000e+00 : f32
      %355 = vector.broadcast %cst_150 : f32 to vector<8x128xf32>
      %c0_151 = arith.constant 0 : index
      %c0_152 = arith.constant 0 : index
      %356 = vector.load %arg10[%c0_151, %c0_152] : memref<8x128xf32, #tpu.memory_space<vmem>>, vector<8x128xf32>
      tpu.vector_store %arg10[%c0_151, %c0_152], %355 {strides = array<i32>} : memref<8x128xf32, #tpu.memory_space<vmem>>, vector<8x128xf32>,
    } else {
    }
    %c0 = arith.constant 0 : index
    %c0_1 = arith.constant 0 : index
    %3 = vector.load %arg1[%c0, %c0_1] : memref<64x16xf32, #tpu.memory_space<vmem>>, vector<64x16xf32>
    %c0_2 = arith.constant 0 : index
    %c0_3 = arith.constant 0 : index
    %4 = vector.load %arg2[%c0_2, %c0_3] : memref<16x512xf32, #tpu.memory_space<vmem>>, vector<16x512xf32>
    %cst = arith.constant dense<0.000000e+00> : vector<64x512xf32>
    %5 = tpu.matmul %3, %4, %cst {dimension_numbers = #tpu.dot_dimension_numbers<[1], [0], [0], [1], [0, 0, 1, 1], [], []>} : vector<64x16xf32>, vector<16x512xf32>, vector<64x512xf32> -> vector<64x512xf32>
    %c0_4 = arith.constant 0 : index
    %c0_5 = arith.constant 0 : index
    %6 = vector.load %arg4[%c0_4, %c0_5] : memref<1x512xf32, #tpu.memory_space<vmem>>, vector<1x512xf32>
    %7 = vector.broadcast %6 : vector<1x512xf32> to vector<64x512xf32>
    %8 = arith.addf %5, %7 : vector<64x512xf32>
    %c0_6 = arith.constant 0 : index
    %c0_7 = arith.constant 0 : index
    %9 = vector.load %arg8[%c0_6, %c0_7] : memref<64x512xf32, #tpu.memory_space<vmem>>, vector<64x512xf32>
    tpu.vector_store %arg8[%c0_6, %c0_7], %8 {strides = array<i32>} : memref<64x512xf32, #tpu.memory_space<vmem>>, vector<64x512xf32>,
    %c0_8 = arith.constant 0 : index
    %c0_9 = arith.constant 0 : index
    %10 = vector.load %arg9[%c0_8, %c0_9] : memref<8x128xf32, #tpu.memory_space<vmem>>, vector<8x128xf32>
    %c0_10 = arith.constant 0 : index
    %c0_11 = arith.constant 0 : index
    %11 = vector.load %arg10[%c0_10, %c0_11] : memref<8x128xf32, #tpu.memory_space<vmem>>, vector<8x128xf32>
    %c0_i32_12 = arith.constant 0 : i32
    %c8_i32 = arith.constant 8 : i32
    %12 = arith.muli %c0_i32_12, %c8_i32 : i32
    %13 = tpu.assume_multiple %12, 8 : i32
    %c0_13 = arith.constant 0 : index
    %c0_14 = arith.constant 0 : index
    %14 = vector.load %arg3[%c0_13, %c0_14] : memref<128x512xf32, #tpu.memory_space<vmem>>, vector<128x512xf32>
    %cst_15 = arith.constant dense<0.000000e+00> : vector<8x512xf32>
    %15 = tpu.matmul %10, %14, %cst_15 {dimension_numbers = #tpu.dot_dimension_numbers<[1], [0], [0], [1], [0, 0, 1, 1], [], []>} : vector<8x128xf32>, vector<128x512xf32>, vector<8x512xf32> -> vector<8x512xf32>
    %16 = arith.index_cast %13 : i32 to index
    %c0_16 = arith.constant 0 : index
    %17 = vector.load %arg8[%16, %c0_16] : memref<64x512xf32, #tpu.memory_space<vmem>>, vector<8x512xf32>
    %18 = arith.addf %15, %17 : vector<8x512xf32>
    %19 = vector.extract_strided_slice %18 {offsets = [0, 0], sizes = [8, 128], strides = [1, 1]} : vector<8x512xf32> to vector<8x128xf32>
    %cst_17 = arith.constant 5.000000e-01 : f32
    %20 = vector.broadcast %cst_17 : f32 to vector<8x128xf32>
    %21 = arith.mulf %20, %19 : vector<8x128xf32>
    %22 = math.tanh %21 : vector<8x128xf32>
    %cst_18 = arith.constant 5.000000e-01 : f32
    %23 = vector.broadcast %cst_18 : f32 to vector<8x128xf32>
    %24 = arith.mulf %23, %22 : vector<8x128xf32>
    %cst_19 = arith.constant 5.000000e-01 : f32
    %25 = vector.broadcast %cst_19 : f32 to vector<8x128xf32>
    %26 = arith.addf %24, %25 : vector<8x128xf32>
    %27 = vector.extract_strided_slice %18 {offsets = [0, 128], sizes = [8, 128], strides = [1, 1]} : vector<8x512xf32> to vector<8x128xf32>
    %cst_20 = arith.constant 5.000000e-01 : f32
    %28 = vector.broadcast %cst_20 : f32 to vector<8x128xf32>
    %29 = arith.mulf %28, %27 : vector<8x128xf32>
    %30 = math.tanh %29 : vector<8x128xf32>
    %cst_21 = arith.constant 5.000000e-01 : f32
    %31 = vector.broadcast %cst_21 : f32 to vector<8x128xf32>
    %32 = arith.mulf %31, %30 : vector<8x128xf32>
    %cst_22 = arith.constant 5.000000e-01 : f32
    %33 = vector.broadcast %cst_22 : f32 to vector<8x128xf32>
    %34 = arith.addf %32, %33 : vector<8x128xf32>
    %35 = vector.extract_strided_slice %18 {offsets = [0, 256], sizes = [8, 128], strides = [1, 1]} : vector<8x512xf32> to vector<8x128xf32>
    %36 = math.tanh %35 : vector<8x128xf32>
    %37 = vector.extract_strided_slice %18 {offsets = [0, 384], sizes = [8, 128], strides = [1, 1]} : vector<8x512xf32> to vector<8x128xf32>
    %cst_23 = arith.constant 5.000000e-01 : f32
    %38 = vector.broadcast %cst_23 : f32 to vector<8x128xf32>
    %39 = arith.mulf %38, %37 : vector<8x128xf32>
    %40 = math.tanh %39 : vector<8x128xf32>
    %cst_24 = arith.constant 5.000000e-01 : f32
    %41 = vector.broadcast %cst_24 : f32 to vector<8x128xf32>
    %42 = arith.mulf %41, %40 : vector<8x128xf32>
    %cst_25 = arith.constant 5.000000e-01 : f32
    %43 = vector.broadcast %cst_25 : f32 to vector<8x128xf32>
    %44 = arith.addf %42, %43 : vector<8x128xf32>
    %45 = arith.mulf %34, %11 : vector<8x128xf32>
    %46 = arith.mulf %26, %36 : vector<8x128xf32>
    %47 = arith.addf %45, %46 : vector<8x128xf32>
    %48 = math.tanh %47 : vector<8x128xf32>
    %49 = arith.mulf %44, %48 : vector<8x128xf32>
    %50 = arith.index_cast %c0_i32_12 : i32 to index
    %c0_26 = arith.constant 0 : index
    %c0_27 = arith.constant 0 : index
    %51 = vector.load %arg5[%50, %c0_26, %c0_27] : memref<8x8x128xf32, #tpu.memory_space<vmem>>, vector<1x8x128xf32>
    %52 = vector.shape_cast %51 : vector<1x8x128xf32> to vector<8x128xf32>
    %53 = vector.shape_cast %49 : vector<8x128xf32> to vector<1x8x128xf32>
    tpu.vector_store %arg5[%50, %c0_26, %c0_27], %53 {strides = array<i32>} : memref<8x8x128xf32, #tpu.memory_space<vmem>>, vector<1x8x128xf32>,
    %c1_i32 = arith.constant 1 : i32
    %c8_i32_28 = arith.constant 8 : i32
    %54 = arith.muli %c1_i32, %c8_i32_28 : i32
    %55 = tpu.assume_multiple %54, 8 : i32
    %c0_29 = arith.constant 0 : index
    %c0_30 = arith.constant 0 : index
    %56 = vector.load %arg3[%c0_29, %c0_30] : memref<128x512xf32, #tpu.memory_space<vmem>>, vector<128x512xf32>
    %cst_31 = arith.constant dense<0.000000e+00> : vector<8x512xf32>
    %57 = tpu.matmul %49, %56, %cst_31 {dimension_numbers = #tpu.dot_dimension_numbers<[1], [0], [0], [1], [0, 0, 1, 1], [], []>} : vector<8x128xf32>, vector<128x512xf32>, vector<8x512xf32> -> vector<8x512xf32>
    %58 = arith.index_cast %55 : i32 to index
    %c0_32 = arith.constant 0 : index
    %59 = vector.load %arg8[%58, %c0_32] : memref<64x512xf32, #tpu.memory_space<vmem>>, vector<8x512xf32>
    %60 = arith.addf %57, %59 : vector<8x512xf32>
    %61 = vector.extract_strided_slice %60 {offsets = [0, 0], sizes = [8, 128], strides = [1, 1]} : vector<8x512xf32> to vector<8x128xf32>
    %cst_33 = arith.constant 5.000000e-01 : f32
    %62 = vector.broadcast %cst_33 : f32 to vector<8x128xf32>
    %63 = arith.mulf %62, %61 : vector<8x128xf32>
    %64 = math.tanh %63 : vector<8x128xf32>
    %cst_34 = arith.constant 5.000000e-01 : f32
    %65 = vector.broadcast %cst_34 : f32 to vector<8x128xf32>
    %66 = arith.mulf %65, %64 : vector<8x128xf32>
    %cst_35 = arith.constant 5.000000e-01 : f32
    %67 = vector.broadcast %cst_35 : f32 to vector<8x128xf32>
    %68 = arith.addf %66, %67 : vector<8x128xf32>
    %69 = vector.extract_strided_slice %60 {offsets = [0, 128], sizes = [8, 128], strides = [1, 1]} : vector<8x512xf32> to vector<8x128xf32>
    %cst_36 = arith.constant 5.000000e-01 : f32
    %70 = vector.broadcast %cst_36 : f32 to vector<8x128xf32>
    %71 = arith.mulf %70, %69 : vector<8x128xf32>
    %72 = math.tanh %71 : vector<8x128xf32>
    %cst_37 = arith.constant 5.000000e-01 : f32
    %73 = vector.broadcast %cst_37 : f32 to vector<8x128xf32>
    %74 = arith.mulf %73, %72 : vector<8x128xf32>
    %cst_38 = arith.constant 5.000000e-01 : f32
    %75 = vector.broadcast %cst_38 : f32 to vector<8x128xf32>
    %76 = arith.addf %74, %75 : vector<8x128xf32>
    %77 = vector.extract_strided_slice %60 {offsets = [0, 256], sizes = [8, 128], strides = [1, 1]} : vector<8x512xf32> to vector<8x128xf32>
    %78 = math.tanh %77 : vector<8x128xf32>
    %79 = vector.extract_strided_slice %60 {offsets = [0, 384], sizes = [8, 128], strides = [1, 1]} : vector<8x512xf32> to vector<8x128xf32>
    %cst_39 = arith.constant 5.000000e-01 : f32
    %80 = vector.broadcast %cst_39 : f32 to vector<8x128xf32>
    %81 = arith.mulf %80, %79 : vector<8x128xf32>
    %82 = math.tanh %81 : vector<8x128xf32>
    %cst_40 = arith.constant 5.000000e-01 : f32
    %83 = vector.broadcast %cst_40 : f32 to vector<8x128xf32>
    %84 = arith.mulf %83, %82 : vector<8x128xf32>
    %cst_41 = arith.constant 5.000000e-01 : f32
    %85 = vector.broadcast %cst_41 : f32 to vector<8x128xf32>
    %86 = arith.addf %84, %85 : vector<8x128xf32>
    %87 = arith.mulf %76, %47 : vector<8x128xf32>
    %88 = arith.mulf %68, %78 : vector<8x128xf32>
    %89 = arith.addf %87, %88 : vector<8x128xf32>
    %90 = math.tanh %89 : vector<8x128xf32>
    %91 = arith.mulf %86, %90 : vector<8x128xf32>
    %92 = arith.index_cast %c1_i32 : i32 to index
    %c0_42 = arith.constant 0 : index
    %c0_43 = arith.constant 0 : index
    %93 = vector.load %arg5[%92, %c0_42, %c0_43] : memref<8x8x128xf32, #tpu.memory_space<vmem>>, vector<1x8x128xf32>
    %94 = vector.shape_cast %93 : vector<1x8x128xf32> to vector<8x128xf32>
    %95 = vector.shape_cast %91 : vector<8x128xf32> to vector<1x8x128xf32>
    tpu.vector_store %arg5[%92, %c0_42, %c0_43], %95 {strides = array<i32>} : memref<8x8x128xf32, #tpu.memory_space<vmem>>, vector<1x8x128xf32>,
    %c2_i32 = arith.constant 2 : i32
    %c8_i32_44 = arith.constant 8 : i32
    %96 = arith.muli %c2_i32, %c8_i32_44 : i32
    %97 = tpu.assume_multiple %96, 8 : i32
    %c0_45 = arith.constant 0 : index
    %c0_46 = arith.constant 0 : index
    %98 = vector.load %arg3[%c0_45, %c0_46] : memref<128x512xf32, #tpu.memory_space<vmem>>, vector<128x512xf32>
    %cst_47 = arith.constant dense<0.000000e+00> : vector<8x512xf32>
    %99 = tpu.matmul %91, %98, %cst_47 {dimension_numbers = #tpu.dot_dimension_numbers<[1], [0], [0], [1], [0, 0, 1, 1], [], []>} : vector<8x128xf32>, vector<128x512xf32>, vector<8x512xf32> -> vector<8x512xf32>
    %100 = arith.index_cast %97 : i32 to index
    %c0_48 = arith.constant 0 : index
    %101 = vector.load %arg8[%100, %c0_48] : memref<64x512xf32, #tpu.memory_space<vmem>>, vector<8x512xf32>
    %102 = arith.addf %99, %101 : vector<8x512xf32>
    %103 = vector.extract_strided_slice %102 {offsets = [0, 0], sizes = [8, 128], strides = [1, 1]} : vector<8x512xf32> to vector<8x128xf32>
    %cst_49 = arith.constant 5.000000e-01 : f32
    %104 = vector.broadcast %cst_49 : f32 to vector<8x128xf32>
    %105 = arith.mulf %104, %103 : vector<8x128xf32>
    %106 = math.tanh %105 : vector<8x128xf32>
    %cst_50 = arith.constant 5.000000e-01 : f32
    %107 = vector.broadcast %cst_50 : f32 to vector<8x128xf32>
    %108 = arith.mulf %107, %106 : vector<8x128xf32>
    %cst_51 = arith.constant 5.000000e-01 : f32
    %109 = vector.broadcast %cst_51 : f32 to vector<8x128xf32>
    %110 = arith.addf %108, %109 : vector<8x128xf32>
    %111 = vector.extract_strided_slice %102 {offsets = [0, 128], sizes = [8, 128], strides = [1, 1]} : vector<8x512xf32> to vector<8x128xf32>
    %cst_52 = arith.constant 5.000000e-01 : f32
    %112 = vector.broadcast %cst_52 : f32 to vector<8x128xf32>
    %113 = arith.mulf %112, %111 : vector<8x128xf32>
    %114 = math.tanh %113 : vector<8x128xf32>
    %cst_53 = arith.constant 5.000000e-01 : f32
    %115 = vector.broadcast %cst_53 : f32 to vector<8x128xf32>
    %116 = arith.mulf %115, %114 : vector<8x128xf32>
    %cst_54 = arith.constant 5.000000e-01 : f32
    %117 = vector.broadcast %cst_54 : f32 to vector<8x128xf32>
    %118 = arith.addf %116, %117 : vector<8x128xf32>
    %119 = vector.extract_strided_slice %102 {offsets = [0, 256], sizes = [8, 128], strides = [1, 1]} : vector<8x512xf32> to vector<8x128xf32>
    %120 = math.tanh %119 : vector<8x128xf32>
    %121 = vector.extract_strided_slice %102 {offsets = [0, 384], sizes = [8, 128], strides = [1, 1]} : vector<8x512xf32> to vector<8x128xf32>
    %cst_55 = arith.constant 5.000000e-01 : f32
    %122 = vector.broadcast %cst_55 : f32 to vector<8x128xf32>
    %123 = arith.mulf %122, %121 : vector<8x128xf32>
    %124 = math.tanh %123 : vector<8x128xf32>
    %cst_56 = arith.constant 5.000000e-01 : f32
    %125 = vector.broadcast %cst_56 : f32 to vector<8x128xf32>
    %126 = arith.mulf %125, %124 : vector<8x128xf32>
    %cst_57 = arith.constant 5.000000e-01 : f32
    %127 = vector.broadcast %cst_57 : f32 to vector<8x128xf32>
    %128 = arith.addf %126, %127 : vector<8x128xf32>
    %129 = arith.mulf %118, %89 : vector<8x128xf32>
    %130 = arith.mulf %110, %120 : vector<8x128xf32>
    %131 = arith.addf %129, %130 : vector<8x128xf32>
    %132 = math.tanh %131 : vector<8x128xf32>
    %133 = arith.mulf %128, %132 : vector<8x128xf32>
    %134 = arith.index_cast %c2_i32 : i32 to index
    %c0_58 = arith.constant 0 : index
    %c0_59 = arith.constant 0 : index
    %135 = vector.load %arg5[%134, %c0_58, %c0_59] : memref<8x8x128xf32, #tpu.memory_space<vmem>>, vector<1x8x128xf32>
    %136 = vector.shape_cast %135 : vector<1x8x128xf32> to vector<8x128xf32>
    %137 = vector.shape_cast %133 : vector<8x128xf32> to vector<1x8x128xf32>
    tpu.vector_store %arg5[%134, %c0_58, %c0_59], %137 {strides = array<i32>} : memref<8x8x128xf32, #tpu.memory_space<vmem>>, vector<1x8x128xf32>,
    %c3_i32 = arith.constant 3 : i32
    %c8_i32_60 = arith.constant 8 : i32
    %138 = arith.muli %c3_i32, %c8_i32_60 : i32
    %139 = tpu.assume_multiple %138, 8 : i32
    %c0_61 = arith.constant 0 : index
    %c0_62 = arith.constant 0 : index
    %140 = vector.load %arg3[%c0_61, %c0_62] : memref<128x512xf32, #tpu.memory_space<vmem>>, vector<128x512xf32>
    %cst_63 = arith.constant dense<0.000000e+00> : vector<8x512xf32>
    %141 = tpu.matmul %133, %140, %cst_63 {dimension_numbers = #tpu.dot_dimension_numbers<[1], [0], [0], [1], [0, 0, 1, 1], [], []>} : vector<8x128xf32>, vector<128x512xf32>, vector<8x512xf32> -> vector<8x512xf32>
    %142 = arith.index_cast %139 : i32 to index
    %c0_64 = arith.constant 0 : index
    %143 = vector.load %arg8[%142, %c0_64] : memref<64x512xf32, #tpu.memory_space<vmem>>, vector<8x512xf32>
    %144 = arith.addf %141, %143 : vector<8x512xf32>
    %145 = vector.extract_strided_slice %144 {offsets = [0, 0], sizes = [8, 128], strides = [1, 1]} : vector<8x512xf32> to vector<8x128xf32>
    %cst_65 = arith.constant 5.000000e-01 : f32
    %146 = vector.broadcast %cst_65 : f32 to vector<8x128xf32>
    %147 = arith.mulf %146, %145 : vector<8x128xf32>
    %148 = math.tanh %147 : vector<8x128xf32>
    %cst_66 = arith.constant 5.000000e-01 : f32
    %149 = vector.broadcast %cst_66 : f32 to vector<8x128xf32>
    %150 = arith.mulf %149, %148 : vector<8x128xf32>
    %cst_67 = arith.constant 5.000000e-01 : f32
    %151 = vector.broadcast %cst_67 : f32 to vector<8x128xf32>
    %152 = arith.addf %150, %151 : vector<8x128xf32>
    %153 = vector.extract_strided_slice %144 {offsets = [0, 128], sizes = [8, 128], strides = [1, 1]} : vector<8x512xf32> to vector<8x128xf32>
    %cst_68 = arith.constant 5.000000e-01 : f32
    %154 = vector.broadcast %cst_68 : f32 to vector<8x128xf32>
    %155 = arith.mulf %154, %153 : vector<8x128xf32>
    %156 = math.tanh %155 : vector<8x128xf32>
    %cst_69 = arith.constant 5.000000e-01 : f32
    %157 = vector.broadcast %cst_69 : f32 to vector<8x128xf32>
    %158 = arith.mulf %157, %156 : vector<8x128xf32>
    %cst_70 = arith.constant 5.000000e-01 : f32
    %159 = vector.broadcast %cst_70 : f32 to vector<8x128xf32>
    %160 = arith.addf %158, %159 : vector<8x128xf32>
    %161 = vector.extract_strided_slice %144 {offsets = [0, 256], sizes = [8, 128], strides = [1, 1]} : vector<8x512xf32> to vector<8x128xf32>
    %162 = math.tanh %161 : vector<8x128xf32>
    %163 = vector.extract_strided_slice %144 {offsets = [0, 384], sizes = [8, 128], strides = [1, 1]} : vector<8x512xf32> to vector<8x128xf32>
    %cst_71 = arith.constant 5.000000e-01 : f32
    %164 = vector.broadcast %cst_71 : f32 to vector<8x128xf32>
    %165 = arith.mulf %164, %163 : vector<8x128xf32>
    %166 = math.tanh %165 : vector<8x128xf32>
    %cst_72 = arith.constant 5.000000e-01 : f32
    %167 = vector.broadcast %cst_72 : f32 to vector<8x128xf32>
    %168 = arith.mulf %167, %166 : vector<8x128xf32>
    %cst_73 = arith.constant 5.000000e-01 : f32
    %169 = vector.broadcast %cst_73 : f32 to vector<8x128xf32>
    %170 = arith.addf %168, %169 : vector<8x128xf32>
    %171 = arith.mulf %160, %131 : vector<8x128xf32>
    %172 = arith.mulf %152, %162 : vector<8x128xf32>
    %173 = arith.addf %171, %172 : vector<8x128xf32>
    %174 = math.tanh %173 : vector<8x128xf32>
    %175 = arith.mulf %170, %174 : vector<8x128xf32>
    %176 = arith.index_cast %c3_i32 : i32 to index
    %c0_74 = arith.constant 0 : index
    %c0_75 = arith.constant 0 : index
    %177 = vector.load %arg5[%176, %c0_74, %c0_75] : memref<8x8x128xf32, #tpu.memory_space<vmem>>, vector<1x8x128xf32>
    %178 = vector.shape_cast %177 : vector<1x8x128xf32> to vector<8x128xf32>
    %179 = vector.shape_cast %175 : vector<8x128xf32> to vector<1x8x128xf32>
    tpu.vector_store %arg5[%176, %c0_74, %c0_75], %179 {strides = array<i32>} : memref<8x8x128xf32, #tpu.memory_space<vmem>>, vector<1x8x128xf32>,
    %c4_i32 = arith.constant 4 : i32
    %c8_i32_76 = arith.constant 8 : i32
    %180 = arith.muli %c4_i32, %c8_i32_76 : i32
    %181 = tpu.assume_multiple %180, 8 : i32
    %c0_77 = arith.constant 0 : index
    %c0_78 = arith.constant 0 : index
    %182 = vector.load %arg3[%c0_77, %c0_78] : memref<128x512xf32, #tpu.memory_space<vmem>>, vector<128x512xf32>
    %cst_79 = arith.constant dense<0.000000e+00> : vector<8x512xf32>
    %183 = tpu.matmul %175, %182, %cst_79 {dimension_numbers = #tpu.dot_dimension_numbers<[1], [0], [0], [1], [0, 0, 1, 1], [], []>} : vector<8x128xf32>, vector<128x512xf32>, vector<8x512xf32> -> vector<8x512xf32>
    %184 = arith.index_cast %181 : i32 to index
    %c0_80 = arith.constant 0 : index
    %185 = vector.load %arg8[%184, %c0_80] : memref<64x512xf32, #tpu.memory_space<vmem>>, vector<8x512xf32>
    %186 = arith.addf %183, %185 : vector<8x512xf32>
    %187 = vector.extract_strided_slice %186 {offsets = [0, 0], sizes = [8, 128], strides = [1, 1]} : vector<8x512xf32> to vector<8x128xf32>
    %cst_81 = arith.constant 5.000000e-01 : f32
    %188 = vector.broadcast %cst_81 : f32 to vector<8x128xf32>
    %189 = arith.mulf %188, %187 : vector<8x128xf32>
    %190 = math.tanh %189 : vector<8x128xf32>
    %cst_82 = arith.constant 5.000000e-01 : f32
    %191 = vector.broadcast %cst_82 : f32 to vector<8x128xf32>
    %192 = arith.mulf %191, %190 : vector<8x128xf32>
    %cst_83 = arith.constant 5.000000e-01 : f32
    %193 = vector.broadcast %cst_83 : f32 to vector<8x128xf32>
    %194 = arith.addf %192, %193 : vector<8x128xf32>
    %195 = vector.extract_strided_slice %186 {offsets = [0, 128], sizes = [8, 128], strides = [1, 1]} : vector<8x512xf32> to vector<8x128xf32>
    %cst_84 = arith.constant 5.000000e-01 : f32
    %196 = vector.broadcast %cst_84 : f32 to vector<8x128xf32>
    %197 = arith.mulf %196, %195 : vector<8x128xf32>
    %198 = math.tanh %197 : vector<8x128xf32>
    %cst_85 = arith.constant 5.000000e-01 : f32
    %199 = vector.broadcast %cst_85 : f32 to vector<8x128xf32>
    %200 = arith.mulf %199, %198 : vector<8x128xf32>
    %cst_86 = arith.constant 5.000000e-01 : f32
    %201 = vector.broadcast %cst_86 : f32 to vector<8x128xf32>
    %202 = arith.addf %200, %201 : vector<8x128xf32>
    %203 = vector.extract_strided_slice %186 {offsets = [0, 256], sizes = [8, 128], strides = [1, 1]} : vector<8x512xf32> to vector<8x128xf32>
    %204 = math.tanh %203 : vector<8x128xf32>
    %205 = vector.extract_strided_slice %186 {offsets = [0, 384], sizes = [8, 128], strides = [1, 1]} : vector<8x512xf32> to vector<8x128xf32>
    %cst_87 = arith.constant 5.000000e-01 : f32
    %206 = vector.broadcast %cst_87 : f32 to vector<8x128xf32>
    %207 = arith.mulf %206, %205 : vector<8x128xf32>
    %208 = math.tanh %207 : vector<8x128xf32>
    %cst_88 = arith.constant 5.000000e-01 : f32
    %209 = vector.broadcast %cst_88 : f32 to vector<8x128xf32>
    %210 = arith.mulf %209, %208 : vector<8x128xf32>
    %cst_89 = arith.constant 5.000000e-01 : f32
    %211 = vector.broadcast %cst_89 : f32 to vector<8x128xf32>
    %212 = arith.addf %210, %211 : vector<8x128xf32>
    %213 = arith.mulf %202, %173 : vector<8x128xf32>
    %214 = arith.mulf %194, %204 : vector<8x128xf32>
    %215 = arith.addf %213, %214 : vector<8x128xf32>
    %216 = math.tanh %215 : vector<8x128xf32>
    %217 = arith.mulf %212, %216 : vector<8x128xf32>
    %218 = arith.index_cast %c4_i32 : i32 to index
    %c0_90 = arith.constant 0 : index
    %c0_91 = arith.constant 0 : index
    %219 = vector.load %arg5[%218, %c0_90, %c0_91] : memref<8x8x128xf32, #tpu.memory_space<vmem>>, vector<1x8x128xf32>
    %220 = vector.shape_cast %219 : vector<1x8x128xf32> to vector<8x128xf32>
    %221 = vector.shape_cast %217 : vector<8x128xf32> to vector<1x8x128xf32>
    tpu.vector_store %arg5[%218, %c0_90, %c0_91], %221 {strides = array<i32>} : memref<8x8x128xf32, #tpu.memory_space<vmem>>, vector<1x8x128xf32>,
    %c5_i32 = arith.constant 5 : i32
    %c8_i32_92 = arith.constant 8 : i32
    %222 = arith.muli %c5_i32, %c8_i32_92 : i32
    %223 = tpu.assume_multiple %222, 8 : i32
    %c0_93 = arith.constant 0 : index
    %c0_94 = arith.constant 0 : index
    %224 = vector.load %arg3[%c0_93, %c0_94] : memref<128x512xf32, #tpu.memory_space<vmem>>, vector<128x512xf32>
    %cst_95 = arith.constant dense<0.000000e+00> : vector<8x512xf32>
    %225 = tpu.matmul %217, %224, %cst_95 {dimension_numbers = #tpu.dot_dimension_numbers<[1], [0], [0], [1], [0, 0, 1, 1], [], []>} : vector<8x128xf32>, vector<128x512xf32>, vector<8x512xf32> -> vector<8x512xf32>
    %226 = arith.index_cast %223 : i32 to index
    %c0_96 = arith.constant 0 : index
    %227 = vector.load %arg8[%226, %c0_96] : memref<64x512xf32, #tpu.memory_space<vmem>>, vector<8x512xf32>
    %228 = arith.addf %225, %227 : vector<8x512xf32>
    %229 = vector.extract_strided_slice %228 {offsets = [0, 0], sizes = [8, 128], strides = [1, 1]} : vector<8x512xf32> to vector<8x128xf32>
    %cst_97 = arith.constant 5.000000e-01 : f32
    %230 = vector.broadcast %cst_97 : f32 to vector<8x128xf32>
    %231 = arith.mulf %230, %229 : vector<8x128xf32>
    %232 = math.tanh %231 : vector<8x128xf32>
    %cst_98 = arith.constant 5.000000e-01 : f32
    %233 = vector.broadcast %cst_98 : f32 to vector<8x128xf32>
    %234 = arith.mulf %233, %232 : vector<8x128xf32>
    %cst_99 = arith.constant 5.000000e-01 : f32
    %235 = vector.broadcast %cst_99 : f32 to vector<8x128xf32>
    %236 = arith.addf %234, %235 : vector<8x128xf32>
    %237 = vector.extract_strided_slice %228 {offsets = [0, 128], sizes = [8, 128], strides = [1, 1]} : vector<8x512xf32> to vector<8x128xf32>
    %cst_100 = arith.constant 5.000000e-01 : f32
    %238 = vector.broadcast %cst_100 : f32 to vector<8x128xf32>
    %239 = arith.mulf %238, %237 : vector<8x128xf32>
    %240 = math.tanh %239 : vector<8x128xf32>
    %cst_101 = arith.constant 5.000000e-01 : f32
    %241 = vector.broadcast %cst_101 : f32 to vector<8x128xf32>
    %242 = arith.mulf %241, %240 : vector<8x128xf32>
    %cst_102 = arith.constant 5.000000e-01 : f32
    %243 = vector.broadcast %cst_102 : f32 to vector<8x128xf32>
    %244 = arith.addf %242, %243 : vector<8x128xf32>
    %245 = vector.extract_strided_slice %228 {offsets = [0, 256], sizes = [8, 128], strides = [1, 1]} : vector<8x512xf32> to vector<8x128xf32>
    %246 = math.tanh %245 : vector<8x128xf32>
    %247 = vector.extract_strided_slice %228 {offsets = [0, 384], sizes = [8, 128], strides = [1, 1]} : vector<8x512xf32> to vector<8x128xf32>
    %cst_103 = arith.constant 5.000000e-01 : f32
    %248 = vector.broadcast %cst_103 : f32 to vector<8x128xf32>
    %249 = arith.mulf %248, %247 : vector<8x128xf32>
    %250 = math.tanh %249 : vector<8x128xf32>
    %cst_104 = arith.constant 5.000000e-01 : f32
    %251 = vector.broadcast %cst_104 : f32 to vector<8x128xf32>
    %252 = arith.mulf %251, %250 : vector<8x128xf32>
    %cst_105 = arith.constant 5.000000e-01 : f32
    %253 = vector.broadcast %cst_105 : f32 to vector<8x128xf32>
    %254 = arith.addf %252, %253 : vector<8x128xf32>
    %255 = arith.mulf %244, %215 : vector<8x128xf32>
    %256 = arith.mulf %236, %246 : vector<8x128xf32>
    %257 = arith.addf %255, %256 : vector<8x128xf32>
    %258 = math.tanh %257 : vector<8x128xf32>
    %259 = arith.mulf %254, %258 : vector<8x128xf32>
    %260 = arith.index_cast %c5_i32 : i32 to index
    %c0_106 = arith.constant 0 : index
    %c0_107 = arith.constant 0 : index
    %261 = vector.load %arg5[%260, %c0_106, %c0_107] : memref<8x8x128xf32, #tpu.memory_space<vmem>>, vector<1x8x128xf32>
    %262 = vector.shape_cast %261 : vector<1x8x128xf32> to vector<8x128xf32>
    %263 = vector.shape_cast %259 : vector<8x128xf32> to vector<1x8x128xf32>
    tpu.vector_store %arg5[%260, %c0_106, %c0_107], %263 {strides = array<i32>} : memref<8x8x128xf32, #tpu.memory_space<vmem>>, vector<1x8x128xf32>,
    %c6_i32 = arith.constant 6 : i32
    %c8_i32_108 = arith.constant 8 : i32
    %264 = arith.muli %c6_i32, %c8_i32_108 : i32
    %265 = tpu.assume_multiple %264, 8 : i32
    %c0_109 = arith.constant 0 : index
    %c0_110 = arith.constant 0 : index
    %266 = vector.load %arg3[%c0_109, %c0_110] : memref<128x512xf32, #tpu.memory_space<vmem>>, vector<128x512xf32>
    %cst_111 = arith.constant dense<0.000000e+00> : vector<8x512xf32>
    %267 = tpu.matmul %259, %266, %cst_111 {dimension_numbers = #tpu.dot_dimension_numbers<[1], [0], [0], [1], [0, 0, 1, 1], [], []>} : vector<8x128xf32>, vector<128x512xf32>, vector<8x512xf32> -> vector<8x512xf32>
    %268 = arith.index_cast %265 : i32 to index
    %c0_112 = arith.constant 0 : index
    %269 = vector.load %arg8[%268, %c0_112] : memref<64x512xf32, #tpu.memory_space<vmem>>, vector<8x512xf32>
    %270 = arith.addf %267, %269 : vector<8x512xf32>
    %271 = vector.extract_strided_slice %270 {offsets = [0, 0], sizes = [8, 128], strides = [1, 1]} : vector<8x512xf32> to vector<8x128xf32>
    %cst_113 = arith.constant 5.000000e-01 : f32
    %272 = vector.broadcast %cst_113 : f32 to vector<8x128xf32>
    %273 = arith.mulf %272, %271 : vector<8x128xf32>
    %274 = math.tanh %273 : vector<8x128xf32>
    %cst_114 = arith.constant 5.000000e-01 : f32
    %275 = vector.broadcast %cst_114 : f32 to vector<8x128xf32>
    %276 = arith.mulf %275, %274 : vector<8x128xf32>
    %cst_115 = arith.constant 5.000000e-01 : f32
    %277 = vector.broadcast %cst_115 : f32 to vector<8x128xf32>
    %278 = arith.addf %276, %277 : vector<8x128xf32>
    %279 = vector.extract_strided_slice %270 {offsets = [0, 128], sizes = [8, 128], strides = [1, 1]} : vector<8x512xf32> to vector<8x128xf32>
    %cst_116 = arith.constant 5.000000e-01 : f32
    %280 = vector.broadcast %cst_116 : f32 to vector<8x128xf32>
    %281 = arith.mulf %280, %279 : vector<8x128xf32>
    %282 = math.tanh %281 : vector<8x128xf32>
    %cst_117 = arith.constant 5.000000e-01 : f32
    %283 = vector.broadcast %cst_117 : f32 to vector<8x128xf32>
    %284 = arith.mulf %283, %282 : vector<8x128xf32>
    %cst_118 = arith.constant 5.000000e-01 : f32
    %285 = vector.broadcast %cst_118 : f32 to vector<8x128xf32>
    %286 = arith.addf %284, %285 : vector<8x128xf32>
    %287 = vector.extract_strided_slice %270 {offsets = [0, 256], sizes = [8, 128], strides = [1, 1]} : vector<8x512xf32> to vector<8x128xf32>
    %288 = math.tanh %287 : vector<8x128xf32>
    %289 = vector.extract_strided_slice %270 {offsets = [0, 384], sizes = [8, 128], strides = [1, 1]} : vector<8x512xf32> to vector<8x128xf32>
    %cst_119 = arith.constant 5.000000e-01 : f32
    %290 = vector.broadcast %cst_119 : f32 to vector<8x128xf32>
    %291 = arith.mulf %290, %289 : vector<8x128xf32>
    %292 = math.tanh %291 : vector<8x128xf32>
    %cst_120 = arith.constant 5.000000e-01 : f32
    %293 = vector.broadcast %cst_120 : f32 to vector<8x128xf32>
    %294 = arith.mulf %293, %292 : vector<8x128xf32>
    %cst_121 = arith.constant 5.000000e-01 : f32
    %295 = vector.broadcast %cst_121 : f32 to vector<8x128xf32>
    %296 = arith.addf %294, %295 : vector<8x128xf32>
    %297 = arith.mulf %286, %257 : vector<8x128xf32>
    %298 = arith.mulf %278, %288 : vector<8x128xf32>
    %299 = arith.addf %297, %298 : vector<8x128xf32>
    %300 = math.tanh %299 : vector<8x128xf32>
    %301 = arith.mulf %296, %300 : vector<8x128xf32>
    %302 = arith.index_cast %c6_i32 : i32 to index
    %c0_122 = arith.constant 0 : index
    %c0_123 = arith.constant 0 : index
    %303 = vector.load %arg5[%302, %c0_122, %c0_123] : memref<8x8x128xf32, #tpu.memory_space<vmem>>, vector<1x8x128xf32>
    %304 = vector.shape_cast %303 : vector<1x8x128xf32> to vector<8x128xf32>
    %305 = vector.shape_cast %301 : vector<8x128xf32> to vector<1x8x128xf32>
    tpu.vector_store %arg5[%302, %c0_122, %c0_123], %305 {strides = array<i32>} : memref<8x8x128xf32, #tpu.memory_space<vmem>>, vector<1x8x128xf32>,
    %c7_i32 = arith.constant 7 : i32
    %c8_i32_124 = arith.constant 8 : i32
    %306 = arith.muli %c7_i32, %c8_i32_124 : i32
    %307 = tpu.assume_multiple %306, 8 : i32
    %c0_125 = arith.constant 0 : index
    %c0_126 = arith.constant 0 : index
    %308 = vector.load %arg3[%c0_125, %c0_126] : memref<128x512xf32, #tpu.memory_space<vmem>>, vector<128x512xf32>
    %cst_127 = arith.constant dense<0.000000e+00> : vector<8x512xf32>
    %309 = tpu.matmul %301, %308, %cst_127 {dimension_numbers = #tpu.dot_dimension_numbers<[1], [0], [0], [1], [0, 0, 1, 1], [], []>} : vector<8x128xf32>, vector<128x512xf32>, vector<8x512xf32> -> vector<8x512xf32>
    %310 = arith.index_cast %307 : i32 to index
    %c0_128 = arith.constant 0 : index
    %311 = vector.load %arg8[%310, %c0_128] : memref<64x512xf32, #tpu.memory_space<vmem>>, vector<8x512xf32>
    %312 = arith.addf %309, %311 : vector<8x512xf32>
    %313 = vector.extract_strided_slice %312 {offsets = [0, 0], sizes = [8, 128], strides = [1, 1]} : vector<8x512xf32> to vector<8x128xf32>
    %cst_129 = arith.constant 5.000000e-01 : f32
    %314 = vector.broadcast %cst_129 : f32 to vector<8x128xf32>
    %315 = arith.mulf %314, %313 : vector<8x128xf32>
    %316 = math.tanh %315 : vector<8x128xf32>
    %cst_130 = arith.constant 5.000000e-01 : f32
    %317 = vector.broadcast %cst_130 : f32 to vector<8x128xf32>
    %318 = arith.mulf %317, %316 : vector<8x128xf32>
    %cst_131 = arith.constant 5.000000e-01 : f32
    %319 = vector.broadcast %cst_131 : f32 to vector<8x128xf32>
    %320 = arith.addf %318, %319 : vector<8x128xf32>
    %321 = vector.extract_strided_slice %312 {offsets = [0, 128], sizes = [8, 128], strides = [1, 1]} : vector<8x512xf32> to vector<8x128xf32>
    %cst_132 = arith.constant 5.000000e-01 : f32
    %322 = vector.broadcast %cst_132 : f32 to vector<8x128xf32>
    %323 = arith.mulf %322, %321 : vector<8x128xf32>
    %324 = math.tanh %323 : vector<8x128xf32>
    %cst_133 = arith.constant 5.000000e-01 : f32
    %325 = vector.broadcast %cst_133 : f32 to vector<8x128xf32>
    %326 = arith.mulf %325, %324 : vector<8x128xf32>
    %cst_134 = arith.constant 5.000000e-01 : f32
    %327 = vector.broadcast %cst_134 : f32 to vector<8x128xf32>
    %328 = arith.addf %326, %327 : vector<8x128xf32>
    %329 = vector.extract_strided_slice %312 {offsets = [0, 256], sizes = [8, 128], strides = [1, 1]} : vector<8x512xf32> to vector<8x128xf32>
    %330 = math.tanh %329 : vector<8x128xf32>
    %331 = vector.extract_strided_slice %312 {offsets = [0, 384], sizes = [8, 128], strides = [1, 1]} : vector<8x512xf32> to vector<8x128xf32>
    %cst_135 = arith.constant 5.000000e-01 : f32
    %332 = vector.broadcast %cst_135 : f32 to vector<8x128xf32>
    %333 = arith.mulf %332, %331 : vector<8x128xf32>
    %334 = math.tanh %333 : vector<8x128xf32>
    %cst_136 = arith.constant 5.000000e-01 : f32
    %335 = vector.broadcast %cst_136 : f32 to vector<8x128xf32>
    %336 = arith.mulf %335, %334 : vector<8x128xf32>
    %cst_137 = arith.constant 5.000000e-01 : f32
    %337 = vector.broadcast %cst_137 : f32 to vector<8x128xf32>
    %338 = arith.addf %336, %337 : vector<8x128xf32>
    %339 = arith.mulf %328, %299 : vector<8x128xf32>
    %340 = arith.mulf %320, %330 : vector<8x128xf32>
    %341 = arith.addf %339, %340 : vector<8x128xf32>
    %342 = math.tanh %341 : vector<8x128xf32>
    %343 = arith.mulf %338, %342 : vector<8x128xf32>
    %344 = arith.index_cast %c7_i32 : i32 to index
    %c0_138 = arith.constant 0 : index
    %c0_139 = arith.constant 0 : index
    %345 = vector.load %arg5[%344, %c0_138, %c0_139] : memref<8x8x128xf32, #tpu.memory_space<vmem>>, vector<1x8x128xf32>
    %346 = vector.shape_cast %345 : vector<1x8x128xf32> to vector<8x128xf32>
    %347 = vector.shape_cast %343 : vector<8x128xf32> to vector<1x8x128xf32>
    tpu.vector_store %arg5[%344, %c0_138, %c0_139], %347 {strides = array<i32>} : memref<8x8x128xf32, #tpu.memory_space<vmem>>, vector<1x8x128xf32>,
    %c8_i32_140 = arith.constant 8 : i32
    %c0_141 = arith.constant 0 : index
    %c0_142 = arith.constant 0 : index
    %348 = vector.load %arg9[%c0_141, %c0_142] : memref<8x128xf32, #tpu.memory_space<vmem>>, vector<8x128xf32>
    tpu.vector_store %arg9[%c0_141, %c0_142], %343 {strides = array<i32>} : memref<8x128xf32, #tpu.memory_space<vmem>>, vector<8x128xf32>,
    %c0_143 = arith.constant 0 : index
    %c0_144 = arith.constant 0 : index
    %349 = vector.load %arg10[%c0_143, %c0_144] : memref<8x128xf32, #tpu.memory_space<vmem>>, vector<8x128xf32>
    tpu.vector_store %arg10[%c0_143, %c0_144], %341 {strides = array<i32>} : memref<8x128xf32, #tpu.memory_space<vmem>>, vector<8x128xf32>,
    %c0_i32_145 = arith.constant 0 : i32
    %350 = arith.cmpi eq, %arg0, %c0_i32_145 : i32
    %351 = arith.extui %350 : i1 to i32
    %c0_i32_146 = arith.constant 0 : i32
    %352 = arith.cmpi ne, %351, %c0_i32_146 : i32
    scf.if %352 {
      %c0_147 = arith.constant 0 : index
      %c0_148 = arith.constant 0 : index
      %353 = vector.load %arg6[%c0_147, %c0_148] : memref<8x128xf32, #tpu.memory_space<vmem>>, vector<8x128xf32>
      tpu.vector_store %arg6[%c0_147, %c0_148], %343 {strides = array<i32>} : memref<8x128xf32, #tpu.memory_space<vmem>>, vector<8x128xf32>,
      %c0_149 = arith.constant 0 : index
      %c0_150 = arith.constant 0 : index
      %354 = vector.load %arg7[%c0_149, %c0_150] : memref<8x128xf32, #tpu.memory_space<vmem>>, vector<8x128xf32>
      tpu.vector_store %arg7[%c0_149, %c0_150], %341 {strides = array<i32>} : memref<8x128xf32, #tpu.memory_space<vmem>>, vector<8x128xf32>,
    } else {
    }
    return
  }
  func.func @transform_0(%arg0: i32) -> (i32, i32) {
    %c0_i32 = arith.constant 0 : i32
    %c0_i32_0 = arith.constant 0 : i32
    return %arg0, %c0_i32 : i32, i32
  }
  func.func @transform_1(%arg0: i32) -> (i32, i32) {
    %c0_i32 = arith.constant 0 : i32
    %c0_i32_0 = arith.constant 0 : i32
    %c0_i32_1 = arith.constant 0 : i32
    return %c0_i32, %c0_i32_0 : i32, i32
  }
  func.func @transform_2(%arg0: i32) -> (i32, i32) {
    %c0_i32 = arith.constant 0 : i32
    %c0_i32_0 = arith.constant 0 : i32
    %c0_i32_1 = arith.constant 0 : i32
    return %c0_i32, %c0_i32_0 : i32, i32
  }
  func.func @transform_3(%arg0: i32) -> (i32, i32) {
    %c0_i32 = arith.constant 0 : i32
    %c0_i32_0 = arith.constant 0 : i32
    %c0_i32_1 = arith.constant 0 : i32
    return %c0_i32, %c0_i32_0 : i32, i32
  }
  func.func @transform_4(%arg0: i32) -> (i32, i32, i32) {
    %c0_i32 = arith.constant 0 : i32
    %c0_i32_0 = arith.constant 0 : i32
    %c0_i32_1 = arith.constant 0 : i32
    return %arg0, %c0_i32, %c0_i32_0 : i32, i32, i32
  }
  func.func @transform_5(%arg0: i32) -> (i32, i32) {
    %c0_i32 = arith.constant 0 : i32
    %c0_i32_0 = arith.constant 0 : i32
    %c0_i32_1 = arith.constant 0 : i32
    return %c0_i32, %c0_i32_0 : i32, i32
  }
  func.func @transform_6(%arg0: i32) -> (i32, i32) {
    %c0_i32 = arith.constant 0 : i32
    %c0_i32_0 = arith.constant 0 : i32
    %c0_i32_1 = arith.constant 0 : i32
    return %c0_i32, %c0_i32_0 : i32, i32
  }
}

</mosaic_0001>

<bundles_post_ra>
// kernel: seq2seq_encoder_forward.3
= control target key start
LH: loop header
LB: loop body
LE: loop exit
PB: predicated region body
PF: predicated region fallthrough
CT: control target
= control target key end

     0   :  { %s3478_s1 = inlined_call_operand.vmem [shape: f32[128,512], index: 1, kind: input, shape index: {}]   ;;  %s3479_s0 = inlined_call_operand.vmem [shape: f32[64,128], index: 0, kind: input, shape index: {}]   ;;  %s3480_s2 = inlined_call_operand.vmem [shape: f32[128,512], index: 2, kind: input, shape index: {}]   ;;  %s3481_s3 = inlined_call_operand.vmem [shape: f32[1,512], index: 3, kind: input, shape index: {}]   ;;  %s3482_s4 = inlined_call_operand.vmem [shape: f32[8,8,128], index: 4, kind: output, shape index: {0}]   ;;  %s3483_s6 = inlined_call_operand.vmem [shape: f32[8,128], index: 6, kind: output, shape index: {2}]   ;;  %s3484_s5 = inlined_call_operand.vmem [shape: f32[8,128], index: 5, kind: output, shape index: {1}]  }
   0x1   :  { %v94_v0 = vld [vmem:[%s3478_s1 + $0x1e0] sm:$0xff]  ;;  %v95_v1 = vld [vmem:[%s3478_s1 + $0x1e8] sm:$0xff]  ;;  %v96_v2 = vld [vmem:[%s3478_s1 + $0x1f0] sm:$0xff] }
   0x2   :  { %108 = vmatpush.msra.mxu0 %v94_v0  ;;  %149 = vmatpush.msra.mxu1 %v95_v1  ;;  %v97_v3 = vld [vmem:[%s3478_s1 + $0x1f8] sm:$0xff]  ;;  %v90_v4 = vld [vmem:[%s3478_s1 + $0x1c0] sm:$0xff]  ;;  %v91_v5 = vld [vmem:[%s3478_s1 + $0x1c8] sm:$0xff] }
   0x3   :  { %190 = vmatpush.msra.mxu2 %v96_v2  ;;  %231 = vmatpush.msra.mxu3 %v97_v3  ;;  %v92_v6 = vld [vmem:[%s3478_s1 + $0x1d0] sm:$0xff]  ;;  %v93_v7 = vld [vmem:[%s3478_s1 + $0x1d8] sm:$0xff]  ;;  %v86_v8 = vld [vmem:[%s3478_s1 + $0x1a0] sm:$0xff] }
   0x4   :  { %109 = vmatpush.msra.mxu0 %v90_v4  ;;  %150 = vmatpush.msra.mxu1 %v91_v5  ;;  %v87_v9 = vld [vmem:[%s3478_s1 + $0x1a8] sm:$0xff]  ;;  %v88_v10 = vld [vmem:[%s3478_s1 + $0x1b0] sm:$0xff]  ;;  %v89_v11 = vld [vmem:[%s3478_s1 + $0x1b8] sm:$0xff] }
   0x5   :  { %191 = vmatpush.msra.mxu2 %v92_v6  ;;  %232 = vmatpush.msra.mxu3 %v93_v7  ;;  %v82_v12 = vld [vmem:[%s3478_s1 + $0x180] sm:$0xff]  ;;  %v83_v13 = vld [vmem:[%s3478_s1 + $0x188] sm:$0xff]  ;;  %v84_v14 = vld [vmem:[%s3478_s1 + $0x190] sm:$0xff] }
   0x6   :  { %110 = vmatpush.msra.mxu0 %v86_v8  ;;  %151 = vmatpush.msra.mxu1 %v87_v9  ;;  %v85_v15 = vld [vmem:[%s3478_s1 + $0x198] sm:$0xff]  ;;  %v78_v16 = vld [vmem:[%s3478_s1 + $0x160] sm:$0xff]  ;;  %v79_v17 = vld [vmem:[%s3478_s1 + $0x168] sm:$0xff] }
   0x7   :  { %192 = vmatpush.msra.mxu2 %v88_v10  ;;  %233 = vmatpush.msra.mxu3 %v89_v11  ;;  %v80_v18 = vld [vmem:[%s3478_s1 + $0x170] sm:$0xff]  ;;  %v81_v19 = vld [vmem:[%s3478_s1 + $0x178] sm:$0xff]  ;;  %v74_v20 = vld [vmem:[%s3478_s1 + $0x140] sm:$0xff] }
   0x8   :  { %111 = vmatpush.msra.mxu0 %v82_v12  ;;  %152 = vmatpush.msra.mxu1 %v83_v13  ;;  %v75_v21 = vld [vmem:[%s3478_s1 + $0x148] sm:$0xff]  ;;  %v76_v22 = vld [vmem:[%s3478_s1 + $0x150] sm:$0xff]  ;;  %v77_v23 = vld [vmem:[%s3478_s1 + $0x158] sm:$0xff] }
   0x9   :  { %193 = vmatpush.msra.mxu2 %v84_v14  ;;  %234 = vmatpush.msra.mxu3 %v85_v15  ;;  %v70_v24 = vld [vmem:[%s3478_s1 + $0x120] sm:$0xff]  ;;  %v71_v25 = vld [vmem:[%s3478_s1 + $0x128] sm:$0xff]  ;;  %v72_v26 = vld [vmem:[%s3478_s1 + $0x130] sm:$0xff] }
   0xa   :  { %112 = vmatpush.msra.mxu0 %v78_v16  ;;  %153 = vmatpush.msra.mxu1 %v79_v17  ;;  %v73_v27 = vld [vmem:[%s3478_s1 + $0x138] sm:$0xff]  ;;  %v66_v28 = vld [vmem:[%s3478_s1 + $0x100] sm:$0xff]  ;;  %v67_v29 = vld [vmem:[%s3478_s1 + $0x108] sm:$0xff] }
   0xb   :  { %194 = vmatpush.msra.mxu2 %v80_v18  ;;  %235 = vmatpush.msra.mxu3 %v81_v19  ;;  %v68_v30 = vld [vmem:[%s3478_s1 + $0x110] sm:$0xff]  ;;  %v69_v31 = vld [vmem:[%s3478_s1 + $0x118] sm:$0xff]  ;;  %v62_v32 = vld [vmem:[%s3478_s1 + $0xe0] sm:$0xff] }
   0xc   :  { %113 = vmatpush.msra.mxu0 %v74_v20  ;;  %154 = vmatpush.msra.mxu1 %v75_v21  ;;  %v63_v33 = vld [vmem:[%s3478_s1 + $0xe8] sm:$0xff]  ;;  %v64_v34 = vld [vmem:[%s3478_s1 + $0xf0] sm:$0xff]  ;;  %v65_v35 = vld [vmem:[%s3478_s1 + $0xf8] sm:$0xff] }
   0xd   :  { %195 = vmatpush.msra.mxu2 %v76_v22  ;;  %236 = vmatpush.msra.mxu3 %v77_v23  ;;  %v58_v36 = vld [vmem:[%s3478_s1 + $0xc0] sm:$0xff]  ;;  %v59_v37 = vld [vmem:[%s3478_s1 + $0xc8] sm:$0xff]  ;;  %v60_v38 = vld [vmem:[%s3478_s1 + $0xd0] sm:$0xff] }
   0xe   :  { %114 = vmatpush.msra.mxu0 %v70_v24  ;;  %155 = vmatpush.msra.mxu1 %v71_v25  ;;  %v61_v39 = vld [vmem:[%s3478_s1 + $0xd8] sm:$0xff]  ;;  %v54_v40 = vld [vmem:[%s3478_s1 + $0xa0] sm:$0xff]  ;;  %v55_v41 = vld [vmem:[%s3478_s1 + $0xa8] sm:$0xff] }
   0xf   :  { %196 = vmatpush.msra.mxu2 %v72_v26  ;;  %237 = vmatpush.msra.mxu3 %v73_v27  ;;  %v56_v42 = vld [vmem:[%s3478_s1 + $0xb0] sm:$0xff]  ;;  %v57_v43 = vld [vmem:[%s3478_s1 + $0xb8] sm:$0xff]  ;;  %v50_v44 = vld [vmem:[%s3478_s1 + $0x80] sm:$0xff] }
  0x10   :  { %115 = vmatpush.msra.mxu0 %v66_v28  ;;  %156 = vmatpush.msra.mxu1 %v67_v29  ;;  %v51_v45 = vld [vmem:[%s3478_s1 + $0x88] sm:$0xff]  ;;  %v52_v46 = vld [vmem:[%s3478_s1 + $0x90] sm:$0xff]  ;;  %v53_v47 = vld [vmem:[%s3478_s1 + $0x98] sm:$0xff] }
  0x11   :  { %197 = vmatpush.msra.mxu2 %v68_v30  ;;  %238 = vmatpush.msra.mxu3 %v69_v31  ;;  %v46_v48 = vld [vmem:[%s3478_s1 + $0x60] sm:$0xff]  ;;  %v47_v49 = vld [vmem:[%s3478_s1 + $0x68] sm:$0xff]  ;;  %v48_v50 = vld [vmem:[%s3478_s1 + $0x70] sm:$0xff] }
  0x12   :  { %116 = vmatpush.msra.mxu0 %v62_v32  ;;  %157 = vmatpush.msra.mxu1 %v63_v33  ;;  %v49_v51 = vld [vmem:[%s3478_s1 + $0x78] sm:$0xff]  ;;  %v42_v52 = vld [vmem:[%s3478_s1 + $0x40] sm:$0xff]  ;;  %v43_v53 = vld [vmem:[%s3478_s1 + $0x48] sm:$0xff] }
  0x13   :  { %198 = vmatpush.msra.mxu2 %v64_v34  ;;  %239 = vmatpush.msra.mxu3 %v65_v35  ;;  %v44_v54 = vld [vmem:[%s3478_s1 + $0x50] sm:$0xff]  ;;  %v45_v55 = vld [vmem:[%s3478_s1 + $0x58] sm:$0xff]  ;;  %v38_v56 = vld [vmem:[%s3478_s1 + $0x20] sm:$0xff] }
  0x14   :  { %117 = vmatpush.msra.mxu0 %v58_v36  ;;  %158 = vmatpush.msra.mxu1 %v59_v37  ;;  %v39_v57 = vld [vmem:[%s3478_s1 + $0x28] sm:$0xff]  ;;  %v40_v58 = vld [vmem:[%s3478_s1 + $0x30] sm:$0xff]  ;;  %v41_v59 = vld [vmem:[%s3478_s1 + $0x38] sm:$0xff] }
  0x15   :  { %199 = vmatpush.msra.mxu2 %v60_v38  ;;  %240 = vmatpush.msra.mxu3 %v61_v39  ;;  %v34_v60 = vld [vmem:[%s3478_s1] sm:$0xff]  ;;  %v35_v61 = vld [vmem:[%s3478_s1 + $0x8] sm:$0xff]  ;;  %v36_v62 = vld [vmem:[%s3478_s1 + $0x10] sm:$0xff] }
  0x16   :  { %118 = vmatpush.msra.mxu0 %v54_v40  ;;  %159 = vmatpush.msra.mxu1 %v55_v41  ;;  %v37_v63 = vld [vmem:[%s3478_s1 + $0x18] sm:$0xff]  ;;  %v26_v0 = vld [vmem:[%s3479_s0] sm:$0xff]  ;;  %v2026_v2 = vld [vmem:[%s3480_s2 + $0x1e8] sm:$0xff] }
  0x17   :  { %200 = vmatpush.msra.mxu2 %v56_v42  ;;  %241 = vmatpush.msra.mxu3 %v57_v43  ;;  %v2021_v1 = vld [vmem:[%s3480_s2 + $0x1e0] sm:$0xff]  ;;  %v2031_v3 = vld [vmem:[%s3480_s2 + $0x1f0] sm:$0xff]  ;;  %v2036_v4 = vld [vmem:[%s3480_s2 + $0x1f8] sm:$0xff] }
  0x18   :  { %119 = vmatpush.msra.mxu0 %v50_v44  ;;  %160 = vmatpush.msra.mxu1 %v51_v45  ;;  %v2041_v5 = vld [vmem:[%s3480_s2 + $0x1c0] sm:$0xff]  ;;  %v2046_v6 = vld [vmem:[%s3480_s2 + $0x1c8] sm:$0xff]  ;;  %v2053_v7 = vld [vmem:[%s3480_s2 + $0x1d0] sm:$0xff] }
  0x19   :  { %201 = vmatpush.msra.mxu2 %v52_v46  ;;  %242 = vmatpush.msra.mxu3 %v53_v47  ;;  %v2058_v8 = vld [vmem:[%s3480_s2 + $0x1d8] sm:$0xff]  ;;  %v2065_v9 = vld [vmem:[%s3480_s2 + $0x1a0] sm:$0xff]  ;;  %v2070_v10 = vld [vmem:[%s3480_s2 + $0x1a8] sm:$0xff] }
  0x1a   :  { %120 = vmatpush.msra.mxu0 %v46_v48  ;;  %161 = vmatpush.msra.mxu1 %v47_v49  ;;  %v2077_v11 = vld [vmem:[%s3480_s2 + $0x1b0] sm:$0xff]  ;;  %v2082_v12 = vld [vmem:[%s3480_s2 + $0x1b8] sm:$0xff]  ;;  %v27_v13 = vld [vmem:[%s3479_s0 + $0x8] sm:$0xff] }
  0x1b   :  { %202 = vmatpush.msra.mxu2 %v48_v50  ;;  %243 = vmatpush.msra.mxu3 %v49_v51  ;;  %v2095_v14 = vld [vmem:[%s3480_s2 + $0x180] sm:$0xff]  ;;  %v2100_v15 = vld [vmem:[%s3480_s2 + $0x188] sm:$0xff]  ;;  %v2106_v16 = vld [vmem:[%s3480_s2 + $0x190] sm:$0xff] }
  0x1c   :  { %121 = vmatpush.msra.mxu0 %v42_v52  ;;  %162 = vmatpush.msra.mxu1 %v43_v53  ;;  %v2111_v17 = vld [vmem:[%s3480_s2 + $0x198] sm:$0xff]  ;;  %v2116_v18 = vld [vmem:[%s3480_s2 + $0x160] sm:$0xff]  ;;  %v2121_v19 = vld [vmem:[%s3480_s2 + $0x168] sm:$0xff] }
  0x1d   :  { %203 = vmatpush.msra.mxu2 %v44_v54  ;;  %244 = vmatpush.msra.mxu3 %v45_v55  ;;  %v2128_v20 = vld [vmem:[%s3480_s2 + $0x170] sm:$0xff]  ;;  %v2133_v21 = vld [vmem:[%s3480_s2 + $0x178] sm:$0xff]  ;;  %v2140_v22 = vld [vmem:[%s3480_s2 + $0x140] sm:$0xff] }
  0x1e   :  { %122 = vmatpush.msra.mxu0 %v38_v56  ;;  %163 = vmatpush.msra.mxu1 %v39_v57  ;;  %v2145_v23 = vld [vmem:[%s3480_s2 + $0x148] sm:$0xff]  ;;  %v2152_v24 = vld [vmem:[%s3480_s2 + $0x150] sm:$0xff]  ;;  %v2157_v25 = vld [vmem:[%s3480_s2 + $0x158] sm:$0xff] }
  0x1f   :  { %204 = vmatpush.msra.mxu2 %v40_v58  ;;  %245 = vmatpush.msra.mxu3 %v41_v59  ;;  %v28_v26 = vld [vmem:[%s3479_s0 + $0x10] sm:$0xff]  ;;  %v2170_v27 = vld [vmem:[%s3480_s2 + $0x120] sm:$0xff]  ;;  %v2175_v28 = vld [vmem:[%s3480_s2 + $0x128] sm:$0xff] }
  0x20   :  { %123 = vmatpush.msra.mxu0 %v34_v60  ;;  %164 = vmatpush.msra.mxu1 %v35_v61  ;;  %v2181_v29 = vld [vmem:[%s3480_s2 + $0x130] sm:$0xff]  ;;  %v2186_v30 = vld [vmem:[%s3480_s2 + $0x138] sm:$0xff]  ;;  %v2191_v31 = vld [vmem:[%s3480_s2 + $0x100] sm:$0xff] }
  0x21   :  { %205 = vmatpush.msra.mxu2 %v36_v62  ;;  %246 = vmatpush.msra.mxu3 %v37_v63  ;;  %v2196_v32 = vld [vmem:[%s3480_s2 + $0x108] sm:$0xff]  ;;  %v2203_v33 = vld [vmem:[%s3480_s2 + $0x110] sm:$0xff]  ;;  %v2208_v34 = vld [vmem:[%s3480_s2 + $0x118] sm:$0xff] }
  0x22   :  { %124 = vmatmul.f32.vlgmr.msra.gmra.mxu0 %v26_v0  ;;  %165 = vmatmul.f32.vlgmr.msra.gmra.mxu1 %v26_v0  ;;  %v2215_v35 = vld [vmem:[%s3480_s2 + $0xe0] sm:$0xff]  ;;  %v2220_v36 = vld [vmem:[%s3480_s2 + $0xe8] sm:$0xff]  ;;  %v2227_v37 = vld [vmem:[%s3480_s2 + $0xf0] sm:$0xff] }
  0x23   :  { %206 = vmatmul.f32.vlgmr.msra.gmra.mxu2 %v26_v0  ;;  %247 = vmatmul.f32.vlgmr.msra.gmra.mxu3 %v26_v0  ;;  %v2232_v38 = vld [vmem:[%s3480_s2 + $0xf8] sm:$0xff]  ;;  %v2245_v40 = vld [vmem:[%s3480_s2 + $0xc0] sm:$0xff]  ;;  %v2250_v41 = vld [vmem:[%s3480_s2 + $0xc8] sm:$0xff] }
  0x24   :  { %377 = vmatpush.msrb.mxu0 %v2021_v1  ;;  %397 = vmatpush.msrb.mxu1 %v2026_v2  ;;  %v29_v39 = vld [vmem:[%s3479_s0 + $0x18] sm:$0xff]  ;;  %v2256_v42 = vld [vmem:[%s3480_s2 + $0xd0] sm:$0xff]  ;;  %v2266_v44 = vld [vmem:[%s3480_s2 + $0xa0] sm:$0xff] }
  0x25   :  { %417 = vmatpush.msrb.mxu2 %v2031_v3  ;;  %437 = vmatpush.msrb.mxu3 %v2036_v4  ;;  %v2261_v43 = vld [vmem:[%s3480_s2 + $0xd8] sm:$0xff]  ;;  %v2271_v45 = vld [vmem:[%s3480_s2 + $0xa8] sm:$0xff]  ;;  %v2278_v46 = vld [vmem:[%s3480_s2 + $0xb0] sm:$0xff] }
  0x26   :  { %378 = vmatpush.msrb.mxu0 %v2041_v5  ;;  %398 = vmatpush.msrb.mxu1 %v2046_v6  ;;  %v2283_v47 = vld [vmem:[%s3480_s2 + $0xb8] sm:$0xff]  ;;  %v2290_v48 = vld [vmem:[%s3480_s2 + $0x80] sm:$0xff]  ;;  %v2295_v49 = vld [vmem:[%s3480_s2 + $0x88] sm:$0xff] }
  0x27   :  { %418 = vmatpush.msrb.mxu2 %v2053_v7  ;;  %438 = vmatpush.msrb.mxu3 %v2058_v8  ;;  %v2302_v50 = vld [vmem:[%s3480_s2 + $0x90] sm:$0xff]  ;;  %v2307_v51 = vld [vmem:[%s3480_s2 + $0x98] sm:$0xff]  ;;  %v30_v52 = vld [vmem:[%s3479_s0 + $0x20] sm:$0xff] }
  0x28   :  { %379 = vmatpush.msrb.mxu0 %v2065_v9  ;;  %399 = vmatpush.msrb.mxu1 %v2070_v10  ;;  %v2320_v53 = vld [vmem:[%s3480_s2 + $0x60] sm:$0xff]  ;;  %v2325_v54 = vld [vmem:[%s3480_s2 + $0x68] sm:$0xff]  ;;  %v2331_v55 = vld [vmem:[%s3480_s2 + $0x70] sm:$0xff] }
  0x29   :  { %419 = vmatpush.msrb.mxu2 %v2077_v11  ;;  %439 = vmatpush.msrb.mxu3 %v2082_v12  ;;  %v2336_v56 = vld [vmem:[%s3480_s2 + $0x78] sm:$0xff]  ;;  %v2341_v57 = vld [vmem:[%s3480_s2 + $0x40] sm:$0xff]  ;;  %v2346_v58 = vld [vmem:[%s3480_s2 + $0x48] sm:$0xff] }
  0x2a   :  { %127 = vmatmul.f32.gmra.mxu0 %v27_v13  ;;  %168 = vmatmul.f32.gmra.mxu1 %v27_v13  ;;  %v2353_v59 = vld [vmem:[%s3480_s2 + $0x50] sm:$0xff]  ;;  %v2358_v60 = vld [vmem:[%s3480_s2 + $0x58] sm:$0xff]  ;;  %v2365_v61 = vld [vmem:[%s3480_s2 + $0x20] sm:$0xff] }
  0x2b   :  { %209 = vmatmul.f32.gmra.mxu2 %v27_v13  ;;  %250 = vmatmul.f32.gmra.mxu3 %v27_v13  ;;  %v2370_v62 = vld [vmem:[%s3480_s2 + $0x28] sm:$0xff]  ;;  %v2377_v63 = vld [vmem:[%s3480_s2 + $0x30] sm:$0xff]  ;;  %v2382_v0 = vld [vmem:[%s3480_s2 + $0x38] sm:$0xff] }
  0x2c   :  { %380 = vmatpush.msrb.mxu0 %v2095_v14  ;;  %400 = vmatpush.msrb.mxu1 %v2100_v15  ;;  %3533 = vst [vmem:[#allocation5_spill] sm:$0xff] %v2377_v63  ;;  %v31_v13 = vld [vmem:[%s3479_s0 + $0x28] sm:$0xff] }
  0x2d   :  { %420 = vmatpush.msrb.mxu2 %v2106_v16  ;;  %440 = vmatpush.msrb.mxu3 %v2111_v17  ;;  %3534 = vst [vmem:[#allocation6_spill] sm:$0xff] %v2382_v0 }
  0x2e   :  { %381 = vmatpush.msrb.mxu0 %v2116_v18  ;;  %401 = vmatpush.msrb.mxu1 %v2121_v19 }
  0x2f   :  { %421 = vmatpush.msrb.mxu2 %v2128_v20  ;;  %441 = vmatpush.msrb.mxu3 %v2133_v21 }
  0x30   :  { %382 = vmatpush.msrb.mxu0 %v2140_v22  ;;  %402 = vmatpush.msrb.mxu1 %v2145_v23 }
  0x31   :  { %422 = vmatpush.msrb.mxu2 %v2152_v24  ;;  %442 = vmatpush.msrb.mxu3 %v2157_v25 }
  0x32   :  { %130 = vmatmul.f32.gmra.mxu0 %v28_v26  ;;  %171 = vmatmul.f32.gmra.mxu1 %v28_v26 }
  0x33   :  { %212 = vmatmul.f32.gmra.mxu2 %v28_v26  ;;  %253 = vmatmul.f32.gmra.mxu3 %v28_v26  ;;  %v2395_v26 = vld [vmem:[%s3480_s2] sm:$0xff] }
  0x34   :  { %383 = vmatpush.msrb.mxu0 %v2170_v27  ;;  %403 = vmatpush.msrb.mxu1 %v2175_v28 }
  0x35   :  { %423 = vmatpush.msrb.mxu2 %v2181_v29  ;;  %443 = vmatpush.msrb.mxu3 %v2186_v30 }
  0x36   :  { %384 = vmatpush.msrb.mxu0 %v2191_v31  ;;  %404 = vmatpush.msrb.mxu1 %v2196_v32 }
  0x37   :  { %424 = vmatpush.msrb.mxu2 %v2203_v33  ;;  %444 = vmatpush.msrb.mxu3 %v2208_v34 }
  0x38   :  { %385 = vmatpush.msrb.mxu0 %v2215_v35  ;;  %405 = vmatpush.msrb.mxu1 %v2220_v36 }
  0x39   :  { %425 = vmatpush.msrb.mxu2 %v2227_v37  ;;  %445 = vmatpush.msrb.mxu3 %v2232_v38 }
  0x3a   :  { %133 = vmatmul.f32.gmra.mxu0 %v29_v39  ;;  %174 = vmatmul.f32.gmra.mxu1 %v29_v39 }
  0x3b   :  { %215 = vmatmul.f32.gmra.mxu2 %v29_v39  ;;  %256 = vmatmul.f32.gmra.mxu3 %v29_v39  ;;  %v2400_v39 = vld [vmem:[%s3480_s2 + $0x8] sm:$0xff] }
  0x3c   :  { %386 = vmatpush.msrb.mxu0 %v2245_v40  ;;  %406 = vmatpush.msrb.mxu1 %v2250_v41 }
  0x3d   :  { %426 = vmatpush.msrb.mxu2 %v2256_v42  ;;  %446 = vmatpush.msrb.mxu3 %v2261_v43 }
  0x3e   :  { %387 = vmatpush.msrb.mxu0 %v2266_v44  ;;  %407 = vmatpush.msrb.mxu1 %v2271_v45 }
  0x3f   :  { %427 = vmatpush.msrb.mxu2 %v2278_v46  ;;  %447 = vmatpush.msrb.mxu3 %v2283_v47 }
  0x40   :  { %388 = vmatpush.msrb.mxu0 %v2290_v48  ;;  %408 = vmatpush.msrb.mxu1 %v2295_v49 }
  0x41   :  { %428 = vmatpush.msrb.mxu2 %v2302_v50  ;;  %448 = vmatpush.msrb.mxu3 %v2307_v51 }
  0x42   :  { %136 = vmatmul.f32.gmra.mxu0 %v30_v52  ;;  %177 = vmatmul.f32.gmra.mxu1 %v30_v52 }
  0x43   :  { %218 = vmatmul.f32.gmra.mxu2 %v30_v52  ;;  %259 = vmatmul.f32.gmra.mxu3 %v30_v52  ;;  %v2406_v52 = vld [vmem:[%s3480_s2 + $0x10] sm:$0xff] }
  0x44   :  { %389 = vmatpush.msrb.mxu0 %v2320_v53  ;;  %409 = vmatpush.msrb.mxu1 %v2325_v54 }
  0x45   :  { %429 = vmatpush.msrb.mxu2 %v2331_v55  ;;  %449 = vmatpush.msrb.mxu3 %v2336_v56 }
  0x46   :  { %390 = vmatpush.msrb.mxu0 %v2341_v57  ;;  %410 = vmatpush.msrb.mxu1 %v2346_v58 }
  0x47   :  { %430 = vmatpush.msrb.mxu2 %v2353_v59  ;;  %450 = vmatpush.msrb.mxu3 %v2358_v60 }
  0x48   :  { %391 = vmatpush.msrb.mxu0 %v2365_v61  ;;  %411 = vmatpush.msrb.mxu1 %v2370_v62 }
  0x49   :  { %431 = vmatpush.msrb.mxu2 %v2377_v63  ;;  %451 = vmatpush.msrb.mxu3 %v2382_v0  ;;  %v2411_v63 = vld [vmem:[%s3480_s2 + $0x18] sm:$0xff]  ;;  %v32_v0 = vld [vmem:[%s3479_s0 + $0x30] sm:$0xff] }
  0x4a   :  { %139 = vmatmul.f32.gmra.mxu0 %v31_v13  ;;  %180 = vmatmul.f32.gmra.mxu1 %v31_v13 }
  0x4b   :  { %221 = vmatmul.f32.gmra.mxu2 %v31_v13  ;;  %262 = vmatmul.f32.gmra.mxu3 %v31_v13  ;;  %v33_v13 = vld [vmem:[%s3479_s0 + $0x38] sm:$0xff] }
  0x4c   :  { %392 = vmatpush.msrb.mxu0 %v2395_v26  ;;  %412 = vmatpush.msrb.mxu1 %v2400_v39 }
  0x4d   :  { %432 = vmatpush.msrb.mxu2 %v2406_v52  ;;  %452 = vmatpush.msrb.mxu3 %v2411_v63 }
  0x4e   :  { %547 = vmatpush.msra.mxu0 %v2021_v1  ;;  %567 = vmatpush.msra.mxu1 %v2026_v2 }
  0x4f   :  { %587 = vmatpush.msra.mxu2 %v2031_v3  ;;  %607 = vmatpush.msra.mxu3 %v2036_v4 }
  0x50   :  { %548 = vmatpush.msra.mxu0 %v2041_v5  ;;  %568 = vmatpush.msra.mxu1 %v2046_v6 }
  0x51   :  { %588 = vmatpush.msra.mxu2 %v2053_v7  ;;  %608 = vmatpush.msra.mxu3 %v2058_v8 }
  0x52   :  { %142 = vmatmul.f32.gmra.mxu0 %v32_v0  ;;  %183 = vmatmul.f32.gmra.mxu1 %v32_v0 }
  0x53   :  { %224 = vmatmul.f32.gmra.mxu2 %v32_v0  ;;  %265 = vmatmul.f32.gmra.mxu3 %v32_v0  ;;  %v1787_v0 = vmov 0.0  }
  0x54   :  { %549 = vmatpush.msra.mxu0 %v2065_v9  ;;  %569 = vmatpush.msra.mxu1 %v2070_v10 }
  0x55   :  { %589 = vmatpush.msra.mxu2 %v2077_v11  ;;  %609 = vmatpush.msra.mxu3 %v2082_v12 }
  0x56   :  { %550 = vmatpush.msra.mxu0 %v2095_v14  ;;  %570 = vmatpush.msra.mxu1 %v2100_v15 }
  0x57   :  { %590 = vmatpush.msra.mxu2 %v2106_v16  ;;  %610 = vmatpush.msra.mxu3 %v2111_v17 }
  0x58   :  { %551 = vmatpush.msra.mxu0 %v2116_v18  ;;  %571 = vmatpush.msra.mxu1 %v2121_v19 }
  0x59   :  { %591 = vmatpush.msra.mxu2 %v2128_v20  ;;  %611 = vmatpush.msra.mxu3 %v2133_v21 }
  0x5a   :  { %145 = vmatmul.f32.gmra.mxu0 %v33_v13  ;;  %186 = vmatmul.f32.gmra.mxu1 %v33_v13 }
  0x5b   :  { %227 = vmatmul.f32.gmra.mxu2 %v33_v13  ;;  %268 = vmatmul.f32.gmra.mxu3 %v33_v13  ;;  %v3535_v13 = vld [vmem:[#allocation5_spill] sm:$0xff] }
  0x5c   :  { %552 = vmatpush.msra.mxu0 %v2140_v22  ;;  %572 = vmatpush.msra.mxu1 %v2145_v23 }
  0x5d   :  { %592 = vmatpush.msra.mxu2 %v2152_v24  ;;  %612 = vmatpush.msra.mxu3 %v2157_v25 }
  0x5e   :  { %553 = vmatpush.msra.mxu0 %v2170_v27  ;;  %573 = vmatpush.msra.mxu1 %v2175_v28 }
  0x5f   :  { %593 = vmatpush.msra.mxu2 %v2181_v29  ;;  %613 = vmatpush.msra.mxu3 %v2186_v30 }
  0x60   :  { %554 = vmatpush.msra.mxu0 %v2191_v31  ;;  %574 = vmatpush.msra.mxu1 %v2196_v32 }
  0x61   :  { %594 = vmatpush.msra.mxu2 %v2203_v33  ;;  %614 = vmatpush.msra.mxu3 %v2208_v34 }
  0x62   :  { %393 = vmatmul.f32.vlgmr.msrb.gmra.mxu0 %v1787_v0  ;;  %413 = vmatmul.f32.vlgmr.msrb.gmra.mxu1 %v1787_v0 }
  0x63   :  { %433 = vmatmul.f32.vlgmr.msrb.gmra.mxu2 %v1787_v0  ;;  %453 = vmatmul.f32.vlgmr.msrb.gmra.mxu3 %v1787_v0  ;;  %v3536_v0 = vld [vmem:[#allocation6_spill] sm:$0xff] }
  0x64   :  { %555 = vmatpush.msra.mxu0 %v2215_v35  ;;  %575 = vmatpush.msra.mxu1 %v2220_v36 }
  0x65   :  { %595 = vmatpush.msra.mxu2 %v2227_v37  ;;  %615 = vmatpush.msra.mxu3 %v2232_v38 }
  0x66   :  { %556 = vmatpush.msra.mxu0 %v2245_v40  ;;  %576 = vmatpush.msra.mxu1 %v2250_v41 }
  0x67   :  { %596 = vmatpush.msra.mxu2 %v2256_v42  ;;  %616 = vmatpush.msra.mxu3 %v2261_v43 }
  0x68   :  { %557 = vmatpush.msra.mxu0 %v2266_v44  ;;  %577 = vmatpush.msra.mxu1 %v2271_v45 }
  0x69   :  { %597 = vmatpush.msra.mxu2 %v2278_v46  ;;  %617 = vmatpush.msra.mxu3 %v2283_v47 }
  0x6a   :  { %558 = vmatpush.msra.mxu0 %v2290_v48  ;;  %578 = vmatpush.msra.mxu1 %v2295_v49 }
  0x6b   :  { %598 = vmatpush.msra.mxu2 %v2302_v50  ;;  %618 = vmatpush.msra.mxu3 %v2307_v51 }
  0x6c   :  { %559 = vmatpush.msra.mxu0 %v2320_v53  ;;  %579 = vmatpush.msra.mxu1 %v2325_v54 }
  0x6d   :  { %599 = vmatpush.msra.mxu2 %v2331_v55  ;;  %619 = vmatpush.msra.mxu3 %v2336_v56 }
  0x6e   :  { %560 = vmatpush.msra.mxu0 %v2341_v57  ;;  %580 = vmatpush.msra.mxu1 %v2346_v58 }
  0x6f   :  { %600 = vmatpush.msra.mxu2 %v2353_v59  ;;  %620 = vmatpush.msra.mxu3 %v2358_v60 }
  0x70   :  { %561 = vmatpush.msra.mxu0 %v2365_v61  ;;  %581 = vmatpush.msra.mxu1 %v2370_v62 }
  0x71   :  { %601 = vmatpush.msra.mxu2 %v3535_v13  ;;  %621 = vmatpush.msra.mxu3 %v3536_v0 }
  0x72   :  { %562 = vmatpush.msra.mxu0 %v2395_v26  ;;  %582 = vmatpush.msra.mxu1 %v2400_v39 }
  0x73   :  { %602 = vmatpush.msra.mxu2 %v2406_v52  ;;  %622 = vmatpush.msra.mxu3 %v2411_v63 }
  0x74   :  { %718 = vmatpush.msrb.mxu0 %v2021_v1  ;;  %738 = vmatpush.msrb.mxu1 %v2026_v2 }
  0x75   :  { %758 = vmatpush.msrb.mxu2 %v2031_v3  ;;  %778 = vmatpush.msrb.mxu3 %v2036_v4  ;;  %v98_v3 = vld [vmem:[%s3481_s3] sm:$0xf] }
  0x76   :  { %719 = vmatpush.msrb.mxu0 %v2041_v5  ;;  %739 = vmatpush.msrb.mxu1 %v2046_v6  ;;  %v100_v4 = vperm.slane %v98_v3, 0  ;;  %v101_v5 = vperm.slane %v98_v3, 1 }
  0x77   :  { %759 = vmatpush.msrb.mxu2 %v2053_v7  ;;  %779 = vmatpush.msrb.mxu3 %v2058_v8 }
  0x78   :  { %720 = vmatpush.msrb.mxu0 %v2065_v9  ;;  %740 = vmatpush.msrb.mxu1 %v2070_v10 }
  0x79   :  { %760 = vmatpush.msrb.mxu2 %v2077_v11  ;;  %780 = vmatpush.msrb.mxu3 %v2082_v12  ;;  %v2562_v12 = vperm.slane %v98_v3, 2 }
  0x7a   :  { %721 = vmatpush.msrb.mxu0 %v2095_v14  ;;  %741 = vmatpush.msrb.mxu1 %v2100_v15  ;;  %v2564_v14 = vperm.slane %v98_v3, 3 }
  0x7b   :  { %761 = vmatpush.msrb.mxu2 %v2106_v16  ;;  %781 = vmatpush.msrb.mxu3 %v2111_v17 }
  0x7c   :  { %722 = vmatpush.msrb.mxu0 %v2116_v18  ;;  %742 = vmatpush.msrb.mxu1 %v2121_v19 }
  0x7d   :  { %762 = vmatpush.msrb.mxu2 %v2128_v20  ;;  %782 = vmatpush.msrb.mxu3 %v2133_v21 }
  0x7e   :  { %723 = vmatpush.msrb.mxu0 %v2140_v22  ;;  %743 = vmatpush.msrb.mxu1 %v2145_v23 }
  0x7f   :  { %763 = vmatpush.msrb.mxu2 %v2152_v24  ;;  %783 = vmatpush.msrb.mxu3 %v2157_v25 }
  0x80   :  { %724 = vmatpush.msrb.mxu0 %v2170_v27  ;;  %744 = vmatpush.msrb.mxu1 %v2175_v28 }
  0x81   :  { %764 = vmatpush.msrb.mxu2 %v2181_v29  ;;  %784 = vmatpush.msrb.mxu3 %v2186_v30 }
  0x82   :  { %725 = vmatpush.msrb.mxu0 %v2191_v31  ;;  %745 = vmatpush.msrb.mxu1 %v2196_v32 }
  0x83   :  { %765 = vmatpush.msrb.mxu2 %v2203_v33  ;;  %785 = vmatpush.msrb.mxu3 %v2208_v34 }
  0x84   :  { %726 = vmatpush.msrb.mxu0 %v2215_v35  ;;  %746 = vmatpush.msrb.mxu1 %v2220_v36 }
  0x85   :  { %766 = vmatpush.msrb.mxu2 %v2227_v37  ;;  %786 = vmatpush.msrb.mxu3 %v2232_v38 }
  0x86   :  { %727 = vmatpush.msrb.mxu0 %v2245_v40  ;;  %747 = vmatpush.msrb.mxu1 %v2250_v41 }
  0x87   :  { %767 = vmatpush.msrb.mxu2 %v2256_v42  ;;  %787 = vmatpush.msrb.mxu3 %v2261_v43 }
  0x88   :  { %728 = vmatpush.msrb.mxu0 %v2266_v44  ;;  %748 = vmatpush.msrb.mxu1 %v2271_v45 }
  0x89   :  { %768 = vmatpush.msrb.mxu2 %v2278_v46  ;;  %788 = vmatpush.msrb.mxu3 %v2283_v47 }
  0x8a   :  { %729 = vmatpush.msrb.mxu0 %v2290_v48  ;;  %749 = vmatpush.msrb.mxu1 %v2295_v49 }
  0x8b   :  { %769 = vmatpush.msrb.mxu2 %v2302_v50  ;;  %789 = vmatpush.msrb.mxu3 %v2307_v51 }
  0x8c   :  { %730 = vmatpush.msrb.mxu0 %v2320_v53  ;;  %750 = vmatpush.msrb.mxu1 %v2325_v54 }
  0x8d   :  { %770 = vmatpush.msrb.mxu2 %v2331_v55  ;;  %790 = vmatpush.msrb.mxu3 %v2336_v56 }
  0x8e   :  { %731 = vmatpush.msrb.mxu0 %v2341_v57  ;;  %751 = vmatpush.msrb.mxu1 %v2346_v58 }
  0x8f   :  { %771 = vmatpush.msrb.mxu2 %v2353_v59  ;;  %791 = vmatpush.msrb.mxu3 %v2358_v60 }
  0x90   :  { %732 = vmatpush.msrb.mxu0 %v2365_v61  ;;  %752 = vmatpush.msrb.mxu1 %v2370_v62 }
  0x91   :  { %772 = vmatpush.msrb.mxu2 %v3535_v13  ;;  %792 = vmatpush.msrb.mxu3 %v3536_v0 }
  0x92   :  { %733 = vmatpush.msrb.mxu0 %v2395_v26  ;;  %753 = vmatpush.msrb.mxu1 %v2400_v39 }
  0x93   :  { %773 = vmatpush.msrb.mxu2 %v2406_v52  ;;  %793 = vmatpush.msrb.mxu3 %v2411_v63 }
  0x9f   :  { %v125_v1 = vpop.f32.mrf.mxu0  ;;  %v166_v2 = vpop.f32.mrf.mxu1 }
  0xa0   :  { %v126_v52 = vadd.f32 %v125_v1, %v100_v4  ;;  %v167_v13 = vadd.f32 %v166_v2, %v101_v5 }
  0xa6   :  { %v2554_v6 = vpop.f32.mrf.mxu2  ;;  %v2556_v7 = vpop.f32.mrf.mxu3 }
  0xa7   :  { %v128_v8 = vpop.f32.mrf.mxu0  ;;  %v169_v9 = vpop.f32.mrf.mxu1  ;;  %v249_v1 = vadd.f32 %v2556_v7, %v2564_v14 }
  0xa8   :  { %v2558_v10 = vadd.f32 %v128_v8, %v100_v4  ;;  %v2560_v11 = vadd.f32 %v169_v9, %v101_v5 }
  0xae   :  { %v210_v15 = vpop.f32.mrf.mxu2  ;;  %v251_v16 = vpop.f32.mrf.mxu3 }
  0xaf   :  { %v2567_v17 = vadd.f32 %v210_v15, %v2562_v12  ;;  %v2570_v18 = vadd.f32 %v251_v16, %v2564_v14  ;;  %v131_v19 = vpop.f32.mrf.mxu0  ;;  %v172_v20 = vpop.f32.mrf.mxu1 }
  0xb0   :  { %v2572_v21 = vadd.f32 %v131_v19, %v100_v4  ;;  %v2574_v22 = vadd.f32 %v172_v20, %v101_v5 }
  0xb6   :  { %v213_v23 = vpop.f32.mrf.mxu2  ;;  %v254_v24 = vpop.f32.mrf.mxu3 }
  0xb7   :  { %v2577_v25 = vadd.f32 %v213_v23, %v2562_v12  ;;  %v2580_v27 = vadd.f32 %v254_v24, %v2564_v14  ;;  %v134_v28 = vpop.f32.mrf.mxu0  ;;  %v175_v29 = vpop.f32.mrf.mxu1 }
  0xb8   :  { %v2582_v30 = vadd.f32 %v134_v28, %v100_v4  ;;  %v2584_v31 = vadd.f32 %v175_v29, %v101_v5  ;;  %v208_v28 = vadd.f32 %v2554_v6, %v2562_v12 }
  0xba   :  { %3537 = vst [vmem:[#allocation5_spill] sm:$0xff] %v2582_v30  ;;  %v2998_v30 = vld [vmem:[%s3480_s2 + $0x30] sm:$0xff] }
  0xbb   :  { %3538 = vst [vmem:[#allocation6_spill] sm:$0xff] %v2584_v31  ;;  %v2993_v31 = vld [vmem:[%s3480_s2 + $0x28] sm:$0xff] }
  0xbc   :  { %3571 = vst [vmem:[#allocation39_spill] sm:$0xff] %v2993_v31 }
  0xbd   :  { %3572 = vst [vmem:[#allocation40_spill] sm:$0xff] %v2998_v30 }
  0xbe   :  { %v216_v32 = vpop.f32.mrf.mxu2  ;;  %v257_v33 = vpop.f32.mrf.mxu3 }
  0xbf   :  { %v2587_v34 = vadd.f32 %v216_v32, %v2562_v12  ;;  %v2590_v35 = vadd.f32 %v257_v33, %v2564_v14  ;;  %v137_v36 = vpop.f32.mrf.mxu0  ;;  %v178_v37 = vpop.f32.mrf.mxu1 }
  0xc0   :  { %v2592_v38 = vadd.f32 %v137_v36, %v100_v4  ;;  %v2594_v40 = vadd.f32 %v178_v37, %v101_v5 }
  0xc1   :  { %3539 = vst [vmem:[#allocation7_spill] sm:$0xff] %v2587_v34  ;;  %v2988_v34 = vld [vmem:[%s3480_s2 + $0x20] sm:$0xff] }
  0xc2   :  { %3540 = vst [vmem:[#allocation8_spill] sm:$0xff] %v2590_v35  ;;  %v2981_v35 = vld [vmem:[%s3480_s2 + $0x58] sm:$0xff] }
  0xc3   :  { %3541 = vst [vmem:[#allocation9_spill] sm:$0xff] %v2592_v38  ;;  %v2974_v38 = vld [vmem:[%s3480_s2 + $0x50] sm:$0xff] }
  0xc4   :  { %3542 = vst [vmem:[#allocation10_spill] sm:$0xff] %v2594_v40  ;;  %v2969_v40 = vld [vmem:[%s3480_s2 + $0x48] sm:$0xff] }
  0xc5   :  { %3567 = vst [vmem:[#allocation35_spill] sm:$0xff] %v2969_v40 }
  0xc6   :  { %v219_v41 = vpop.f32.mrf.mxu2  ;;  %v260_v42 = vpop.f32.mrf.mxu3  ;;  %3568 = vst [vmem:[#allocation36_spill] sm:$0xff] %v2974_v38 }
  0xc7   :  { %v2597_v43 = vadd.f32 %v219_v41, %v2562_v12  ;;  %v2600_v44 = vadd.f32 %v260_v42, %v2564_v14  ;;  %v140_v45 = vpop.f32.mrf.mxu0  ;;  %v181_v46 = vpop.f32.mrf.mxu1  ;;  %3569 = vst [vmem:[#allocation37_spill] sm:$0xff] %v2981_v35 }
  0xc8   :  { %v2602_v47 = vadd.f32 %v140_v45, %v100_v4  ;;  %v2604_v48 = vadd.f32 %v181_v46, %v101_v5  ;;  %3570 = vst [vmem:[#allocation38_spill] sm:$0xff] %v2988_v34 }
  0xc9   :  { %3543 = vst [vmem:[#allocation11_spill] sm:$0xff] %v2597_v43  ;;  %v2964_v43 = vld [vmem:[%s3480_s2 + $0x40] sm:$0xff] }
  0xca   :  { %3544 = vst [vmem:[#allocation12_spill] sm:$0xff] %v2600_v44  ;;  %v2957_v44 = vld [vmem:[%s3480_s2 + $0x78] sm:$0xff] }
  0xcb   :  { %3545 = vst [vmem:[#allocation13_spill] sm:$0xff] %v2602_v47  ;;  %v2950_v47 = vld [vmem:[%s3480_s2 + $0x70] sm:$0xff] }
  0xcc   :  { %3546 = vst [vmem:[#allocation14_spill] sm:$0xff] %v2604_v48  ;;  %v2945_v48 = vld [vmem:[%s3480_s2 + $0x68] sm:$0xff] }
  0xcd   :  { %3563 = vst [vmem:[#allocation31_spill] sm:$0xff] %v2945_v48 }
  0xce   :  { %v222_v49 = vpop.f32.mrf.mxu2  ;;  %v263_v50 = vpop.f32.mrf.mxu3  ;;  %3564 = vst [vmem:[#allocation32_spill] sm:$0xff] %v2950_v47 }
  0xcf   :  { %v2607_v51 = vadd.f32 %v222_v49, %v2562_v12  ;;  %v2610_v53 = vadd.f32 %v263_v50, %v2564_v14  ;;  %v143_v54 = vpop.f32.mrf.mxu0  ;;  %v184_v55 = vpop.f32.mrf.mxu1  ;;  %3565 = vst [vmem:[#allocation33_spill] sm:$0xff] %v2957_v44 }
  0xd0   :  { %v2612_v56 = vadd.f32 %v143_v54, %v100_v4  ;;  %v2614_v57 = vadd.f32 %v184_v55, %v101_v5  ;;  %3566 = vst [vmem:[#allocation34_spill] sm:$0xff] %v2964_v43 }
  0xd1   :  { %3547 = vst [vmem:[#allocation15_spill] sm:$0xff] %v2607_v51  ;;  %v2940_v51 = vld [vmem:[%s3480_s2 + $0x60] sm:$0xff] }
  0xd2   :  { %3548 = vst [vmem:[#allocation16_spill] sm:$0xff] %v2610_v53  ;;  %v2933_v53 = vld [vmem:[%s3480_s2 + $0x98] sm:$0xff] }
  0xd3   :  { %3549 = vst [vmem:[#allocation17_spill] sm:$0xff] %v2612_v56  ;;  %v2926_v56 = vld [vmem:[%s3480_s2 + $0x90] sm:$0xff] }
  0xd4   :  { %3550 = vst [vmem:[#allocation18_spill] sm:$0xff] %v2614_v57  ;;  %v2921_v57 = vld [vmem:[%s3480_s2 + $0x88] sm:$0xff] }
  0xd5   :  { %3559 = vst [vmem:[#allocation27_spill] sm:$0xff] %v2921_v57 }
  0xd6   :  { %v225_v58 = vpop.f32.mrf.mxu2  ;;  %v266_v59 = vpop.f32.mrf.mxu3  ;;  %3560 = vst [vmem:[#allocation28_spill] sm:$0xff] %v2926_v56 }
  0xd7   :  { %v2617_v60 = vadd.f32 %v225_v58, %v2562_v12  ;;  %v2620_v61 = vadd.f32 %v266_v59, %v2564_v14  ;;  %v146_v62 = vpop.f32.mrf.mxu0  ;;  %v187_v63 = vpop.f32.mrf.mxu1  ;;  %v2642_v58 = vld [vmem:[%s3480_s2 + $0x1e0] sm:$0xff]  ;;  %v2647_v59 = vld [vmem:[%s3480_s2 + $0x1e8] sm:$0xff]  ;;  %3561 = vst [vmem:[#allocation29_spill] sm:$0xff] %v2933_v53 }
  0xd8   :  { %v2622_v26 = vadd.f32 %v146_v62, %v100_v4  ;;  %v2624_v39 = vadd.f32 %v187_v63, %v101_v5  ;;  %3557 = vst [vmem:[#allocation25_spill] sm:$0xff] %v2642_v58  ;;  %v2652_v62 = vld [vmem:[%s3480_s2 + $0x1f0] sm:$0xff] }
  0xd9   :  { %3551 = vst [vmem:[#allocation19_spill] sm:$0xff] %v2617_v60  ;;  %v2916_v60 = vld [vmem:[%s3480_s2 + $0x80] sm:$0xff] }
  0xda   :  { %3552 = vst [vmem:[#allocation20_spill] sm:$0xff] %v2620_v61  ;;  %v2909_v61 = vld [vmem:[%s3480_s2 + $0xb8] sm:$0xff] }
  0xdb   :  { %3553 = vst [vmem:[#allocation21_spill] sm:$0xff] %v2622_v26  ;;  %v2902_v26 = vld [vmem:[%s3480_s2 + $0xb0] sm:$0xff] }
  0xdc   :  { %3554 = vst [vmem:[#allocation22_spill] sm:$0xff] %v2624_v39  ;;  %v2897_v39 = vld [vmem:[%s3480_s2 + $0xa8] sm:$0xff] }
  0xdd   :  { %3558 = vst [vmem:[#allocation26_spill] sm:$0xff] %v2647_v59 }
  0xde   :  { %v228_v0 = vpop.f32.mrf.mxu2  ;;  %v269_v3 = vpop.f32.mrf.mxu3  ;;  %3562 = vst [vmem:[#allocation30_spill] sm:$0xff] %v2940_v51 }
  0xdf   :  { %v2627_v8 = vadd.f32 %v228_v0, %v2562_v12  ;;  %v2630_v9 = vadd.f32 %v269_v3, %v2564_v14  ;;  %v394_v15 = vpop.f32.mrf.mxu0  ;;  %v414_v16 = vpop.f32.mrf.mxu1 }
  0xe0   :  { %v395_v19 = vadd.f32 %v394_v15, %v126_v52  ;;  %v415_v20 = vadd.f32 %v414_v16, %v167_v13  ;;  %v2659_v13 = vld [vmem:[%s3480_s2 + $0x1f8] sm:$0xff] }
  0xe1   :  { %3555 = vst [vmem:[#allocation23_spill] sm:$0xff] %v2627_v8  ;;  %v2892_v8 = vld [vmem:[%s3480_s2 + $0xa0] sm:$0xff] }
  0xe2   :  { %3556 = vst [vmem:[#allocation24_spill] sm:$0xff] %v2630_v9  ;;  %v457_v23 = vmul.f32 0.5, %v395_v19  ;;  %v461_v24 = vmul.f32 0.5, %v415_v20  ;;  %v2885_v9 = vld [vmem:[%s3480_s2 + $0xd8] sm:$0xff] }
  0xe4   :  { %1707 = vtanh.f32 %v457_v23 }
  0xe5   :  { %1709 = vtanh.f32 %v461_v24 }
  0xe6   :  { %v434_v2 = vpop.f32.mrf.mxu2  ;;  %v454_v4 = vpop.f32.mrf.mxu3 }
  0xe7   :  { %v435_v5 = vadd.f32 %v434_v2, %v208_v28  ;;  %v455_v29 = vadd.f32 %v454_v4, %v249_v1 }
  0xe9   :  { %1711 = vtanh.f32 %v435_v5  ;;  %v466_v32 = vmul.f32 0.5, %v455_v29 }
  0xea   :  { %v1708_v33 = vpop.eup %1707 }
  0xeb   :  { %v1710_v36 = vpop.eup %1709  ;;  %v459_v37 = vmul.f32 0.5, %v1708_v33  ;;  %1713 = vtanh.f32 %v466_v32 }
  0xec   :  { %v463_v41 = vmul.f32 0.5, %v1710_v36 }
  0xed   :  { %v460_v42 = vadd.f32 0.5, %v459_v37 }
  0xee   :  { %v464_v45 = vadd.f32 0.5, %v463_v41 }
  0xef   :  { %v1712_v46 = vpop.eup %1711 }
  0xf0   :  { %v470_v49 = vmul.f32 0.0, %v464_v45  ;;  %v471_v6 = vmul.f32 %v1712_v46, %v460_v42  ;;  %v2676_v45 = vld [vmem:[%s3480_s2 + $0x1c0] sm:$0xff]  ;;  %v2681_v46 = vld [vmem:[%s3480_s2 + $0x1c8] sm:$0xff] }
  0xf1   :  { %v1714_v12 = vpop.eup %1713 }
  0xf2   :  { %v472_v50 = vadd.f32 %v471_v6, %v470_v49  ;;  %v468_v7 = vmul.f32 0.5, %v1714_v12  ;;  %v2686_v49 = vld [vmem:[%s3480_s2 + $0x1d0] sm:$0xff]  ;;  %v2693_v6 = vld [vmem:[%s3480_s2 + $0x1d8] sm:$0xff]  ;;  %v2700_v12 = vld [vmem:[%s3480_s2 + $0x1a0] sm:$0xff] }
  0xf4   :  { %1715 = vtanh.f32 %v472_v50  ;;  %v469_v14 = vadd.f32 0.5, %v468_v7  ;;  %v2710_v7 = vld [vmem:[%s3480_s2 + $0x1b0] sm:$0xff] }
  0xfa   :  { %v1716_v54 = vpop.eup %1715 }
  0xfb   :  { %v474_v55 = vmul.f32 %v1716_v54, %v469_v14  ;;  %v2717_v14 = vld [vmem:[%s3480_s2 + $0x1b8] sm:$0xff]  ;;  %v2724_v54 = vld [vmem:[%s3480_s2 + $0x180] sm:$0xff] }
  0xfd   :  { %475 = vst [vmem:[%s3482_s4] sm:$0xff] %v474_v55  ;;  %563 = vmatmul.f32.vlgmr.msra.gmra.mxu0 %v474_v55  ;;  %583 = vmatmul.f32.vlgmr.msra.gmra.mxu1 %v474_v55 }
  0xfe   :  { %603 = vmatmul.f32.vlgmr.msra.gmra.mxu2 %v474_v55  ;;  %623 = vmatmul.f32.vlgmr.msra.gmra.mxu3 %v474_v55  ;;  %v2729_v55 = vld [vmem:[%s3480_s2 + $0x188] sm:$0xff] }
  0xff   :  { %889 = vmatpush.msra.mxu0 %v2642_v58  ;;  %909 = vmatpush.msra.mxu1 %v2647_v59 }
 0x100   :  { %929 = vmatpush.msra.mxu2 %v2652_v62  ;;  %949 = vmatpush.msra.mxu3 %v2659_v13 }
 0x101   :  { %890 = vmatpush.msra.mxu0 %v2676_v45  ;;  %910 = vmatpush.msra.mxu1 %v2681_v46 }
 0x102   :  { %930 = vmatpush.msra.mxu2 %v2686_v49  ;;  %950 = vmatpush.msra.mxu3 %v2693_v6 }
 0x103   :  { %891 = vmatpush.msra.mxu0 %v2700_v12 }
 0x104   :  { %931 = vmatpush.msra.mxu2 %v2710_v7  ;;  %951 = vmatpush.msra.mxu3 %v2717_v14 }
 0x105   :  { %892 = vmatpush.msra.mxu0 %v2724_v54 }
 0x17a   :  { %v564_v63 = vpop.f32.mrf.mxu0  ;;  %v584_v52 = vpop.f32.mrf.mxu1 }
 0x17b   :  { %v565_v0 = vadd.f32 %v564_v63, %v2558_v10  ;;  %v585_v3 = vadd.f32 %v584_v52, %v2560_v11  ;;  %v2734_v63 = vld [vmem:[%s3480_s2 + $0x190] sm:$0xff]  ;;  %v2741_v52 = vld [vmem:[%s3480_s2 + $0x198] sm:$0xff] }
 0x17c   :  { %932 = vmatpush.msra.mxu2 %v2734_v63  ;;  %952 = vmatpush.msra.mxu3 %v2741_v52 }
 0x17d   :  { %v627_v15 = vmul.f32 0.5, %v565_v0  ;;  %v631_v16 = vmul.f32 0.5, %v585_v3  ;;  %v2748_v0 = vld [vmem:[%s3480_s2 + $0x160] sm:$0xff]  ;;  %v2753_v3 = vld [vmem:[%s3480_s2 + $0x168] sm:$0xff] }
 0x17e   :  { %893 = vmatpush.msra.mxu0 %v2748_v0 }
 0x17f   :  { %1717 = vtanh.f32 %v627_v15  ;;  %v2758_v15 = vld [vmem:[%s3480_s2 + $0x170] sm:$0xff] }
 0x180   :  { %1719 = vtanh.f32 %v631_v16  ;;  %v2765_v16 = vld [vmem:[%s3480_s2 + $0x178] sm:$0xff]  ;;  %933 = vmatpush.msra.mxu2 %v2758_v15 }
 0x181   :  { %v604_v19 = vpop.f32.mrf.mxu2  ;;  %v624_v20 = vpop.f32.mrf.mxu3  ;;  %953 = vmatpush.msra.mxu3 %v2765_v16 }
 0x182   :  { %v605_v23 = vadd.f32 %v604_v19, %v2567_v17  ;;  %v625_v24 = vadd.f32 %v624_v20, %v2570_v18  ;;  %v2772_v19 = vld [vmem:[%s3480_s2 + $0x140] sm:$0xff]  ;;  %v2777_v20 = vld [vmem:[%s3480_s2 + $0x148] sm:$0xff] }
 0x183   :  { %894 = vmatpush.msra.mxu0 %v2772_v19 }
 0x184   :  { %1721 = vtanh.f32 %v605_v23  ;;  %v636_v28 = vmul.f32 0.5, %v625_v24  ;;  %v2782_v23 = vld [vmem:[%s3480_s2 + $0x150] sm:$0xff]  ;;  %v2789_v24 = vld [vmem:[%s3480_s2 + $0x158] sm:$0xff] }
 0x185   :  { %v1718_v1 = vpop.eup %1717  ;;  %934 = vmatpush.msra.mxu2 %v2782_v23  ;;  %954 = vmatpush.msra.mxu3 %v2789_v24 }
 0x186   :  { %v1720_v10 = vpop.eup %1719  ;;  %v629_v2 = vmul.f32 0.5, %v1718_v1  ;;  %1723 = vtanh.f32 %v636_v28  ;;  %v2796_v28 = vld [vmem:[%s3480_s2 + $0x120] sm:$0xff]  ;;  %v2801_v1 = vld [vmem:[%s3480_s2 + $0x128] sm:$0xff] }
 0x187   :  { %v633_v11 = vmul.f32 0.5, %v1720_v10  ;;  %v2806_v10 = vld [vmem:[%s3480_s2 + $0x130] sm:$0xff]  ;;  %895 = vmatpush.msra.mxu0 %v2796_v28 }
 0x188   :  { %v630_v4 = vadd.f32 0.5, %v629_v2  ;;  %v2813_v2 = vld [vmem:[%s3480_s2 + $0x138] sm:$0xff]  ;;  %935 = vmatpush.msra.mxu2 %v2806_v10 }
 0x189   :  { %v634_v5 = vadd.f32 0.5, %v633_v11  ;;  %955 = vmatpush.msra.mxu3 %v2813_v2  ;;  %v2820_v11 = vld [vmem:[%s3480_s2 + $0x100] sm:$0xff] }
 0x18a   :  { %v1722_v29 = vpop.eup %1721  ;;  %896 = vmatpush.msra.mxu0 %v2820_v11 }
 0x18b   :  { %v640_v32 = vmul.f32 %v634_v5, %v472_v50  ;;  %v641_v33 = vmul.f32 %v1722_v29, %v630_v4  ;;  %v2705_v50 = vld [vmem:[%s3480_s2 + $0x1a8] sm:$0xff]  ;;  %v2830_v5 = vld [vmem:[%s3480_s2 + $0x110] sm:$0xff]  ;;  %v2837_v29 = vld [vmem:[%s3480_s2 + $0x118] sm:$0xff] }
 0x18c   :  { %v1724_v36 = vpop.eup %1723  ;;  %911 = vmatpush.msra.mxu1 %v2705_v50  ;;  %v2825_v4 = vld [vmem:[%s3480_s2 + $0x108] sm:$0xff]  ;;  %936 = vmatpush.msra.mxu2 %v2830_v5 }
 0x18d   :  { %v2667_v37 = vadd.f32 %v641_v33, %v640_v32  ;;  %v638_v17 = vmul.f32 0.5, %v1724_v36  ;;  %956 = vmatpush.msra.mxu3 %v2837_v29  ;;  %v2844_v32 = vld [vmem:[%s3480_s2 + $0xe0] sm:$0xff]  ;;  %v2849_v33 = vld [vmem:[%s3480_s2 + $0xe8] sm:$0xff]  ;;  %v2854_v36 = vld [vmem:[%s3480_s2 + $0xf0] sm:$0xff] }
 0x18e   :  { %912 = vmatpush.msra.mxu1 %v2729_v55  ;;  %897 = vmatpush.msra.mxu0 %v2844_v32 }
 0x18f   :  { %1725 = vtanh.f32 %v2667_v37  ;;  %v639_v41 = vadd.f32 0.5, %v638_v17  ;;  %v2861_v17 = vld [vmem:[%s3480_s2 + $0xf8] sm:$0xff]  ;;  %937 = vmatpush.msra.mxu2 %v2854_v36 }
 0x190   :  { %913 = vmatpush.msra.mxu1 %v2753_v3  ;;  %957 = vmatpush.msra.mxu3 %v2861_v17 }
 0x192   :  { %914 = vmatpush.msra.mxu1 %v2777_v20  ;;  %958 = vmatpush.msra.mxu3 %v2885_v9 }
 0x194   :  { %915 = vmatpush.msra.mxu1 %v2801_v1  ;;  %959 = vmatpush.msra.mxu3 %v2909_v61 }
 0x195   :  { %v1726_v18 = vpop.eup %1725 }
 0x196   :  { %v644_v42 = vmul.f32 %v1726_v18, %v639_v41  ;;  %916 = vmatpush.msra.mxu1 %v2825_v4  ;;  %v2868_v41 = vld [vmem:[%s3480_s2 + $0xc0] sm:$0xff]  ;;  %v2873_v18 = vld [vmem:[%s3480_s2 + $0xc8] sm:$0xff]  ;;  %960 = vmatpush.msra.mxu3 %v2933_v53 }
 0x197   :  { %898 = vmatpush.msra.mxu0 %v2868_v41 }
 0x198   :  { %1699 = vst [vmem:[%s3482_s4 + $0x8] sm:$0xff] %v644_v42  ;;  %734 = vmatmul.f32.vlgmr.msrb.gmra.mxu0 %v644_v42  ;;  %754 = vmatmul.f32.vlgmr.msrb.gmra.mxu1 %v644_v42 }
 0x199   :  { %774 = vmatmul.f32.vlgmr.msrb.gmra.mxu2 %v644_v42  ;;  %794 = vmatmul.f32.vlgmr.msrb.gmra.mxu3 %v644_v42  ;;  %v2878_v42 = vld [vmem:[%s3480_s2 + $0xd0] sm:$0xff] }
 0x19a   :  { %917 = vmatpush.msra.mxu1 %v2849_v33  ;;  %938 = vmatpush.msra.mxu2 %v2878_v42 }
 0x19b   :  { %899 = vmatpush.msra.mxu0 %v2892_v8  ;;  %961 = vmatpush.msra.mxu3 %v2957_v44 }
 0x19c   :  { %918 = vmatpush.msra.mxu1 %v2873_v18  ;;  %939 = vmatpush.msra.mxu2 %v2902_v26 }
 0x19d   :  { %900 = vmatpush.msra.mxu0 %v2916_v60  ;;  %962 = vmatpush.msra.mxu3 %v2981_v35  ;;  %v3005_v35 = vld [vmem:[%s3480_s2 + $0x38] sm:$0xff] }
 0x19e   :  { %919 = vmatpush.msra.mxu1 %v2897_v39  ;;  %940 = vmatpush.msra.mxu2 %v2926_v56  ;;  %3573 = vst [vmem:[#allocation41_spill] sm:$0xff] %v3005_v35 }
 0x19f   :  { %901 = vmatpush.msra.mxu0 %v2940_v51  ;;  %963 = vmatpush.msra.mxu3 %v3005_v35  ;;  %v3029_v35 = vld [vmem:[%s3480_s2 + $0x18] sm:$0xff] }
 0x1a0   :  { %920 = vmatpush.msra.mxu1 %v2921_v57  ;;  %941 = vmatpush.msra.mxu2 %v2950_v47  ;;  %3577 = vst [vmem:[#allocation45_spill] sm:$0xff] %v3029_v35 }
 0x1a1   :  { %902 = vmatpush.msra.mxu0 %v2964_v43  ;;  %964 = vmatpush.msra.mxu3 %v3029_v35 }
 0x1a2   :  { %921 = vmatpush.msra.mxu1 %v2945_v48  ;;  %942 = vmatpush.msra.mxu2 %v2974_v38  ;;  %v3012_v38 = vld [vmem:[%s3480_s2] sm:$0xff] }
 0x1a3   :  { %903 = vmatpush.msra.mxu0 %v2988_v34  ;;  %3574 = vst [vmem:[#allocation42_spill] sm:$0xff] %v3012_v38  ;;  %v3017_v34 = vld [vmem:[%s3480_s2 + $0x8] sm:$0xff]  ;;  %1120 = vmatpush.msrb.mxu3 %v2659_v13 }
 0x1a4   :  { %922 = vmatpush.msra.mxu1 %v2969_v40  ;;  %943 = vmatpush.msra.mxu2 %v2998_v30  ;;  %3575 = vst [vmem:[#allocation43_spill] sm:$0xff] %v3017_v34 }
 0x1a5   :  { %904 = vmatpush.msra.mxu0 %v3012_v38  ;;  %1121 = vmatpush.msrb.mxu3 %v2693_v6 }
 0x1a6   :  { %923 = vmatpush.msra.mxu1 %v2993_v31  ;;  %v3022_v31 = vld [vmem:[%s3480_s2 + $0x10] sm:$0xff] }
 0x1a7   :  { %3576 = vst [vmem:[#allocation44_spill] sm:$0xff] %v3022_v31  ;;  %944 = vmatpush.msra.mxu2 %v3022_v31  ;;  %1060 = vmatpush.msrb.mxu0 %v2642_v58 }
 0x1a8   :  { %924 = vmatpush.msra.mxu1 %v3017_v34  ;;  %1122 = vmatpush.msrb.mxu3 %v2717_v14 }
 0x1a9   :  { %1100 = vmatpush.msrb.mxu2 %v2652_v62  ;;  %1061 = vmatpush.msrb.mxu0 %v2676_v45 }
 0x1aa   :  { %1080 = vmatpush.msrb.mxu1 %v2647_v59  ;;  %1123 = vmatpush.msrb.mxu3 %v2741_v52 }
 0x1ab   :  { %1101 = vmatpush.msrb.mxu2 %v2686_v49  ;;  %1062 = vmatpush.msrb.mxu0 %v2700_v12 }
 0x1ac   :  { %1081 = vmatpush.msrb.mxu1 %v2681_v46  ;;  %1124 = vmatpush.msrb.mxu3 %v2765_v16 }
 0x1ad   :  { %1102 = vmatpush.msrb.mxu2 %v2710_v7  ;;  %1063 = vmatpush.msrb.mxu0 %v2724_v54 }
 0x1ae   :  { %1082 = vmatpush.msrb.mxu1 %v2705_v50  ;;  %1125 = vmatpush.msrb.mxu3 %v2789_v24 }
 0x1af   :  { %1103 = vmatpush.msrb.mxu2 %v2734_v63  ;;  %1064 = vmatpush.msrb.mxu0 %v2748_v0 }
 0x1b0   :  { %1083 = vmatpush.msrb.mxu1 %v2729_v55  ;;  %1126 = vmatpush.msrb.mxu3 %v2813_v2 }
 0x1b1   :  { %1104 = vmatpush.msrb.mxu2 %v2758_v15  ;;  %1065 = vmatpush.msrb.mxu0 %v2772_v19 }
 0x1b2   :  { %1084 = vmatpush.msrb.mxu1 %v2753_v3  ;;  %1127 = vmatpush.msrb.mxu3 %v2837_v29 }
 0x1b3   :  { %1105 = vmatpush.msrb.mxu2 %v2782_v23  ;;  %1066 = vmatpush.msrb.mxu0 %v2796_v28 }
 0x1b4   :  { %1085 = vmatpush.msrb.mxu1 %v2777_v20  ;;  %1128 = vmatpush.msrb.mxu3 %v2861_v17 }
 0x1b5   :  { %1106 = vmatpush.msrb.mxu2 %v2806_v10  ;;  %1067 = vmatpush.msrb.mxu0 %v2820_v11 }
 0x1b6   :  { %1086 = vmatpush.msrb.mxu1 %v2801_v1  ;;  %1129 = vmatpush.msrb.mxu3 %v2885_v9 }
 0x1b7   :  { %1107 = vmatpush.msrb.mxu2 %v2830_v5  ;;  %1068 = vmatpush.msrb.mxu0 %v2844_v32 }
 0x1b8   :  { %1087 = vmatpush.msrb.mxu1 %v2825_v4  ;;  %1130 = vmatpush.msrb.mxu3 %v2909_v61 }
 0x1b9   :  { %1108 = vmatpush.msrb.mxu2 %v2854_v36  ;;  %1069 = vmatpush.msrb.mxu0 %v2868_v41 }
 0x1ba   :  { %1088 = vmatpush.msrb.mxu1 %v2849_v33  ;;  %1131 = vmatpush.msrb.mxu3 %v2933_v53 }
 0x1bb   :  { %1109 = vmatpush.msrb.mxu2 %v2878_v42  ;;  %1070 = vmatpush.msrb.mxu0 %v2892_v8 }
 0x1bc   :  { %1089 = vmatpush.msrb.mxu1 %v2873_v18  ;;  %1132 = vmatpush.msrb.mxu3 %v2957_v44  ;;  %v3586_v44 = vld [vmem:[#allocation42_spill] sm:$0xff] }
 0x1bd   :  { %1110 = vmatpush.msrb.mxu2 %v2902_v26  ;;  %1071 = vmatpush.msrb.mxu0 %v2916_v60 }
 0x1be   :  { %1090 = vmatpush.msrb.mxu1 %v2897_v39 }
 0x1bf   :  { %1111 = vmatpush.msrb.mxu2 %v2926_v56  ;;  %1072 = vmatpush.msrb.mxu0 %v2940_v51 }
 0x1c0   :  { %1091 = vmatpush.msrb.mxu1 %v2921_v57 }
 0x1c1   :  { %1112 = vmatpush.msrb.mxu2 %v2950_v47  ;;  %1073 = vmatpush.msrb.mxu0 %v2964_v43  ;;  %v3587_v43 = vld [vmem:[#allocation43_spill] sm:$0xff] }
 0x1c2   :  { %1092 = vmatpush.msrb.mxu1 %v2945_v48 }
 0x215   :  { %v735_v30 = vpop.f32.mrf.mxu0  ;;  %v755_v40 = vpop.f32.mrf.mxu1 }
 0x216   :  { %v736_v34 = vadd.f32 %v735_v30, %v2572_v21  ;;  %v756_v38 = vadd.f32 %v755_v40, %v2574_v22 }
 0x218   :  { %v798_v58 = vmul.f32 0.5, %v736_v34  ;;  %v802_v59 = vmul.f32 0.5, %v756_v38 }
 0x21a   :  { %1727 = vtanh.f32 %v798_v58 }
 0x21b   :  { %1729 = vtanh.f32 %v802_v59 }
 0x21c   :  { %v775_v21 = vpop.f32.mrf.mxu2  ;;  %v795_v22 = vpop.f32.mrf.mxu3 }
 0x21d   :  { %v776_v30 = vadd.f32 %v775_v21, %v2577_v25  ;;  %v796_v34 = vadd.f32 %v795_v22, %v2580_v27 }
 0x21f   :  { %1731 = vtanh.f32 %v776_v30  ;;  %v807_v38 = vmul.f32 0.5, %v796_v34 }
 0x220   :  { %v1728_v40 = vpop.eup %1727 }
 0x221   :  { %v1730_v25 = vpop.eup %1729  ;;  %v800_v27 = vmul.f32 0.5, %v1728_v40  ;;  %1733 = vtanh.f32 %v807_v38 }
 0x222   :  { %v804_v58 = vmul.f32 0.5, %v1730_v25  ;;  %v3579_v25 = vld [vmem:[#allocation35_spill] sm:$0xff] }
 0x223   :  { %v801_v59 = vadd.f32 0.5, %v800_v27  ;;  %1093 = vmatpush.msrb.mxu1 %v3579_v25 }
 0x224   :  { %v805_v21 = vadd.f32 0.5, %v804_v58  ;;  %v3580_v58 = vld [vmem:[#allocation36_spill] sm:$0xff] }
 0x225   :  { %v1732_v22 = vpop.eup %1731  ;;  %1113 = vmatpush.msrb.mxu2 %v3580_v58 }
 0x226   :  { %v811_v30 = vmul.f32 %v805_v21, %v2667_v37  ;;  %v812_v34 = vmul.f32 %v1732_v22, %v801_v59  ;;  %v3581_v59 = vld [vmem:[#allocation37_spill] sm:$0xff]  ;;  %v3582_v22 = vld [vmem:[#allocation38_spill] sm:$0xff] }
 0x227   :  { %v1734_v38 = vpop.eup %1733  ;;  %1133 = vmatpush.msrb.mxu3 %v3581_v59  ;;  %1074 = vmatpush.msrb.mxu0 %v3582_v22 }
 0x228   :  { %v3078_v40 = vadd.f32 %v812_v34, %v811_v30  ;;  %v809_v37 = vmul.f32 0.5, %v1734_v38  ;;  %v3583_v30 = vld [vmem:[#allocation39_spill] sm:$0xff]  ;;  %v3584_v38 = vld [vmem:[#allocation40_spill] sm:$0xff] }
 0x229   :  { %1094 = vmatpush.msrb.mxu1 %v3583_v30  ;;  %1114 = vmatpush.msrb.mxu2 %v3584_v38 }
 0x22a   :  { %3578 = vst [vmem:[#allocation46_spill] sm:$0xff] %v3078_v40  ;;  %1735 = vtanh.f32 %v3078_v40  ;;  %v810_v27 = vadd.f32 0.5, %v809_v37  ;;  %v3585_v40 = vld [vmem:[#allocation41_spill] sm:$0xff]  ;;  %1075 = vmatpush.msrb.mxu0 %v3586_v44 }
 0x22b   :  { %1134 = vmatpush.msrb.mxu3 %v3585_v40  ;;  %1095 = vmatpush.msrb.mxu1 %v3587_v43  ;;  %v3588_v37 = vld [vmem:[#allocation25_spill] sm:$0xff] }
 0x22c   :  { %1115 = vmatpush.msrb.mxu2 %v3022_v31 }
 0x22d   :  { %1135 = vmatpush.msrb.mxu3 %v3029_v35 }
 0x230   :  { %v1736_v21 = vpop.eup %1735 }
 0x231   :  { %v815_v34 = vmul.f32 %v1736_v21, %v810_v27  ;;  %v3589_v27 = vld [vmem:[#allocation26_spill] sm:$0xff]  ;;  %v3590_v21 = vld [vmem:[#allocation33_spill] sm:$0xff] }
 0x233   :  { %1700 = vst [vmem:[%s3482_s4 + $0x10] sm:$0xff] %v815_v34  ;;  %905 = vmatmul.f32.vlgmr.msra.gmra.mxu0 %v815_v34  ;;  %925 = vmatmul.f32.vlgmr.msra.gmra.mxu1 %v815_v34 }
 0x234   :  { %945 = vmatmul.f32.vlgmr.msra.gmra.mxu2 %v815_v34  ;;  %965 = vmatmul.f32.vlgmr.msra.gmra.mxu3 %v815_v34  ;;  %v3591_v34 = vld [vmem:[#allocation34_spill] sm:$0xff] }
 0x235   :  { %1231 = vmatpush.msra.mxu0 %v3588_v37  ;;  %1251 = vmatpush.msra.mxu1 %v3589_v27 }
 0x236   :  { %1271 = vmatpush.msra.mxu2 %v2652_v62  ;;  %1291 = vmatpush.msra.mxu3 %v2659_v13 }
 0x237   :  { %1232 = vmatpush.msra.mxu0 %v2676_v45  ;;  %1252 = vmatpush.msra.mxu1 %v2681_v46 }
 0x238   :  { %1272 = vmatpush.msra.mxu2 %v2686_v49  ;;  %1292 = vmatpush.msra.mxu3 %v2693_v6 }
 0x239   :  { %1233 = vmatpush.msra.mxu0 %v2700_v12  ;;  %1253 = vmatpush.msra.mxu1 %v2705_v50 }
 0x23a   :  { %1273 = vmatpush.msra.mxu2 %v2710_v7  ;;  %1293 = vmatpush.msra.mxu3 %v2717_v14 }
 0x23b   :  { %1234 = vmatpush.msra.mxu0 %v2724_v54  ;;  %1254 = vmatpush.msra.mxu1 %v2729_v55 }
 0x23c   :  { %1274 = vmatpush.msra.mxu2 %v2734_v63  ;;  %1294 = vmatpush.msra.mxu3 %v2741_v52 }
 0x23d   :  { %1235 = vmatpush.msra.mxu0 %v2748_v0  ;;  %1255 = vmatpush.msra.mxu1 %v2753_v3 }
 0x23e   :  { %1275 = vmatpush.msra.mxu2 %v2758_v15  ;;  %1295 = vmatpush.msra.mxu3 %v2765_v16 }
 0x23f   :  { %1236 = vmatpush.msra.mxu0 %v2772_v19  ;;  %1256 = vmatpush.msra.mxu1 %v2777_v20 }
 0x240   :  { %1276 = vmatpush.msra.mxu2 %v2782_v23  ;;  %1296 = vmatpush.msra.mxu3 %v2789_v24 }
 0x241   :  { %1237 = vmatpush.msra.mxu0 %v2796_v28  ;;  %1257 = vmatpush.msra.mxu1 %v2801_v1 }
 0x242   :  { %1277 = vmatpush.msra.mxu2 %v2806_v10  ;;  %1297 = vmatpush.msra.mxu3 %v2813_v2 }
 0x243   :  { %1238 = vmatpush.msra.mxu0 %v2820_v11  ;;  %1258 = vmatpush.msra.mxu1 %v2825_v4 }
 0x244   :  { %1278 = vmatpush.msra.mxu2 %v2830_v5  ;;  %1298 = vmatpush.msra.mxu3 %v2837_v29 }
 0x245   :  { %1239 = vmatpush.msra.mxu0 %v2844_v32  ;;  %1259 = vmatpush.msra.mxu1 %v2849_v33 }
 0x246   :  { %1279 = vmatpush.msra.mxu2 %v2854_v36  ;;  %1299 = vmatpush.msra.mxu3 %v2861_v17 }
 0x247   :  { %1240 = vmatpush.msra.mxu0 %v2868_v41  ;;  %1260 = vmatpush.msra.mxu1 %v2873_v18 }
 0x248   :  { %1280 = vmatpush.msra.mxu2 %v2878_v42  ;;  %1300 = vmatpush.msra.mxu3 %v2885_v9 }
 0x249   :  { %1241 = vmatpush.msra.mxu0 %v2892_v8  ;;  %1261 = vmatpush.msra.mxu1 %v2897_v39 }
 0x24a   :  { %1281 = vmatpush.msra.mxu2 %v2902_v26  ;;  %1301 = vmatpush.msra.mxu3 %v2909_v61 }
 0x24b   :  { %1242 = vmatpush.msra.mxu0 %v2916_v60  ;;  %1262 = vmatpush.msra.mxu1 %v2921_v57 }
 0x24c   :  { %1282 = vmatpush.msra.mxu2 %v2926_v56  ;;  %1302 = vmatpush.msra.mxu3 %v2933_v53 }
 0x24d   :  { %1243 = vmatpush.msra.mxu0 %v2940_v51  ;;  %1263 = vmatpush.msra.mxu1 %v2945_v48  ;;  %v3594_v48 = vld [vmem:[#allocation7_spill] sm:$0xff]  ;;  %v3595_v51 = vld [vmem:[#allocation8_spill] sm:$0xff] }
 0x24e   :  { %1283 = vmatpush.msra.mxu2 %v2950_v47  ;;  %1303 = vmatpush.msra.mxu3 %v3590_v21  ;;  %v3593_v21 = vld [vmem:[#allocation6_spill] sm:$0xff] }
 0x24f   :  { %1244 = vmatpush.msra.mxu0 %v3591_v34  ;;  %1264 = vmatpush.msra.mxu1 %v3579_v25  ;;  %v3592_v34 = vld [vmem:[#allocation5_spill] sm:$0xff] }
 0x250   :  { %1284 = vmatpush.msra.mxu2 %v3580_v58  ;;  %1304 = vmatpush.msra.mxu3 %v3581_v59 }
 0x251   :  { %1245 = vmatpush.msra.mxu0 %v3582_v22  ;;  %1265 = vmatpush.msra.mxu1 %v3583_v30 }
 0x252   :  { %1285 = vmatpush.msra.mxu2 %v3584_v38  ;;  %1305 = vmatpush.msra.mxu3 %v3585_v40 }
 0x253   :  { %1246 = vmatpush.msra.mxu0 %v3586_v44  ;;  %1266 = vmatpush.msra.mxu1 %v3587_v43 }
 0x254   :  { %1286 = vmatpush.msra.mxu2 %v3022_v31  ;;  %1306 = vmatpush.msra.mxu3 %v3029_v35 }
 0x2b0   :  { %v906_v25 = vpop.f32.mrf.mxu0  ;;  %v926_v58 = vpop.f32.mrf.mxu1 }
 0x2b1   :  { %v907_v59 = vadd.f32 %v906_v25, %v3592_v34  ;;  %v927_v22 = vadd.f32 %v926_v58, %v3593_v21 }
 0x2b3   :  { %v969_v47 = vmul.f32 0.5, %v907_v59  ;;  %v973_v30 = vmul.f32 0.5, %v927_v22  ;;  %v3596_v59 = vld [vmem:[#allocation46_spill] sm:$0xff] }
 0x2b5   :  { %1737 = vtanh.f32 %v969_v47 }
 0x2b6   :  { %1739 = vtanh.f32 %v973_v30 }
 0x2b7   :  { %v946_v38 = vpop.f32.mrf.mxu2  ;;  %v966_v40 = vpop.f32.mrf.mxu3 }
 0x2b8   :  { %v947_v44 = vadd.f32 %v946_v38, %v3594_v48  ;;  %v967_v43 = vadd.f32 %v966_v40, %v3595_v51  ;;  %v1562_v38 = vld [vmem:[%s3480_s2 + $0x1e0] sm:$0xff] }
 0x2ba   :  { %1741 = vtanh.f32 %v947_v44  ;;  %v978_v31 = vmul.f32 0.5, %v967_v43 }
 0x2bb   :  { %v1738_v53 = vpop.eup %1737 }
 0x2bc   :  { %v1740_v35 = vpop.eup %1739  ;;  %v971_v56 = vmul.f32 0.5, %v1738_v53  ;;  %1743 = vtanh.f32 %v978_v31  ;;  %v3597_v31 = vld [vmem:[#allocation27_spill] sm:$0xff]  ;;  %v3599_v53 = vld [vmem:[#allocation29_spill] sm:$0xff] }
 0x2bd   :  { %v975_v57 = vmul.f32 0.5, %v1740_v35  ;;  %v3598_v35 = vld [vmem:[#allocation28_spill] sm:$0xff] }
 0x2be   :  { %v972_v25 = vadd.f32 0.5, %v971_v56  ;;  %v3600_v56 = vld [vmem:[#allocation30_spill] sm:$0xff] }
 0x2bf   :  { %v976_v34 = vadd.f32 0.5, %v975_v57  ;;  %v3601_v57 = vld [vmem:[#allocation31_spill] sm:$0xff] }
 0x2c0   :  { %v1742_v58 = vpop.eup %1741 }
 0x2c1   :  { %v982_v22 = vmul.f32 %v976_v34, %v3596_v59  ;;  %v983_v47 = vmul.f32 %v1742_v58, %v972_v25  ;;  %v1565_v58 = vld [vmem:[%s3480_s2 + $0x1f8] sm:$0xff]  ;;  %v3620_v59 = vld [vmem:[#allocation13_spill] sm:$0xff] }
 0x2c2   :  { %v1744_v30 = vpop.eup %1743 }
 0x2c3   :  { %v3177_v21 = vadd.f32 %v983_v47, %v982_v22  ;;  %v980_v48 = vmul.f32 0.5, %v1744_v30  ;;  %v3621_v47 = vld [vmem:[#allocation14_spill] sm:$0xff] }
 0x2c5   :  { %1745 = vtanh.f32 %v3177_v21  ;;  %v981_v51 = vadd.f32 0.5, %v980_v48 }
 0x2cb   :  { %v1746_v44 = vpop.eup %1745 }
 0x2cc   :  { %v986_v43 = vmul.f32 %v1746_v44, %v981_v51 }
 0x2ce   :  { %1701 = vst [vmem:[%s3482_s4 + $0x18] sm:$0xff] %v986_v43  ;;  %1076 = vmatmul.f32.vlgmr.msrb.gmra.mxu0 %v986_v43  ;;  %1096 = vmatmul.f32.vlgmr.msrb.gmra.mxu1 %v986_v43 }
 0x2cf   :  { %1116 = vmatmul.f32.vlgmr.msrb.gmra.mxu2 %v986_v43  ;;  %1136 = vmatmul.f32.vlgmr.msrb.gmra.mxu3 %v986_v43  ;;  %v3622_v43 = vld [vmem:[#allocation15_spill] sm:$0xff] }
 0x2d0   :  { %1402 = vmatpush.msrb.mxu0 %v3588_v37  ;;  %1422 = vmatpush.msrb.mxu1 %v3589_v27  ;;  %v1563_v37 = vld [vmem:[%s3480_s2 + $0x1e8] sm:$0xff]  ;;  %v1564_v27 = vld [vmem:[%s3480_s2 + $0x1f0] sm:$0xff] }
 0x2d1   :  { %1442 = vmatpush.msrb.mxu2 %v2652_v62  ;;  %1462 = vmatpush.msrb.mxu3 %v2659_v13  ;;  %v3608_v62 = vld [vmem:[#allocation38_spill] sm:$0xff]  ;;  %v3609_v13 = vld [vmem:[#allocation39_spill] sm:$0xff] }
 0x2d2   :  { %1403 = vmatpush.msrb.mxu0 %v2676_v45  ;;  %1423 = vmatpush.msrb.mxu1 %v2681_v46  ;;  %v3610_v45 = vld [vmem:[#allocation40_spill] sm:$0xff]  ;;  %v3611_v46 = vld [vmem:[#allocation41_spill] sm:$0xff] }
 0x2d3   :  { %1443 = vmatpush.msrb.mxu2 %v2686_v49  ;;  %1463 = vmatpush.msrb.mxu3 %v2693_v6  ;;  %v3612_v49 = vld [vmem:[#allocation42_spill] sm:$0xff]  ;;  %v3613_v6 = vld [vmem:[#allocation43_spill] sm:$0xff] }
 0x2d4   :  { %1404 = vmatpush.msrb.mxu0 %v2700_v12  ;;  %1424 = vmatpush.msrb.mxu1 %v2705_v50  ;;  %v3614_v12 = vld [vmem:[#allocation44_spill] sm:$0xff]  ;;  %v3615_v50 = vld [vmem:[#allocation45_spill] sm:$0xff] }
 0x2d5   :  { %1444 = vmatpush.msrb.mxu2 %v2710_v7  ;;  %1464 = vmatpush.msrb.mxu3 %v2717_v14 }
 0x2d6   :  { %1405 = vmatpush.msrb.mxu0 %v2724_v54  ;;  %1425 = vmatpush.msrb.mxu1 %v2729_v55  ;;  %v3616_v54 = vld [vmem:[#allocation9_spill] sm:$0xff] }
 0x2d7   :  { %1445 = vmatpush.msrb.mxu2 %v2734_v63  ;;  %1465 = vmatpush.msrb.mxu3 %v2741_v52  ;;  %v3617_v63 = vld [vmem:[#allocation10_spill] sm:$0xff] }
 0x2d8   :  { %1406 = vmatpush.msrb.mxu0 %v2748_v0  ;;  %1426 = vmatpush.msrb.mxu1 %v2753_v3 }
 0x2d9   :  { %1446 = vmatpush.msrb.mxu2 %v2758_v15  ;;  %1466 = vmatpush.msrb.mxu3 %v2765_v16 }
 0x2da   :  { %1407 = vmatpush.msrb.mxu0 %v2772_v19  ;;  %1427 = vmatpush.msrb.mxu1 %v2777_v20  ;;  %v3618_v19 = vld [vmem:[#allocation11_spill] sm:$0xff] }
 0x2db   :  { %1447 = vmatpush.msrb.mxu2 %v2782_v23  ;;  %1467 = vmatpush.msrb.mxu3 %v2789_v24  ;;  %v3619_v23 = vld [vmem:[#allocation12_spill] sm:$0xff] }
 0x2dc   :  { %1408 = vmatpush.msrb.mxu0 %v2796_v28  ;;  %1428 = vmatpush.msrb.mxu1 %v2801_v1 }
 0x2dd   :  { %1448 = vmatpush.msrb.mxu2 %v2806_v10  ;;  %1468 = vmatpush.msrb.mxu3 %v2813_v2 }
 0x2de   :  { %1409 = vmatpush.msrb.mxu0 %v2820_v11  ;;  %1429 = vmatpush.msrb.mxu1 %v2825_v4 }
 0x2df   :  { %1449 = vmatpush.msrb.mxu2 %v2830_v5  ;;  %1469 = vmatpush.msrb.mxu3 %v2837_v29 }
 0x2e0   :  { %1410 = vmatpush.msrb.mxu0 %v2844_v32  ;;  %1430 = vmatpush.msrb.mxu1 %v2849_v33 }
 0x2e1   :  { %1450 = vmatpush.msrb.mxu2 %v2854_v36  ;;  %1470 = vmatpush.msrb.mxu3 %v2861_v17 }
 0x2e2   :  { %1411 = vmatpush.msrb.mxu0 %v2868_v41  ;;  %1431 = vmatpush.msrb.mxu1 %v2873_v18 }
 0x2e3   :  { %1451 = vmatpush.msrb.mxu2 %v2878_v42  ;;  %1471 = vmatpush.msrb.mxu3 %v2885_v9  ;;  %v3602_v9 = vld [vmem:[#allocation32_spill] sm:$0xff] }
 0x2e4   :  { %1412 = vmatpush.msrb.mxu0 %v2892_v8  ;;  %1432 = vmatpush.msrb.mxu1 %v2897_v39  ;;  %v3603_v8 = vld [vmem:[#allocation33_spill] sm:$0xff]  ;;  %v3604_v39 = vld [vmem:[#allocation34_spill] sm:$0xff] }
 0x2e5   :  { %1452 = vmatpush.msrb.mxu2 %v2902_v26  ;;  %1472 = vmatpush.msrb.mxu3 %v2909_v61  ;;  %v3605_v26 = vld [vmem:[#allocation35_spill] sm:$0xff]  ;;  %v3606_v61 = vld [vmem:[#allocation36_spill] sm:$0xff] }
 0x2e6   :  { %1413 = vmatpush.msrb.mxu0 %v2916_v60  ;;  %1433 = vmatpush.msrb.mxu1 %v3597_v31  ;;  %v3607_v60 = vld [vmem:[#allocation37_spill] sm:$0xff] }
 0x2e7   :  { %1453 = vmatpush.msrb.mxu2 %v3598_v35  ;;  %1473 = vmatpush.msrb.mxu3 %v3599_v53  ;;  %v3623_v35 = vld [vmem:[#allocation16_spill] sm:$0xff] }
 0x2e8   :  { %1414 = vmatpush.msrb.mxu0 %v3600_v56  ;;  %1434 = vmatpush.msrb.mxu1 %v3601_v57 }
 0x2e9   :  { %1454 = vmatpush.msrb.mxu2 %v3602_v9  ;;  %1474 = vmatpush.msrb.mxu3 %v3603_v8 }
 0x2ea   :  { %1415 = vmatpush.msrb.mxu0 %v3604_v39  ;;  %1435 = vmatpush.msrb.mxu1 %v3605_v26 }
 0x2eb   :  { %1455 = vmatpush.msrb.mxu2 %v3606_v61  ;;  %1475 = vmatpush.msrb.mxu3 %v3607_v60 }
 0x2ec   :  { %1416 = vmatpush.msrb.mxu0 %v3608_v62  ;;  %1436 = vmatpush.msrb.mxu1 %v3609_v13 }
 0x2ed   :  { %1456 = vmatpush.msrb.mxu2 %v3610_v45  ;;  %1476 = vmatpush.msrb.mxu3 %v3611_v46 }
 0x2ee   :  { %1417 = vmatpush.msrb.mxu0 %v3612_v49  ;;  %1437 = vmatpush.msrb.mxu1 %v3613_v6 }
 0x2ef   :  { %1457 = vmatpush.msrb.mxu2 %v3614_v12  ;;  %1477 = vmatpush.msrb.mxu3 %v3615_v50 }
 0x34b   :  { %v1077_v7 = vpop.f32.mrf.mxu0  ;;  %v1097_v14 = vpop.f32.mrf.mxu1 }
 0x34c   :  { %v1078_v55 = vadd.f32 %v1077_v7, %v3616_v54  ;;  %v1098_v52 = vadd.f32 %v1097_v14, %v3617_v63  ;;  %v1558_v7 = vld [vmem:[%s3480_s2 + $0x1c0] sm:$0xff]  ;;  %v1559_v14 = vld [vmem:[%s3480_s2 + $0x1c8] sm:$0xff]  ;;  %v1560_v54 = vld [vmem:[%s3480_s2 + $0x1d0] sm:$0xff] }
 0x34d   :  { %v1554_v63 = vld [vmem:[%s3480_s2 + $0x1a0] sm:$0xff] }
 0x34e   :  { %v1140_v0 = vmul.f32 0.5, %v1078_v55  ;;  %v1144_v3 = vmul.f32 0.5, %v1098_v52  ;;  %v1561_v55 = vld [vmem:[%s3480_s2 + $0x1d8] sm:$0xff]  ;;  %v1555_v52 = vld [vmem:[%s3480_s2 + $0x1a8] sm:$0xff] }
 0x350   :  { %1747 = vtanh.f32 %v1140_v0  ;;  %v1556_v0 = vld [vmem:[%s3480_s2 + $0x1b0] sm:$0xff] }
 0x351   :  { %1749 = vtanh.f32 %v1144_v3  ;;  %v1557_v3 = vld [vmem:[%s3480_s2 + $0x1b8] sm:$0xff] }
 0x352   :  { %v1117_v15 = vpop.f32.mrf.mxu2  ;;  %v1137_v16 = vpop.f32.mrf.mxu3 }
 0x353   :  { %v1118_v20 = vadd.f32 %v1117_v15, %v3618_v19  ;;  %v1138_v24 = vadd.f32 %v1137_v16, %v3619_v23  ;;  %v1550_v15 = vld [vmem:[%s3480_s2 + $0x180] sm:$0xff]  ;;  %v1551_v16 = vld [vmem:[%s3480_s2 + $0x188] sm:$0xff]  ;;  %v1552_v19 = vld [vmem:[%s3480_s2 + $0x190] sm:$0xff] }
 0x354   :  { %v1546_v23 = vld [vmem:[%s3480_s2 + $0x160] sm:$0xff] }
 0x355   :  { %1751 = vtanh.f32 %v1118_v20  ;;  %v1149_v28 = vmul.f32 0.5, %v1138_v24  ;;  %v1553_v20 = vld [vmem:[%s3480_s2 + $0x198] sm:$0xff]  ;;  %v1547_v24 = vld [vmem:[%s3480_s2 + $0x168] sm:$0xff] }
 0x356   :  { %v1748_v1 = vpop.eup %1747 }
 0x357   :  { %v1750_v10 = vpop.eup %1749  ;;  %v1142_v2 = vmul.f32 0.5, %v1748_v1  ;;  %1753 = vtanh.f32 %v1149_v28  ;;  %v1548_v28 = vld [vmem:[%s3480_s2 + $0x170] sm:$0xff]  ;;  %v1549_v1 = vld [vmem:[%s3480_s2 + $0x178] sm:$0xff] }
 0x358   :  { %v1146_v11 = vmul.f32 0.5, %v1750_v10  ;;  %v1542_v10 = vld [vmem:[%s3480_s2 + $0x140] sm:$0xff] }
 0x359   :  { %v1143_v4 = vadd.f32 0.5, %v1142_v2  ;;  %v1543_v2 = vld [vmem:[%s3480_s2 + $0x148] sm:$0xff] }
 0x35a   :  { %v1147_v5 = vadd.f32 0.5, %v1146_v11  ;;  %v1544_v11 = vld [vmem:[%s3480_s2 + $0x150] sm:$0xff] }
 0x35b   :  { %v1752_v29 = vpop.eup %1751 }
 0x35c   :  { %v1153_v32 = vmul.f32 %v1147_v5, %v3177_v21  ;;  %v1154_v33 = vmul.f32 %v1752_v29, %v1143_v4  ;;  %v1545_v4 = vld [vmem:[%s3480_s2 + $0x158] sm:$0xff]  ;;  %v1538_v5 = vld [vmem:[%s3480_s2 + $0x120] sm:$0xff]  ;;  %v1539_v29 = vld [vmem:[%s3480_s2 + $0x128] sm:$0xff] }
 0x35d   :  { %v1754_v36 = vpop.eup %1753 }
 0x35e   :  { %v1155_v17 = vadd.f32 %v1154_v33, %v1153_v32  ;;  %v1151_v41 = vmul.f32 0.5, %v1754_v36  ;;  %v1540_v32 = vld [vmem:[%s3480_s2 + $0x130] sm:$0xff]  ;;  %v1541_v33 = vld [vmem:[%s3480_s2 + $0x138] sm:$0xff]  ;;  %v1534_v36 = vld [vmem:[%s3480_s2 + $0x100] sm:$0xff] }
 0x360   :  { %1755 = vtanh.f32 %v1155_v17  ;;  %v1152_v18 = vadd.f32 0.5, %v1151_v41  ;;  %v1536_v41 = vld [vmem:[%s3480_s2 + $0x110] sm:$0xff] }
 0x366   :  { %v1756_v42 = vpop.eup %1755 }
 0x367   :  { %v1157_v40 = vmul.f32 %v1756_v42, %v1152_v18  ;;  %v1537_v18 = vld [vmem:[%s3480_s2 + $0x118] sm:$0xff]  ;;  %v1530_v42 = vld [vmem:[%s3480_s2 + $0xe0] sm:$0xff] }
 0x369   :  { %1702 = vst [vmem:[%s3482_s4 + $0x20] sm:$0xff] %v1157_v40  ;;  %1247 = vmatmul.f32.vlgmr.msra.gmra.mxu0 %v1157_v40  ;;  %1267 = vmatmul.f32.vlgmr.msra.gmra.mxu1 %v1157_v40 }
 0x36a   :  { %1287 = vmatmul.f32.vlgmr.msra.gmra.mxu2 %v1157_v40  ;;  %1307 = vmatmul.f32.vlgmr.msra.gmra.mxu3 %v1157_v40  ;;  %v1531_v40 = vld [vmem:[%s3480_s2 + $0xe8] sm:$0xff] }
 0x36b   :  { %1573 = vmatpush.msra.mxu0 %v1562_v38  ;;  %1593 = vmatpush.msra.mxu1 %v1563_v37  ;;  %v1532_v38 = vld [vmem:[%s3480_s2 + $0xf0] sm:$0xff]  ;;  %v1533_v37 = vld [vmem:[%s3480_s2 + $0xf8] sm:$0xff] }
 0x36c   :  { %1613 = vmatpush.msra.mxu2 %v1564_v27  ;;  %1633 = vmatpush.msra.mxu3 %v1565_v58  ;;  %v1526_v27 = vld [vmem:[%s3480_s2 + $0xc0] sm:$0xff]  ;;  %v1529_v58 = vld [vmem:[%s3480_s2 + $0xd8] sm:$0xff] }
 0x36d   :  { %1574 = vmatpush.msra.mxu0 %v1558_v7  ;;  %1594 = vmatpush.msra.mxu1 %v1559_v14  ;;  %v3625_v14 = vld [vmem:[#allocation18_spill] sm:$0xff] }
 0x36e   :  { %1614 = vmatpush.msra.mxu2 %v1560_v54  ;;  %1634 = vmatpush.msra.mxu3 %v1561_v55 }
 0x36f   :  { %1575 = vmatpush.msra.mxu0 %v1554_v63  ;;  %1595 = vmatpush.msra.mxu1 %v1555_v52 }
 0x370   :  { %1615 = vmatpush.msra.mxu2 %v1556_v0  ;;  %1635 = vmatpush.msra.mxu3 %v1557_v3  ;;  %v3626_v3 = vld [vmem:[#allocation19_spill] sm:$0xff] }
 0x371   :  { %1576 = vmatpush.msra.mxu0 %v1550_v15  ;;  %1596 = vmatpush.msra.mxu1 %v1551_v16  ;;  %v3627_v16 = vld [vmem:[#allocation20_spill] sm:$0xff] }
 0x372   :  { %1616 = vmatpush.msra.mxu2 %v1552_v19  ;;  %1636 = vmatpush.msra.mxu3 %v1553_v20 }
 0x373   :  { %1577 = vmatpush.msra.mxu0 %v1546_v23  ;;  %1597 = vmatpush.msra.mxu1 %v1547_v24 }
 0x374   :  { %1617 = vmatpush.msra.mxu2 %v1548_v28  ;;  %1637 = vmatpush.msra.mxu3 %v1549_v1 }
 0x375   :  { %1578 = vmatpush.msra.mxu0 %v1542_v10  ;;  %1598 = vmatpush.msra.mxu1 %v1543_v2 }
 0x376   :  { %1618 = vmatpush.msra.mxu2 %v1544_v11  ;;  %1638 = vmatpush.msra.mxu3 %v1545_v4 }
 0x377   :  { %1579 = vmatpush.msra.mxu0 %v1538_v5  ;;  %1599 = vmatpush.msra.mxu1 %v1539_v29 }
 0x378   :  { %1619 = vmatpush.msra.mxu2 %v1540_v32  ;;  %1639 = vmatpush.msra.mxu3 %v1541_v33 }
 0x379   :  { %1580 = vmatpush.msra.mxu0 %v1534_v36 }
 0x37a   :  { %1620 = vmatpush.msra.mxu2 %v1536_v41  ;;  %1640 = vmatpush.msra.mxu3 %v1537_v18 }
 0x37b   :  { %1581 = vmatpush.msra.mxu0 %v1530_v42 }
 0x37c   :  { %1621 = vmatpush.msra.mxu2 %v1532_v38  ;;  %1641 = vmatpush.msra.mxu3 %v1533_v37  ;;  %v3629_v38 = vld [vmem:[#allocation22_spill] sm:$0xff] }
 0x37d   :  { %1582 = vmatpush.msra.mxu0 %v1526_v27 }
 0x37e   :  { %1642 = vmatpush.msra.mxu3 %v1529_v58 }
 0x3e6   :  { %v1248_v25 = vpop.f32.mrf.mxu0  ;;  %v1268_v34 = vpop.f32.mrf.mxu1 }
 0x3e7   :  { %v1249_v22 = vadd.f32 %v1248_v25, %v3620_v59  ;;  %v1269_v30 = vadd.f32 %v1268_v34, %v3621_v47  ;;  %v1527_v25 = vld [vmem:[%s3480_s2 + $0xc8] sm:$0xff]  ;;  %v1528_v34 = vld [vmem:[%s3480_s2 + $0xd0] sm:$0xff]  ;;  %v1522_v59 = vld [vmem:[%s3480_s2 + $0xa0] sm:$0xff] }
 0x3e8   :  { %1622 = vmatpush.msra.mxu2 %v1528_v34  ;;  %v1524_v47 = vld [vmem:[%s3480_s2 + $0xb0] sm:$0xff]  ;;  %1583 = vmatpush.msra.mxu0 %v1522_v59 }
 0x3e9   :  { %v1311_v21 = vmul.f32 0.5, %v1249_v22  ;;  %v1315_v48 = vmul.f32 0.5, %v1269_v30  ;;  %v1523_v22 = vld [vmem:[%s3480_s2 + $0xa8] sm:$0xff]  ;;  %v1525_v30 = vld [vmem:[%s3480_s2 + $0xb8] sm:$0xff]  ;;  %v3630_v59 = vld [vmem:[#allocation23_spill] sm:$0xff] }
 0x3ea   :  { %1623 = vmatpush.msra.mxu2 %v1524_v47  ;;  %1643 = vmatpush.msra.mxu3 %v1525_v30  ;;  %v3631_v47 = vld [vmem:[#allocation24_spill] sm:$0xff] }
 0x3eb   :  { %1757 = vtanh.f32 %v1311_v21  ;;  %v1518_v21 = vld [vmem:[%s3480_s2 + $0x80] sm:$0xff] }
 0x3ec   :  { %1759 = vtanh.f32 %v1315_v48  ;;  %v1519_v48 = vld [vmem:[%s3480_s2 + $0x88] sm:$0xff]  ;;  %1584 = vmatpush.msra.mxu0 %v1518_v21 }
 0x3ed   :  { %v1288_v51 = vpop.f32.mrf.mxu2  ;;  %v1308_v44 = vpop.f32.mrf.mxu3 }
 0x3ee   :  { %v1289_v31 = vadd.f32 %v1288_v51, %v3622_v43  ;;  %v1309_v53 = vadd.f32 %v1308_v44, %v3623_v35  ;;  %v1520_v51 = vld [vmem:[%s3480_s2 + $0x90] sm:$0xff]  ;;  %v1521_v44 = vld [vmem:[%s3480_s2 + $0x98] sm:$0xff]  ;;  %v1514_v43 = vld [vmem:[%s3480_s2 + $0x60] sm:$0xff] }
 0x3ef   :  { %1624 = vmatpush.msra.mxu2 %v1520_v51  ;;  %1644 = vmatpush.msra.mxu3 %v1521_v44  ;;  %v1516_v35 = vld [vmem:[%s3480_s2 + $0x70] sm:$0xff] }
 0x3f0   :  { %1761 = vtanh.f32 %v1289_v31  ;;  %v1320_v56 = vmul.f32 0.5, %v1309_v53  ;;  %v1515_v31 = vld [vmem:[%s3480_s2 + $0x68] sm:$0xff]  ;;  %1585 = vmatpush.msra.mxu0 %v1514_v43  ;;  %v1517_v53 = vld [vmem:[%s3480_s2 + $0x78] sm:$0xff] }
 0x3f1   :  { %v1758_v57 = vpop.eup %1757  ;;  %1625 = vmatpush.msra.mxu2 %v1516_v35  ;;  %1645 = vmatpush.msra.mxu3 %v1517_v53 }
 0x3f2   :  { %v1760_v9 = vpop.eup %1759  ;;  %v1313_v8 = vmul.f32 0.5, %v1758_v57  ;;  %1763 = vtanh.f32 %v1320_v56  ;;  %v1510_v56 = vld [vmem:[%s3480_s2 + $0x40] sm:$0xff]  ;;  %v1511_v57 = vld [vmem:[%s3480_s2 + $0x48] sm:$0xff] }
 0x3f3   :  { %v1317_v39 = vmul.f32 0.5, %v1760_v9  ;;  %v1512_v9 = vld [vmem:[%s3480_s2 + $0x50] sm:$0xff]  ;;  %1586 = vmatpush.msra.mxu0 %v1510_v56 }
 0x3f4   :  { %v1314_v26 = vadd.f32 0.5, %v1313_v8  ;;  %v1513_v8 = vld [vmem:[%s3480_s2 + $0x58] sm:$0xff]  ;;  %1626 = vmatpush.msra.mxu2 %v1512_v9 }
 0x3f5   :  { %v1318_v61 = vadd.f32 0.5, %v1317_v39  ;;  %1646 = vmatpush.msra.mxu3 %v1513_v8  ;;  %v1506_v39 = vld [vmem:[%s3480_s2 + $0x20] sm:$0xff] }
 0x3f6   :  { %v1762_v60 = vpop.eup %1761  ;;  %1587 = vmatpush.msra.mxu0 %v1506_v39 }
 0x3f7   :  { %v1324_v62 = vmul.f32 %v1318_v61, %v1155_v17  ;;  %v1325_v13 = vmul.f32 %v1762_v60, %v1314_v26  ;;  %v1535_v17 = vld [vmem:[%s3480_s2 + $0x108] sm:$0xff]  ;;  %v1508_v61 = vld [vmem:[%s3480_s2 + $0x30] sm:$0xff]  ;;  %v1509_v60 = vld [vmem:[%s3480_s2 + $0x38] sm:$0xff] }
 0x3f8   :  { %v1764_v45 = vpop.eup %1763  ;;  %1600 = vmatpush.msra.mxu1 %v1535_v17  ;;  %v1507_v26 = vld [vmem:[%s3480_s2 + $0x28] sm:$0xff]  ;;  %1627 = vmatpush.msra.mxu2 %v1508_v61 }
 0x3f9   :  { %v3271_v46 = vadd.f32 %v1325_v13, %v1324_v62  ;;  %v1322_v49 = vmul.f32 0.5, %v1764_v45  ;;  %1647 = vmatpush.msra.mxu3 %v1509_v60  ;;  %v1502_v62 = vld [vmem:[%s3480_s2] sm:$0xff]  ;;  %v1503_v13 = vld [vmem:[%s3480_s2 + $0x8] sm:$0xff]  ;;  %v1504_v45 = vld [vmem:[%s3480_s2 + $0x10] sm:$0xff] }
 0x3fa   :  { %1601 = vmatpush.msra.mxu1 %v1531_v40  ;;  %1588 = vmatpush.msra.mxu0 %v1502_v62  ;;  %v3628_v40 = vld [vmem:[#allocation21_spill] sm:$0xff] }
 0x3fb   :  { %1765 = vtanh.f32 %v3271_v46  ;;  %v1323_v6 = vadd.f32 0.5, %v1322_v49  ;;  %v1505_v49 = vld [vmem:[%s3480_s2 + $0x18] sm:$0xff]  ;;  %1628 = vmatpush.msra.mxu2 %v1504_v45 }
 0x3fc   :  { %1602 = vmatpush.msra.mxu1 %v1527_v25  ;;  %1648 = vmatpush.msra.mxu3 %v1505_v49 }
 0x3fe   :  { %1603 = vmatpush.msra.mxu1 %v1523_v22 }
 0x400   :  { %1604 = vmatpush.msra.mxu1 %v1519_v48 }
 0x401   :  { %v1766_v12 = vpop.eup %1765 }
 0x402   :  { %v1328_v50 = vmul.f32 %v1766_v12, %v1323_v6  ;;  %1605 = vmatpush.msra.mxu1 %v1515_v31 }
 0x404   :  { %1703 = vst [vmem:[%s3482_s4 + $0x28] sm:$0xff] %v1328_v50  ;;  %1418 = vmatmul.f32.vlgmr.msrb.gmra.mxu0 %v1328_v50  ;;  %1438 = vmatmul.f32.vlgmr.msrb.gmra.mxu1 %v1328_v50 }
 0x405   :  { %1458 = vmatmul.f32.vlgmr.msrb.gmra.mxu2 %v1328_v50  ;;  %1478 = vmatmul.f32.vlgmr.msrb.gmra.mxu3 %v1328_v50  ;;  %v3624_v50 = vld [vmem:[#allocation17_spill] sm:$0xff] }
 0x406   :  { %1606 = vmatpush.msra.mxu1 %v1511_v57 }
 0x408   :  { %1607 = vmatpush.msra.mxu1 %v1507_v26 }
 0x40a   :  { %1608 = vmatpush.msra.mxu1 %v1503_v13 }
 0x481   :  { %v1419_v6 = vpop.f32.mrf.mxu0  ;;  %v1439_v12 = vpop.f32.mrf.mxu1 }
 0x482   :  { %v1420_v7 = vadd.f32 %v1419_v6, %v3624_v50  ;;  %v1440_v54 = vadd.f32 %v1439_v12, %v3625_v14 }
 0x484   :  { %v1482_v55 = vmul.f32 0.5, %v1420_v7  ;;  %v1486_v63 = vmul.f32 0.5, %v1440_v54 }
 0x486   :  { %1767 = vtanh.f32 %v1482_v55 }
 0x487   :  { %1769 = vtanh.f32 %v1486_v63 }
 0x488   :  { %v1459_v52 = vpop.f32.mrf.mxu2  ;;  %v1479_v0 = vpop.f32.mrf.mxu3 }
 0x489   :  { %v1460_v15 = vadd.f32 %v1459_v52, %v3626_v3  ;;  %v1480_v19 = vadd.f32 %v1479_v0, %v3627_v16 }
 0x48b   :  { %1771 = vtanh.f32 %v1460_v15  ;;  %v1491_v20 = vmul.f32 0.5, %v1480_v19 }
 0x48c   :  { %v1768_v23 = vpop.eup %1767 }
 0x48d   :  { %v1770_v24 = vpop.eup %1769  ;;  %v1484_v28 = vmul.f32 0.5, %v1768_v23  ;;  %1773 = vtanh.f32 %v1491_v20 }
 0x48e   :  { %v1488_v1 = vmul.f32 0.5, %v1770_v24 }
 0x48f   :  { %v1485_v10 = vadd.f32 0.5, %v1484_v28 }
 0x490   :  { %v1489_v2 = vadd.f32 0.5, %v1488_v1 }
 0x491   :  { %v1772_v11 = vpop.eup %1771 }
 0x492   :  { %v1495_v4 = vmul.f32 %v1489_v2, %v3271_v46  ;;  %v1496_v5 = vmul.f32 %v1772_v11, %v1485_v10 }
 0x493   :  { %v1774_v29 = vpop.eup %1773 }
 0x494   :  { %v1497_v32 = vadd.f32 %v1496_v5, %v1495_v4  ;;  %v1493_v33 = vmul.f32 0.5, %v1774_v29 }
 0x496   :  { %1775 = vtanh.f32 %v1497_v32  ;;  %v1494_v36 = vadd.f32 0.5, %v1493_v33 }
 0x49c   :  { %v1776_v17 = vpop.eup %1775 }
 0x49d   :  { %v1499_v41 = vmul.f32 %v1776_v17, %v1494_v36 }
 0x49f   :  { %1704 = vst [vmem:[%s3482_s4 + $0x30] sm:$0xff] %v1499_v41  ;;  %1589 = vmatmul.f32.vlgmr.msra.gmra.mxu0 %v1499_v41  ;;  %1609 = vmatmul.f32.vlgmr.msra.gmra.mxu1 %v1499_v41 }
 0x4a0   :  { %1629 = vmatmul.f32.vlgmr.msra.gmra.mxu2 %v1499_v41  ;;  %1649 = vmatmul.f32.vlgmr.msra.gmra.mxu3 %v1499_v41 }
 0x51c   :  { %v1590_v18 = vpop.f32.mrf.mxu0  ;;  %v1610_v42 = vpop.f32.mrf.mxu1 }
 0x51d   :  { %v1591_v46 = vadd.f32 %v1590_v18, %v3628_v40  ;;  %v1611_v37 = vadd.f32 %v1610_v42, %v3629_v38 }
 0x51f   :  { %v1653_v27 = vmul.f32 0.5, %v1591_v46  ;;  %v1657_v25 = vmul.f32 0.5, %v1611_v37 }
 0x521   :  { %1777 = vtanh.f32 %v1653_v27 }
 0x522   :  { %1779 = vtanh.f32 %v1657_v25 }
 0x523   :  { %v1630_v34 = vpop.f32.mrf.mxu2  ;;  %v1650_v58 = vpop.f32.mrf.mxu3 }
 0x524   :  { %v1631_v22 = vadd.f32 %v1630_v34, %v3630_v59  ;;  %v1651_v30 = vadd.f32 %v1650_v58, %v3631_v47 }
 0x526   :  { %1781 = vtanh.f32 %v1631_v22  ;;  %v1662_v21 = vmul.f32 0.5, %v1651_v30 }
 0x527   :  { %v1778_v48 = vpop.eup %1777 }
 0x528   :  { %v1780_v51 = vpop.eup %1779  ;;  %v1655_v44 = vmul.f32 0.5, %v1778_v48  ;;  %1783 = vtanh.f32 %v1662_v21 }
 0x529   :  { %v1659_v43 = vmul.f32 0.5, %v1780_v51 }
 0x52a   :  { %v1656_v31 = vadd.f32 0.5, %v1655_v44 }
 0x52b   :  { %v1660_v35 = vadd.f32 0.5, %v1659_v43 }
 0x52c   :  { %v1782_v53 = vpop.eup %1781 }
 0x52d   :  { %v1666_v56 = vmul.f32 %v1660_v35, %v1497_v32  ;;  %v1667_v57 = vmul.f32 %v1782_v53, %v1656_v31 }
 0x52e   :  { %v1784_v9 = vpop.eup %1783 }
 0x52f   :  { %v1668_v8 = vadd.f32 %v1667_v57, %v1666_v56  ;;  %v1664_v39 = vmul.f32 0.5, %v1784_v9 }
 0x531   :  { %1785 = vtanh.f32 %v1668_v8  ;;  %1679 = vst [vmem:[%s3483_s6] sm:$0xff] %v1668_v8  ;;  %v1665_v26 = vadd.f32 0.5, %v1664_v39 }
 0x537   :  { %v1786_v61 = vpop.eup %1785 }
 0x538   :  { %v1670_v60 = vmul.f32 %v1786_v61, %v1665_v26 }
 0x53a   :  { %1705 = vst [vmem:[%s3482_s4 + $0x38] sm:$0xff] %v1670_v60 }
 0x53b   :  { %1678 = vst [vmem:[%s3484_s5] sm:$0xff] %v1670_v60 }

// kernel: seq2seq_encoder_forward.2
= control target key start
LH: loop header
LB: loop body
LE: loop exit
PB: predicated region body
PF: predicated region fallthrough
CT: control target
= control target key end

     0   :  { %vm52_vm0 = vcmask 130048   ;;  %s3343_s1 = inlined_call_operand.vmem [shape: f32[16,512], index: 1, kind: input, shape index: {}]   ;;  %s3344_s0 = inlined_call_operand.vmem [shape: f32[64,16], index: 0, kind: input, shape index: {}]   ;;  %s3345_s2 = inlined_call_operand.vmem [shape: f32[128,512], index: 2, kind: input, shape index: {}]   ;;  %s3346_s3 = inlined_call_operand.vmem [shape: f32[1,512], index: 3, kind: input, shape index: {}]   ;;  %s3347_s4 = inlined_call_operand.vmem [shape: f32[8,8,128], index: 4, kind: output, shape index: {0}]   ;;  %s3348_s6 = inlined_call_operand.vmem [shape: f32[8,128], index: 6, kind: output, shape index: {2}]   ;;  %s3349_s5 = inlined_call_operand.vmem [shape: f32[8,128], index: 5, kind: output, shape index: {1}]  }
   0x1   :  { %v38_v0 = vld [vmem:[%s3343_s1 + $0x20] sm:$0xff]  ;;  %v39_v1 = vld [vmem:[%s3343_s1 + $0x28] sm:$0xff]  ;;  %v40_v2 = vld [vmem:[%s3343_s1 + $0x30] sm:$0xff] }
   0x2   :  { %91 = vmatpush.msra.mxu0 %v38_v0  ;;  %132 = vmatpush.msra.mxu1 %v39_v1  ;;  %v41_v3 = vld [vmem:[%s3343_s1 + $0x38] sm:$0xff]  ;;  %v34_v4 = vld [vmem:[%s3343_s1] sm:$0xff]  ;;  %v35_v5 = vld [vmem:[%s3343_s1 + $0x8] sm:$0xff] }
   0x3   :  { %173 = vmatpush.msra.mxu2 %v40_v2  ;;  %214 = vmatpush.msra.mxu3 %v41_v3  ;;  %v36_v6 = vld [vmem:[%s3343_s1 + $0x10] sm:$0xff]  ;;  %v37_v7 = vld [vmem:[%s3343_s1 + $0x18] sm:$0xff]  ;;  %v26_v8 = vld [vmem:[%s3344_s0] sm:$0xff] }
   0x4   :  { %92 = vmatpush.msra.mxu0 %v34_v4  ;;  %133 = vmatpush.msra.mxu1 %v35_v5  ;;  %v1854_v9 = vld [vmem:[%s3345_s2 + $0x1e0] sm:$0xff]  ;;  %v1859_v10 = vld [vmem:[%s3345_s2 + $0x1e8] sm:$0xff]  ;;  %v1866_v11 = vld [vmem:[%s3345_s2 + $0x1f0] sm:$0xff] }
   0x5   :  { %174 = vmatpush.msra.mxu2 %v36_v6  ;;  %215 = vmatpush.msra.mxu3 %v37_v7  ;;  %v1871_v12 = vld [vmem:[%s3345_s2 + $0x1f8] sm:$0xff]  ;;  %v1878_v13 = vld [vmem:[%s3345_s2 + $0x1c0] sm:$0xff]  ;;  %v1883_v14 = vld [vmem:[%s3345_s2 + $0x1c8] sm:$0xff] }
   0x6   :  { %1668 = vmatmul.msk.f32.vlgmr.msra.gmra.mxu0 %vm52_vm0, %v26_v8  ;;  %1676 = vmatmul.msk.f32.vlgmr.msra.gmra.mxu1 %vm52_vm0, %v26_v8  ;;  %v1890_v15 = vld [vmem:[%s3345_s2 + $0x1d0] sm:$0xff]  ;;  %v1895_v16 = vld [vmem:[%s3345_s2 + $0x1d8] sm:$0xff]  ;;  %v1902_v17 = vld [vmem:[%s3345_s2 + $0x1a0] sm:$0xff] }
   0x7   :  { %1684 = vmatmul.msk.f32.vlgmr.msra.gmra.mxu2 %vm52_vm0, %v26_v8  ;;  %1692 = vmatmul.msk.f32.vlgmr.msra.gmra.mxu3 %vm52_vm0, %v26_v8  ;;  %v1907_v18 = vld [vmem:[%s3345_s2 + $0x1a8] sm:$0xff]  ;;  %v1914_v19 = vld [vmem:[%s3345_s2 + $0x1b0] sm:$0xff]  ;;  %v1919_v20 = vld [vmem:[%s3345_s2 + $0x1b8] sm:$0xff] }
   0x8   :  { %346 = vmatpush.msrb.mxu0 %v1854_v9  ;;  %366 = vmatpush.msrb.mxu1 %v1859_v10  ;;  %v27_v21 = vld [vmem:[%s3344_s0 + $0x8] sm:$0xff]  ;;  %v1932_v22 = vld [vmem:[%s3345_s2 + $0x180] sm:$0xff]  ;;  %v1945_v24 = vld [vmem:[%s3345_s2 + $0x190] sm:$0xff] }
   0x9   :  { %386 = vmatpush.msrb.mxu2 %v1866_v11  ;;  %406 = vmatpush.msrb.mxu3 %v1871_v12  ;;  %v1937_v23 = vld [vmem:[%s3345_s2 + $0x188] sm:$0xff]  ;;  %v1950_v25 = vld [vmem:[%s3345_s2 + $0x198] sm:$0xff]  ;;  %v1957_v26 = vld [vmem:[%s3345_s2 + $0x160] sm:$0xff] }
   0xa   :  { %347 = vmatpush.msrb.mxu0 %v1878_v13  ;;  %367 = vmatpush.msrb.mxu1 %v1883_v14  ;;  %v1962_v27 = vld [vmem:[%s3345_s2 + $0x168] sm:$0xff]  ;;  %v1969_v28 = vld [vmem:[%s3345_s2 + $0x170] sm:$0xff]  ;;  %v1974_v29 = vld [vmem:[%s3345_s2 + $0x178] sm:$0xff] }
   0xb   :  { %387 = vmatpush.msrb.mxu2 %v1890_v15  ;;  %407 = vmatpush.msrb.mxu3 %v1895_v16  ;;  %v1981_v30 = vld [vmem:[%s3345_s2 + $0x140] sm:$0xff]  ;;  %v1986_v31 = vld [vmem:[%s3345_s2 + $0x148] sm:$0xff]  ;;  %v1993_v32 = vld [vmem:[%s3345_s2 + $0x150] sm:$0xff] }
   0xc   :  { %348 = vmatpush.msrb.mxu0 %v1902_v17  ;;  %368 = vmatpush.msrb.mxu1 %v1907_v18  ;;  %v1998_v33 = vld [vmem:[%s3345_s2 + $0x158] sm:$0xff]  ;;  %v28_v34 = vld [vmem:[%s3344_s0 + $0x10] sm:$0xff]  ;;  %v2011_v35 = vld [vmem:[%s3345_s2 + $0x120] sm:$0xff] }
   0xd   :  { %388 = vmatpush.msrb.mxu2 %v1914_v19  ;;  %408 = vmatpush.msrb.mxu3 %v1919_v20  ;;  %v2016_v36 = vld [vmem:[%s3345_s2 + $0x128] sm:$0xff]  ;;  %v2024_v37 = vld [vmem:[%s3345_s2 + $0x130] sm:$0xff]  ;;  %v2029_v38 = vld [vmem:[%s3345_s2 + $0x138] sm:$0xff] }
   0xe   :  { %1669 = vmatmul.msk.f32.gmra.mxu0 %vm52_vm0, %v27_v21  ;;  %1677 = vmatmul.msk.f32.gmra.mxu1 %vm52_vm0, %v27_v21  ;;  %v2036_v39 = vld [vmem:[%s3345_s2 + $0x100] sm:$0xff]  ;;  %v2041_v40 = vld [vmem:[%s3345_s2 + $0x108] sm:$0xff]  ;;  %v2048_v41 = vld [vmem:[%s3345_s2 + $0x110] sm:$0xff] }
   0xf   :  { %1685 = vmatmul.msk.f32.gmra.mxu2 %vm52_vm0, %v27_v21  ;;  %1693 = vmatmul.msk.f32.gmra.mxu3 %vm52_vm0, %v27_v21  ;;  %v2053_v42 = vld [vmem:[%s3345_s2 + $0x118] sm:$0xff]  ;;  %v2060_v43 = vld [vmem:[%s3345_s2 + $0xe0] sm:$0xff]  ;;  %v2065_v44 = vld [vmem:[%s3345_s2 + $0xe8] sm:$0xff] }
  0x10   :  { %349 = vmatpush.msrb.mxu0 %v1932_v22  ;;  %369 = vmatpush.msrb.mxu1 %v1937_v23  ;;  %v2072_v45 = vld [vmem:[%s3345_s2 + $0xf0] sm:$0xff]  ;;  %v2077_v46 = vld [vmem:[%s3345_s2 + $0xf8] sm:$0xff]  ;;  %v2090_v48 = vld [vmem:[%s3345_s2 + $0xc0] sm:$0xff] }
  0x11   :  { %389 = vmatpush.msrb.mxu2 %v1945_v24  ;;  %409 = vmatpush.msrb.mxu3 %v1950_v25  ;;  %v29_v47 = vld [vmem:[%s3344_s0 + $0x18] sm:$0xff]  ;;  %v2095_v49 = vld [vmem:[%s3345_s2 + $0xc8] sm:$0xff]  ;;  %v2103_v50 = vld [vmem:[%s3345_s2 + $0xd0] sm:$0xff] }
  0x12   :  { %350 = vmatpush.msrb.mxu0 %v1957_v26  ;;  %370 = vmatpush.msrb.mxu1 %v1962_v27  ;;  %v2108_v51 = vld [vmem:[%s3345_s2 + $0xd8] sm:$0xff]  ;;  %v2115_v52 = vld [vmem:[%s3345_s2 + $0xa0] sm:$0xff]  ;;  %v2120_v53 = vld [vmem:[%s3345_s2 + $0xa8] sm:$0xff] }
  0x13   :  { %390 = vmatpush.msrb.mxu2 %v1969_v28  ;;  %410 = vmatpush.msrb.mxu3 %v1974_v29  ;;  %v2127_v54 = vld [vmem:[%s3345_s2 + $0xb0] sm:$0xff]  ;;  %v2132_v55 = vld [vmem:[%s3345_s2 + $0xb8] sm:$0xff]  ;;  %v2139_v56 = vld [vmem:[%s3345_s2 + $0x80] sm:$0xff] }
  0x14   :  { %351 = vmatpush.msrb.mxu0 %v1981_v30  ;;  %371 = vmatpush.msrb.mxu1 %v1986_v31  ;;  %v2144_v57 = vld [vmem:[%s3345_s2 + $0x88] sm:$0xff]  ;;  %v2151_v58 = vld [vmem:[%s3345_s2 + $0x90] sm:$0xff]  ;;  %v2156_v59 = vld [vmem:[%s3345_s2 + $0x98] sm:$0xff] }
  0x15   :  { %391 = vmatpush.msrb.mxu2 %v1993_v32  ;;  %411 = vmatpush.msrb.mxu3 %v1998_v33  ;;  %v30_v60 = vld [vmem:[%s3344_s0 + $0x20] sm:$0xff]  ;;  %v2174_v62 = vld [vmem:[%s3345_s2 + $0x68] sm:$0xff]  ;;  %v2182_v63 = vld [vmem:[%s3345_s2 + $0x70] sm:$0xff] }
  0x16   :  { %1670 = vmatmul.msk.f32.gmra.mxu0 %vm52_vm0, %v28_v34  ;;  %1678 = vmatmul.msk.f32.gmra.mxu1 %vm52_vm0, %v28_v34  ;;  %v2169_v61 = vld [vmem:[%s3345_s2 + $0x60] sm:$0xff]  ;;  %v2187_v0 = vld [vmem:[%s3345_s2 + $0x78] sm:$0xff]  ;;  %v2199_v2 = vld [vmem:[%s3345_s2 + $0x48] sm:$0xff] }
  0x17   :  { %1686 = vmatmul.msk.f32.gmra.mxu2 %vm52_vm0, %v28_v34  ;;  %1694 = vmatmul.msk.f32.gmra.mxu3 %vm52_vm0, %v28_v34  ;;  %v2194_v1 = vld [vmem:[%s3345_s2 + $0x40] sm:$0xff]  ;;  %v2206_v3 = vld [vmem:[%s3345_s2 + $0x50] sm:$0xff]  ;;  %v2211_v4 = vld [vmem:[%s3345_s2 + $0x58] sm:$0xff] }
  0x18   :  { %352 = vmatpush.msrb.mxu0 %v2011_v35  ;;  %372 = vmatpush.msrb.mxu1 %v2016_v36  ;;  %v2218_v5 = vld [vmem:[%s3345_s2 + $0x20] sm:$0xff]  ;;  %v2223_v6 = vld [vmem:[%s3345_s2 + $0x28] sm:$0xff]  ;;  %v2230_v7 = vld [vmem:[%s3345_s2 + $0x30] sm:$0xff] }
  0x19   :  { %392 = vmatpush.msrb.mxu2 %v2024_v37  ;;  %412 = vmatpush.msrb.mxu3 %v2029_v38  ;;  %3398 = vst [vmem:[#allocation5_spill] sm:$0xff] %v2230_v7  ;;  %v2235_v8 = vld [vmem:[%s3345_s2 + $0x38] sm:$0xff]  ;;  %v31_v21 = vld [vmem:[%s3344_s0 + $0x28] sm:$0xff]  ;;  %v2248_v34 = vld [vmem:[%s3345_s2] sm:$0xff] }
  0x1a   :  { %353 = vmatpush.msrb.mxu0 %v2036_v39  ;;  %373 = vmatpush.msrb.mxu1 %v2041_v40  ;;  %3399 = vst [vmem:[#allocation6_spill] sm:$0xff] %v2235_v8 }
  0x1b   :  { %393 = vmatpush.msrb.mxu2 %v2048_v41  ;;  %413 = vmatpush.msrb.mxu3 %v2053_v42 }
  0x1c   :  { %354 = vmatpush.msrb.mxu0 %v2060_v43  ;;  %374 = vmatpush.msrb.mxu1 %v2065_v44 }
  0x1d   :  { %394 = vmatpush.msrb.mxu2 %v2072_v45  ;;  %414 = vmatpush.msrb.mxu3 %v2077_v46 }
  0x1e   :  { %1671 = vmatmul.msk.f32.gmra.mxu0 %vm52_vm0, %v29_v47  ;;  %1679 = vmatmul.msk.f32.gmra.mxu1 %vm52_vm0, %v29_v47 }
  0x1f   :  { %1687 = vmatmul.msk.f32.gmra.mxu2 %vm52_vm0, %v29_v47  ;;  %1695 = vmatmul.msk.f32.gmra.mxu3 %vm52_vm0, %v29_v47  ;;  %v2253_v47 = vld [vmem:[%s3345_s2 + $0x8] sm:$0xff] }
  0x20   :  { %355 = vmatpush.msrb.mxu0 %v2090_v48  ;;  %375 = vmatpush.msrb.mxu1 %v2095_v49 }
  0x21   :  { %395 = vmatpush.msrb.mxu2 %v2103_v50  ;;  %415 = vmatpush.msrb.mxu3 %v2108_v51 }
  0x22   :  { %356 = vmatpush.msrb.mxu0 %v2115_v52  ;;  %376 = vmatpush.msrb.mxu1 %v2120_v53 }
  0x23   :  { %396 = vmatpush.msrb.mxu2 %v2127_v54  ;;  %416 = vmatpush.msrb.mxu3 %v2132_v55 }
  0x24   :  { %357 = vmatpush.msrb.mxu0 %v2139_v56  ;;  %377 = vmatpush.msrb.mxu1 %v2144_v57 }
  0x25   :  { %397 = vmatpush.msrb.mxu2 %v2151_v58  ;;  %417 = vmatpush.msrb.mxu3 %v2156_v59 }
  0x26   :  { %1672 = vmatmul.msk.f32.gmra.mxu0 %vm52_vm0, %v30_v60  ;;  %1680 = vmatmul.msk.f32.gmra.mxu1 %vm52_vm0, %v30_v60 }
  0x27   :  { %1688 = vmatmul.msk.f32.gmra.mxu2 %vm52_vm0, %v30_v60  ;;  %1696 = vmatmul.msk.f32.gmra.mxu3 %vm52_vm0, %v30_v60  ;;  %v2261_v60 = vld [vmem:[%s3345_s2 + $0x10] sm:$0xff] }
  0x28   :  { %358 = vmatpush.msrb.mxu0 %v2169_v61  ;;  %378 = vmatpush.msrb.mxu1 %v2174_v62 }
  0x29   :  { %398 = vmatpush.msrb.mxu2 %v2182_v63  ;;  %418 = vmatpush.msrb.mxu3 %v2187_v0 }
  0x2a   :  { %359 = vmatpush.msrb.mxu0 %v2194_v1  ;;  %379 = vmatpush.msrb.mxu1 %v2199_v2 }
  0x2b   :  { %399 = vmatpush.msrb.mxu2 %v2206_v3  ;;  %419 = vmatpush.msrb.mxu3 %v2211_v4 }
  0x2c   :  { %360 = vmatpush.msrb.mxu0 %v2218_v5  ;;  %380 = vmatpush.msrb.mxu1 %v2223_v6 }
  0x2d   :  { %400 = vmatpush.msrb.mxu2 %v2230_v7  ;;  %420 = vmatpush.msrb.mxu3 %v2235_v8  ;;  %v2266_v7 = vld [vmem:[%s3345_s2 + $0x18] sm:$0xff]  ;;  %v32_v8 = vld [vmem:[%s3344_s0 + $0x30] sm:$0xff] }
  0x2e   :  { %1673 = vmatmul.msk.f32.gmra.mxu0 %vm52_vm0, %v31_v21  ;;  %1681 = vmatmul.msk.f32.gmra.mxu1 %vm52_vm0, %v31_v21 }
  0x2f   :  { %1689 = vmatmul.msk.f32.gmra.mxu2 %vm52_vm0, %v31_v21  ;;  %1697 = vmatmul.msk.f32.gmra.mxu3 %vm52_vm0, %v31_v21  ;;  %v33_v21 = vld [vmem:[%s3344_s0 + $0x38] sm:$0xff] }
  0x30   :  { %361 = vmatpush.msrb.mxu0 %v2248_v34  ;;  %381 = vmatpush.msrb.mxu1 %v2253_v47 }
  0x31   :  { %401 = vmatpush.msrb.mxu2 %v2261_v60  ;;  %421 = vmatpush.msrb.mxu3 %v2266_v7 }
  0x32   :  { %516 = vmatpush.msra.mxu0 %v1854_v9  ;;  %536 = vmatpush.msra.mxu1 %v1859_v10 }
  0x33   :  { %556 = vmatpush.msra.mxu2 %v1866_v11  ;;  %576 = vmatpush.msra.mxu3 %v1871_v12 }
  0x34   :  { %517 = vmatpush.msra.mxu0 %v1878_v13  ;;  %537 = vmatpush.msra.mxu1 %v1883_v14 }
  0x35   :  { %557 = vmatpush.msra.mxu2 %v1890_v15  ;;  %577 = vmatpush.msra.mxu3 %v1895_v16 }
  0x36   :  { %1674 = vmatmul.msk.f32.gmra.mxu0 %vm52_vm0, %v32_v8  ;;  %1682 = vmatmul.msk.f32.gmra.mxu1 %vm52_vm0, %v32_v8 }
  0x37   :  { %1690 = vmatmul.msk.f32.gmra.mxu2 %vm52_vm0, %v32_v8  ;;  %1698 = vmatmul.msk.f32.gmra.mxu3 %vm52_vm0, %v32_v8  ;;  %v1788_v8 = vmov 0.0  }
  0x38   :  { %518 = vmatpush.msra.mxu0 %v1902_v17  ;;  %538 = vmatpush.msra.mxu1 %v1907_v18 }
  0x39   :  { %558 = vmatpush.msra.mxu2 %v1914_v19  ;;  %578 = vmatpush.msra.mxu3 %v1919_v20 }
  0x3a   :  { %519 = vmatpush.msra.mxu0 %v1932_v22  ;;  %539 = vmatpush.msra.mxu1 %v1937_v23 }
  0x3b   :  { %559 = vmatpush.msra.mxu2 %v1945_v24  ;;  %579 = vmatpush.msra.mxu3 %v1950_v25 }
  0x3c   :  { %520 = vmatpush.msra.mxu0 %v1957_v26  ;;  %540 = vmatpush.msra.mxu1 %v1962_v27 }
  0x3d   :  { %560 = vmatpush.msra.mxu2 %v1969_v28  ;;  %580 = vmatpush.msra.mxu3 %v1974_v29 }
  0x3e   :  { %1675 = vmatmul.msk.f32.gmra.mxu0 %vm52_vm0, %v33_v21  ;;  %1683 = vmatmul.msk.f32.gmra.mxu1 %vm52_vm0, %v33_v21 }
  0x3f   :  { %1691 = vmatmul.msk.f32.gmra.mxu2 %vm52_vm0, %v33_v21  ;;  %1699 = vmatmul.msk.f32.gmra.mxu3 %vm52_vm0, %v33_v21  ;;  %v3400_v21 = vld [vmem:[#allocation5_spill] sm:$0xff] }
  0x40   :  { %521 = vmatpush.msra.mxu0 %v1981_v30  ;;  %541 = vmatpush.msra.mxu1 %v1986_v31 }
  0x41   :  { %561 = vmatpush.msra.mxu2 %v1993_v32  ;;  %581 = vmatpush.msra.mxu3 %v1998_v33 }
  0x42   :  { %522 = vmatpush.msra.mxu0 %v2011_v35  ;;  %542 = vmatpush.msra.mxu1 %v2016_v36 }
  0x43   :  { %562 = vmatpush.msra.mxu2 %v2024_v37  ;;  %582 = vmatpush.msra.mxu3 %v2029_v38 }
  0x44   :  { %523 = vmatpush.msra.mxu0 %v2036_v39  ;;  %543 = vmatpush.msra.mxu1 %v2041_v40 }
  0x45   :  { %563 = vmatpush.msra.mxu2 %v2048_v41  ;;  %583 = vmatpush.msra.mxu3 %v2053_v42 }
  0x46   :  { %362 = vmatmul.f32.vlgmr.msrb.gmra.mxu0 %v1788_v8  ;;  %382 = vmatmul.f32.vlgmr.msrb.gmra.mxu1 %v1788_v8 }
  0x47   :  { %402 = vmatmul.f32.vlgmr.msrb.gmra.mxu2 %v1788_v8  ;;  %422 = vmatmul.f32.vlgmr.msrb.gmra.mxu3 %v1788_v8  ;;  %v3401_v8 = vld [vmem:[#allocation6_spill] sm:$0xff] }
  0x48   :  { %524 = vmatpush.msra.mxu0 %v2060_v43  ;;  %544 = vmatpush.msra.mxu1 %v2065_v44 }
  0x49   :  { %564 = vmatpush.msra.mxu2 %v2072_v45  ;;  %584 = vmatpush.msra.mxu3 %v2077_v46 }
  0x4a   :  { %525 = vmatpush.msra.mxu0 %v2090_v48  ;;  %545 = vmatpush.msra.mxu1 %v2095_v49 }
  0x4b   :  { %565 = vmatpush.msra.mxu2 %v2103_v50  ;;  %585 = vmatpush.msra.mxu3 %v2108_v51 }
  0x4c   :  { %526 = vmatpush.msra.mxu0 %v2115_v52  ;;  %546 = vmatpush.msra.mxu1 %v2120_v53 }
  0x4d   :  { %566 = vmatpush.msra.mxu2 %v2127_v54  ;;  %586 = vmatpush.msra.mxu3 %v2132_v55 }
  0x4e   :  { %527 = vmatpush.msra.mxu0 %v2139_v56  ;;  %547 = vmatpush.msra.mxu1 %v2144_v57 }
  0x4f   :  { %567 = vmatpush.msra.mxu2 %v2151_v58  ;;  %587 = vmatpush.msra.mxu3 %v2156_v59 }
  0x50   :  { %528 = vmatpush.msra.mxu0 %v2169_v61  ;;  %548 = vmatpush.msra.mxu1 %v2174_v62 }
  0x51   :  { %568 = vmatpush.msra.mxu2 %v2182_v63  ;;  %588 = vmatpush.msra.mxu3 %v2187_v0 }
  0x52   :  { %529 = vmatpush.msra.mxu0 %v2194_v1  ;;  %549 = vmatpush.msra.mxu1 %v2199_v2 }
  0x53   :  { %569 = vmatpush.msra.mxu2 %v2206_v3  ;;  %589 = vmatpush.msra.mxu3 %v2211_v4 }
  0x54   :  { %530 = vmatpush.msra.mxu0 %v2218_v5  ;;  %550 = vmatpush.msra.mxu1 %v2223_v6 }
  0x55   :  { %570 = vmatpush.msra.mxu2 %v3400_v21  ;;  %590 = vmatpush.msra.mxu3 %v3401_v8 }
  0x56   :  { %531 = vmatpush.msra.mxu0 %v2248_v34  ;;  %551 = vmatpush.msra.mxu1 %v2253_v47 }
  0x57   :  { %571 = vmatpush.msra.mxu2 %v2261_v60  ;;  %591 = vmatpush.msra.mxu3 %v2266_v7 }
  0x58   :  { %687 = vmatpush.msrb.mxu0 %v1854_v9  ;;  %707 = vmatpush.msrb.mxu1 %v1859_v10 }
  0x59   :  { %727 = vmatpush.msrb.mxu2 %v1866_v11  ;;  %747 = vmatpush.msrb.mxu3 %v1871_v12  ;;  %v42_v11 = vld [vmem:[%s3346_s3] sm:$0xf] }
  0x5a   :  { %688 = vmatpush.msrb.mxu0 %v1878_v13  ;;  %708 = vmatpush.msrb.mxu1 %v1883_v14  ;;  %v44_v12 = vperm.slane %v42_v11, 0  ;;  %v45_v13 = vperm.slane %v42_v11, 1 }
  0x5b   :  { %728 = vmatpush.msrb.mxu2 %v1890_v15  ;;  %748 = vmatpush.msrb.mxu3 %v1895_v16 }
  0x5c   :  { %689 = vmatpush.msrb.mxu0 %v1902_v17  ;;  %709 = vmatpush.msrb.mxu1 %v1907_v18 }
  0x5d   :  { %729 = vmatpush.msrb.mxu2 %v1914_v19  ;;  %749 = vmatpush.msrb.mxu3 %v1919_v20  ;;  %v2427_v20 = vperm.slane %v42_v11, 2 }
  0x5e   :  { %690 = vmatpush.msrb.mxu0 %v1932_v22  ;;  %710 = vmatpush.msrb.mxu1 %v1937_v23  ;;  %v2429_v22 = vperm.slane %v42_v11, 3 }
  0x5f   :  { %730 = vmatpush.msrb.mxu2 %v1945_v24  ;;  %750 = vmatpush.msrb.mxu3 %v1950_v25 }
  0x60   :  { %691 = vmatpush.msrb.mxu0 %v1957_v26  ;;  %711 = vmatpush.msrb.mxu1 %v1962_v27 }
  0x61   :  { %731 = vmatpush.msrb.mxu2 %v1969_v28  ;;  %751 = vmatpush.msrb.mxu3 %v1974_v29 }
  0x62   :  { %692 = vmatpush.msrb.mxu0 %v1981_v30  ;;  %712 = vmatpush.msrb.mxu1 %v1986_v31 }
  0x63   :  { %732 = vmatpush.msrb.mxu2 %v1993_v32  ;;  %752 = vmatpush.msrb.mxu3 %v1998_v33 }
  0x64   :  { %693 = vmatpush.msrb.mxu0 %v2011_v35  ;;  %713 = vmatpush.msrb.mxu1 %v2016_v36 }
  0x65   :  { %733 = vmatpush.msrb.mxu2 %v2024_v37  ;;  %753 = vmatpush.msrb.mxu3 %v2029_v38 }
  0x66   :  { %694 = vmatpush.msrb.mxu0 %v2036_v39  ;;  %714 = vmatpush.msrb.mxu1 %v2041_v40 }
  0x67   :  { %734 = vmatpush.msrb.mxu2 %v2048_v41  ;;  %754 = vmatpush.msrb.mxu3 %v2053_v42 }
  0x68   :  { %695 = vmatpush.msrb.mxu0 %v2060_v43  ;;  %715 = vmatpush.msrb.mxu1 %v2065_v44 }
  0x69   :  { %735 = vmatpush.msrb.mxu2 %v2072_v45  ;;  %755 = vmatpush.msrb.mxu3 %v2077_v46 }
  0x6a   :  { %696 = vmatpush.msrb.mxu0 %v2090_v48  ;;  %716 = vmatpush.msrb.mxu1 %v2095_v49 }
  0x6b   :  { %736 = vmatpush.msrb.mxu2 %v2103_v50  ;;  %756 = vmatpush.msrb.mxu3 %v2108_v51 }
  0x6c   :  { %697 = vmatpush.msrb.mxu0 %v2115_v52  ;;  %717 = vmatpush.msrb.mxu1 %v2120_v53 }
  0x6d   :  { %737 = vmatpush.msrb.mxu2 %v2127_v54  ;;  %757 = vmatpush.msrb.mxu3 %v2132_v55 }
  0x6e   :  { %698 = vmatpush.msrb.mxu0 %v2139_v56  ;;  %718 = vmatpush.msrb.mxu1 %v2144_v57 }
  0x6f   :  { %738 = vmatpush.msrb.mxu2 %v2151_v58  ;;  %758 = vmatpush.msrb.mxu3 %v2156_v59 }
  0x70   :  { %699 = vmatpush.msrb.mxu0 %v2169_v61  ;;  %719 = vmatpush.msrb.mxu1 %v2174_v62 }
  0x71   :  { %739 = vmatpush.msrb.mxu2 %v2182_v63  ;;  %759 = vmatpush.msrb.mxu3 %v2187_v0 }
  0x72   :  { %700 = vmatpush.msrb.mxu0 %v2194_v1  ;;  %720 = vmatpush.msrb.mxu1 %v2199_v2 }
  0x73   :  { %740 = vmatpush.msrb.mxu2 %v2206_v3  ;;  %760 = vmatpush.msrb.mxu3 %v2211_v4 }
  0x74   :  { %701 = vmatpush.msrb.mxu0 %v2218_v5  ;;  %721 = vmatpush.msrb.mxu1 %v2223_v6 }
  0x75   :  { %741 = vmatpush.msrb.mxu2 %v3400_v21  ;;  %761 = vmatpush.msrb.mxu3 %v3401_v8 }
  0x76   :  { %702 = vmatpush.msrb.mxu0 %v2248_v34  ;;  %722 = vmatpush.msrb.mxu1 %v2253_v47 }
  0x77   :  { %742 = vmatpush.msrb.mxu2 %v2261_v60  ;;  %762 = vmatpush.msrb.mxu3 %v2266_v7 }
  0x83   :  { %v94_v9 = vpop.f32.mrf.mxu0  ;;  %v135_v10 = vpop.f32.mrf.mxu1 }
  0x84   :  { %v95_v60 = vadd.f32 %v94_v9, %v44_v12  ;;  %v136_v21 = vadd.f32 %v135_v10, %v45_v13 }
  0x8a   :  { %v2419_v14 = vpop.f32.mrf.mxu2  ;;  %v2421_v15 = vpop.f32.mrf.mxu3 }
  0x8b   :  { %v97_v16 = vpop.f32.mrf.mxu0  ;;  %v138_v17 = vpop.f32.mrf.mxu1  ;;  %v218_v9 = vadd.f32 %v2421_v15, %v2429_v22 }
  0x8c   :  { %v2423_v18 = vadd.f32 %v97_v16, %v44_v12  ;;  %v2425_v19 = vadd.f32 %v138_v17, %v45_v13 }
  0x92   :  { %v179_v23 = vpop.f32.mrf.mxu2  ;;  %v220_v24 = vpop.f32.mrf.mxu3 }
  0x93   :  { %v2432_v25 = vadd.f32 %v179_v23, %v2427_v20  ;;  %v2435_v26 = vadd.f32 %v220_v24, %v2429_v22  ;;  %v100_v27 = vpop.f32.mrf.mxu0  ;;  %v141_v28 = vpop.f32.mrf.mxu1 }
  0x94   :  { %v2437_v29 = vadd.f32 %v100_v27, %v44_v12  ;;  %v2439_v30 = vadd.f32 %v141_v28, %v45_v13 }
  0x9a   :  { %v182_v31 = vpop.f32.mrf.mxu2  ;;  %v223_v32 = vpop.f32.mrf.mxu3 }
  0x9b   :  { %v2442_v33 = vadd.f32 %v182_v31, %v2427_v20  ;;  %v2445_v35 = vadd.f32 %v223_v32, %v2429_v22  ;;  %v103_v36 = vpop.f32.mrf.mxu0  ;;  %v144_v37 = vpop.f32.mrf.mxu1 }
  0x9c   :  { %v2447_v38 = vadd.f32 %v103_v36, %v44_v12  ;;  %v2449_v39 = vadd.f32 %v144_v37, %v45_v13  ;;  %v177_v36 = vadd.f32 %v2419_v14, %v2427_v20 }
  0x9e   :  { %3402 = vst [vmem:[#allocation5_spill] sm:$0xff] %v2447_v38  ;;  %v2863_v38 = vld [vmem:[%s3345_s2 + $0x30] sm:$0xff] }
  0x9f   :  { %3403 = vst [vmem:[#allocation6_spill] sm:$0xff] %v2449_v39  ;;  %v2858_v39 = vld [vmem:[%s3345_s2 + $0x28] sm:$0xff] }
  0xa0   :  { %3436 = vst [vmem:[#allocation39_spill] sm:$0xff] %v2858_v39 }
  0xa1   :  { %3437 = vst [vmem:[#allocation40_spill] sm:$0xff] %v2863_v38 }
  0xa2   :  { %v185_v40 = vpop.f32.mrf.mxu2  ;;  %v226_v41 = vpop.f32.mrf.mxu3 }
  0xa3   :  { %v2452_v42 = vadd.f32 %v185_v40, %v2427_v20  ;;  %v2455_v43 = vadd.f32 %v226_v41, %v2429_v22  ;;  %v106_v44 = vpop.f32.mrf.mxu0  ;;  %v147_v45 = vpop.f32.mrf.mxu1 }
  0xa4   :  { %v2457_v46 = vadd.f32 %v106_v44, %v44_v12  ;;  %v2459_v48 = vadd.f32 %v147_v45, %v45_v13 }
  0xa5   :  { %3404 = vst [vmem:[#allocation7_spill] sm:$0xff] %v2452_v42  ;;  %v2853_v42 = vld [vmem:[%s3345_s2 + $0x20] sm:$0xff] }
  0xa6   :  { %3405 = vst [vmem:[#allocation8_spill] sm:$0xff] %v2455_v43  ;;  %v2846_v43 = vld [vmem:[%s3345_s2 + $0x58] sm:$0xff] }
  0xa7   :  { %3406 = vst [vmem:[#allocation9_spill] sm:$0xff] %v2457_v46  ;;  %v2839_v46 = vld [vmem:[%s3345_s2 + $0x50] sm:$0xff] }
  0xa8   :  { %3407 = vst [vmem:[#allocation10_spill] sm:$0xff] %v2459_v48  ;;  %v2834_v48 = vld [vmem:[%s3345_s2 + $0x48] sm:$0xff] }
  0xa9   :  { %3432 = vst [vmem:[#allocation35_spill] sm:$0xff] %v2834_v48 }
  0xaa   :  { %v188_v49 = vpop.f32.mrf.mxu2  ;;  %v229_v50 = vpop.f32.mrf.mxu3  ;;  %3433 = vst [vmem:[#allocation36_spill] sm:$0xff] %v2839_v46 }
  0xab   :  { %v2462_v51 = vadd.f32 %v188_v49, %v2427_v20  ;;  %v2465_v52 = vadd.f32 %v229_v50, %v2429_v22  ;;  %v109_v53 = vpop.f32.mrf.mxu0  ;;  %v150_v54 = vpop.f32.mrf.mxu1  ;;  %3434 = vst [vmem:[#allocation37_spill] sm:$0xff] %v2846_v43 }
  0xac   :  { %v2467_v55 = vadd.f32 %v109_v53, %v44_v12  ;;  %v2469_v56 = vadd.f32 %v150_v54, %v45_v13  ;;  %3435 = vst [vmem:[#allocation38_spill] sm:$0xff] %v2853_v42 }
  0xad   :  { %3408 = vst [vmem:[#allocation11_spill] sm:$0xff] %v2462_v51  ;;  %v2829_v51 = vld [vmem:[%s3345_s2 + $0x40] sm:$0xff] }
  0xae   :  { %3409 = vst [vmem:[#allocation12_spill] sm:$0xff] %v2465_v52  ;;  %v2822_v52 = vld [vmem:[%s3345_s2 + $0x78] sm:$0xff] }
  0xaf   :  { %3410 = vst [vmem:[#allocation13_spill] sm:$0xff] %v2467_v55  ;;  %v2815_v55 = vld [vmem:[%s3345_s2 + $0x70] sm:$0xff] }
  0xb0   :  { %3411 = vst [vmem:[#allocation14_spill] sm:$0xff] %v2469_v56  ;;  %v2810_v56 = vld [vmem:[%s3345_s2 + $0x68] sm:$0xff] }
  0xb1   :  { %3428 = vst [vmem:[#allocation31_spill] sm:$0xff] %v2810_v56 }
  0xb2   :  { %v191_v57 = vpop.f32.mrf.mxu2  ;;  %v232_v58 = vpop.f32.mrf.mxu3  ;;  %3429 = vst [vmem:[#allocation32_spill] sm:$0xff] %v2815_v55 }
  0xb3   :  { %v2472_v59 = vadd.f32 %v191_v57, %v2427_v20  ;;  %v2475_v61 = vadd.f32 %v232_v58, %v2429_v22  ;;  %v112_v62 = vpop.f32.mrf.mxu0  ;;  %v153_v63 = vpop.f32.mrf.mxu1  ;;  %3430 = vst [vmem:[#allocation33_spill] sm:$0xff] %v2822_v52 }
  0xb4   :  { %v2477_v0 = vadd.f32 %v112_v62, %v44_v12  ;;  %v2479_v1 = vadd.f32 %v153_v63, %v45_v13  ;;  %3431 = vst [vmem:[#allocation34_spill] sm:$0xff] %v2829_v51 }
  0xb5   :  { %3412 = vst [vmem:[#allocation15_spill] sm:$0xff] %v2472_v59  ;;  %v2805_v59 = vld [vmem:[%s3345_s2 + $0x60] sm:$0xff] }
  0xb6   :  { %3413 = vst [vmem:[#allocation16_spill] sm:$0xff] %v2475_v61  ;;  %v2798_v61 = vld [vmem:[%s3345_s2 + $0x98] sm:$0xff] }
  0xb7   :  { %3414 = vst [vmem:[#allocation17_spill] sm:$0xff] %v2477_v0  ;;  %v2791_v0 = vld [vmem:[%s3345_s2 + $0x90] sm:$0xff] }
  0xb8   :  { %3415 = vst [vmem:[#allocation18_spill] sm:$0xff] %v2479_v1  ;;  %v2786_v1 = vld [vmem:[%s3345_s2 + $0x88] sm:$0xff] }
  0xb9   :  { %3424 = vst [vmem:[#allocation27_spill] sm:$0xff] %v2786_v1 }
  0xba   :  { %v194_v2 = vpop.f32.mrf.mxu2  ;;  %v235_v3 = vpop.f32.mrf.mxu3  ;;  %3425 = vst [vmem:[#allocation28_spill] sm:$0xff] %v2791_v0 }
  0xbb   :  { %v2482_v4 = vadd.f32 %v194_v2, %v2427_v20  ;;  %v2485_v5 = vadd.f32 %v235_v3, %v2429_v22  ;;  %v115_v6 = vpop.f32.mrf.mxu0  ;;  %v156_v7 = vpop.f32.mrf.mxu1  ;;  %v2507_v2 = vld [vmem:[%s3345_s2 + $0x1e0] sm:$0xff]  ;;  %v2512_v3 = vld [vmem:[%s3345_s2 + $0x1e8] sm:$0xff]  ;;  %3426 = vst [vmem:[#allocation29_spill] sm:$0xff] %v2798_v61 }
  0xbc   :  { %v2487_v34 = vadd.f32 %v115_v6, %v44_v12  ;;  %v2489_v47 = vadd.f32 %v156_v7, %v45_v13  ;;  %3422 = vst [vmem:[#allocation25_spill] sm:$0xff] %v2507_v2  ;;  %v2517_v6 = vld [vmem:[%s3345_s2 + $0x1f0] sm:$0xff] }
  0xbd   :  { %3416 = vst [vmem:[#allocation19_spill] sm:$0xff] %v2482_v4  ;;  %v2781_v4 = vld [vmem:[%s3345_s2 + $0x80] sm:$0xff] }
  0xbe   :  { %3417 = vst [vmem:[#allocation20_spill] sm:$0xff] %v2485_v5  ;;  %v2774_v5 = vld [vmem:[%s3345_s2 + $0xb8] sm:$0xff] }
  0xbf   :  { %3418 = vst [vmem:[#allocation21_spill] sm:$0xff] %v2487_v34  ;;  %v2767_v34 = vld [vmem:[%s3345_s2 + $0xb0] sm:$0xff] }
  0xc0   :  { %3419 = vst [vmem:[#allocation22_spill] sm:$0xff] %v2489_v47  ;;  %v2762_v47 = vld [vmem:[%s3345_s2 + $0xa8] sm:$0xff] }
  0xc1   :  { %3423 = vst [vmem:[#allocation26_spill] sm:$0xff] %v2512_v3 }
  0xc2   :  { %v197_v8 = vpop.f32.mrf.mxu2  ;;  %v238_v11 = vpop.f32.mrf.mxu3  ;;  %3427 = vst [vmem:[#allocation30_spill] sm:$0xff] %v2805_v59 }
  0xc3   :  { %v2492_v16 = vadd.f32 %v197_v8, %v2427_v20  ;;  %v2495_v17 = vadd.f32 %v238_v11, %v2429_v22  ;;  %v363_v23 = vpop.f32.mrf.mxu0  ;;  %v383_v24 = vpop.f32.mrf.mxu1 }
  0xc4   :  { %v364_v27 = vadd.f32 %v363_v23, %v95_v60  ;;  %v384_v28 = vadd.f32 %v383_v24, %v136_v21  ;;  %v2524_v21 = vld [vmem:[%s3345_s2 + $0x1f8] sm:$0xff] }
  0xc5   :  { %3420 = vst [vmem:[#allocation23_spill] sm:$0xff] %v2492_v16  ;;  %v2757_v16 = vld [vmem:[%s3345_s2 + $0xa0] sm:$0xff] }
  0xc6   :  { %3421 = vst [vmem:[#allocation24_spill] sm:$0xff] %v2495_v17  ;;  %v426_v31 = vmul.f32 0.5, %v364_v27  ;;  %v430_v32 = vmul.f32 0.5, %v384_v28  ;;  %v2750_v17 = vld [vmem:[%s3345_s2 + $0xd8] sm:$0xff] }
  0xc8   :  { %1708 = vtanh.f32 %v426_v31 }
  0xc9   :  { %1710 = vtanh.f32 %v430_v32 }
  0xca   :  { %v403_v10 = vpop.f32.mrf.mxu2  ;;  %v423_v12 = vpop.f32.mrf.mxu3 }
  0xcb   :  { %v404_v13 = vadd.f32 %v403_v10, %v177_v36  ;;  %v424_v37 = vadd.f32 %v423_v12, %v218_v9 }
  0xcd   :  { %1712 = vtanh.f32 %v404_v13  ;;  %v435_v40 = vmul.f32 0.5, %v424_v37 }
  0xce   :  { %v1709_v41 = vpop.eup %1708 }
  0xcf   :  { %v1711_v44 = vpop.eup %1710  ;;  %v428_v45 = vmul.f32 0.5, %v1709_v41  ;;  %1714 = vtanh.f32 %v435_v40 }
  0xd0   :  { %v432_v49 = vmul.f32 0.5, %v1711_v44 }
  0xd1   :  { %v429_v50 = vadd.f32 0.5, %v428_v45 }
  0xd2   :  { %v433_v53 = vadd.f32 0.5, %v432_v49 }
  0xd3   :  { %v1713_v54 = vpop.eup %1712 }
  0xd4   :  { %v439_v57 = vmul.f32 0.0, %v433_v53  ;;  %v440_v14 = vmul.f32 %v1713_v54, %v429_v50  ;;  %v2541_v53 = vld [vmem:[%s3345_s2 + $0x1c0] sm:$0xff]  ;;  %v2546_v54 = vld [vmem:[%s3345_s2 + $0x1c8] sm:$0xff] }
  0xd5   :  { %v1715_v20 = vpop.eup %1714 }
  0xd6   :  { %v441_v58 = vadd.f32 %v440_v14, %v439_v57  ;;  %v437_v15 = vmul.f32 0.5, %v1715_v20  ;;  %v2551_v57 = vld [vmem:[%s3345_s2 + $0x1d0] sm:$0xff]  ;;  %v2558_v14 = vld [vmem:[%s3345_s2 + $0x1d8] sm:$0xff]  ;;  %v2565_v20 = vld [vmem:[%s3345_s2 + $0x1a0] sm:$0xff] }
  0xd8   :  { %1716 = vtanh.f32 %v441_v58  ;;  %v438_v22 = vadd.f32 0.5, %v437_v15  ;;  %v2575_v15 = vld [vmem:[%s3345_s2 + $0x1b0] sm:$0xff] }
  0xde   :  { %v1717_v62 = vpop.eup %1716 }
  0xdf   :  { %v443_v63 = vmul.f32 %v1717_v62, %v438_v22  ;;  %v2582_v22 = vld [vmem:[%s3345_s2 + $0x1b8] sm:$0xff]  ;;  %v2589_v62 = vld [vmem:[%s3345_s2 + $0x180] sm:$0xff] }
  0xe1   :  { %444 = vst [vmem:[%s3347_s4] sm:$0xff] %v443_v63  ;;  %532 = vmatmul.f32.vlgmr.msra.gmra.mxu0 %v443_v63  ;;  %552 = vmatmul.f32.vlgmr.msra.gmra.mxu1 %v443_v63 }
  0xe2   :  { %572 = vmatmul.f32.vlgmr.msra.gmra.mxu2 %v443_v63  ;;  %592 = vmatmul.f32.vlgmr.msra.gmra.mxu3 %v443_v63  ;;  %v2594_v63 = vld [vmem:[%s3345_s2 + $0x188] sm:$0xff] }
  0xe3   :  { %858 = vmatpush.msra.mxu0 %v2507_v2  ;;  %878 = vmatpush.msra.mxu1 %v2512_v3 }
  0xe4   :  { %898 = vmatpush.msra.mxu2 %v2517_v6  ;;  %918 = vmatpush.msra.mxu3 %v2524_v21 }
  0xe5   :  { %859 = vmatpush.msra.mxu0 %v2541_v53  ;;  %879 = vmatpush.msra.mxu1 %v2546_v54 }
  0xe6   :  { %899 = vmatpush.msra.mxu2 %v2551_v57  ;;  %919 = vmatpush.msra.mxu3 %v2558_v14 }
  0xe7   :  { %860 = vmatpush.msra.mxu0 %v2565_v20 }
  0xe8   :  { %900 = vmatpush.msra.mxu2 %v2575_v15  ;;  %920 = vmatpush.msra.mxu3 %v2582_v22 }
  0xe9   :  { %861 = vmatpush.msra.mxu0 %v2589_v62 }
 0x15e   :  { %v533_v7 = vpop.f32.mrf.mxu0  ;;  %v553_v60 = vpop.f32.mrf.mxu1 }
 0x15f   :  { %v534_v8 = vadd.f32 %v533_v7, %v2423_v18  ;;  %v554_v11 = vadd.f32 %v553_v60, %v2425_v19  ;;  %v2599_v7 = vld [vmem:[%s3345_s2 + $0x190] sm:$0xff]  ;;  %v2606_v60 = vld [vmem:[%s3345_s2 + $0x198] sm:$0xff] }
 0x160   :  { %901 = vmatpush.msra.mxu2 %v2599_v7  ;;  %921 = vmatpush.msra.mxu3 %v2606_v60 }
 0x161   :  { %v596_v23 = vmul.f32 0.5, %v534_v8  ;;  %v600_v24 = vmul.f32 0.5, %v554_v11  ;;  %v2613_v8 = vld [vmem:[%s3345_s2 + $0x160] sm:$0xff]  ;;  %v2618_v11 = vld [vmem:[%s3345_s2 + $0x168] sm:$0xff] }
 0x162   :  { %862 = vmatpush.msra.mxu0 %v2613_v8 }
 0x163   :  { %1718 = vtanh.f32 %v596_v23  ;;  %v2623_v23 = vld [vmem:[%s3345_s2 + $0x170] sm:$0xff] }
 0x164   :  { %1720 = vtanh.f32 %v600_v24  ;;  %v2630_v24 = vld [vmem:[%s3345_s2 + $0x178] sm:$0xff]  ;;  %902 = vmatpush.msra.mxu2 %v2623_v23 }
 0x165   :  { %v573_v27 = vpop.f32.mrf.mxu2  ;;  %v593_v28 = vpop.f32.mrf.mxu3  ;;  %922 = vmatpush.msra.mxu3 %v2630_v24 }
 0x166   :  { %v574_v31 = vadd.f32 %v573_v27, %v2432_v25  ;;  %v594_v32 = vadd.f32 %v593_v28, %v2435_v26  ;;  %v2637_v27 = vld [vmem:[%s3345_s2 + $0x140] sm:$0xff]  ;;  %v2642_v28 = vld [vmem:[%s3345_s2 + $0x148] sm:$0xff] }
 0x167   :  { %863 = vmatpush.msra.mxu0 %v2637_v27 }
 0x168   :  { %1722 = vtanh.f32 %v574_v31  ;;  %v605_v36 = vmul.f32 0.5, %v594_v32  ;;  %v2647_v31 = vld [vmem:[%s3345_s2 + $0x150] sm:$0xff]  ;;  %v2654_v32 = vld [vmem:[%s3345_s2 + $0x158] sm:$0xff] }
 0x169   :  { %v1719_v9 = vpop.eup %1718  ;;  %903 = vmatpush.msra.mxu2 %v2647_v31  ;;  %923 = vmatpush.msra.mxu3 %v2654_v32 }
 0x16a   :  { %v1721_v18 = vpop.eup %1720  ;;  %v598_v10 = vmul.f32 0.5, %v1719_v9  ;;  %1724 = vtanh.f32 %v605_v36  ;;  %v2661_v36 = vld [vmem:[%s3345_s2 + $0x120] sm:$0xff]  ;;  %v2666_v9 = vld [vmem:[%s3345_s2 + $0x128] sm:$0xff] }
 0x16b   :  { %v602_v19 = vmul.f32 0.5, %v1721_v18  ;;  %v2671_v18 = vld [vmem:[%s3345_s2 + $0x130] sm:$0xff]  ;;  %864 = vmatpush.msra.mxu0 %v2661_v36 }
 0x16c   :  { %v599_v12 = vadd.f32 0.5, %v598_v10  ;;  %v2678_v10 = vld [vmem:[%s3345_s2 + $0x138] sm:$0xff]  ;;  %904 = vmatpush.msra.mxu2 %v2671_v18 }
 0x16d   :  { %v603_v13 = vadd.f32 0.5, %v602_v19  ;;  %924 = vmatpush.msra.mxu3 %v2678_v10  ;;  %v2685_v19 = vld [vmem:[%s3345_s2 + $0x100] sm:$0xff] }
 0x16e   :  { %v1723_v37 = vpop.eup %1722  ;;  %865 = vmatpush.msra.mxu0 %v2685_v19 }
 0x16f   :  { %v609_v40 = vmul.f32 %v603_v13, %v441_v58  ;;  %v610_v41 = vmul.f32 %v1723_v37, %v599_v12  ;;  %v2570_v58 = vld [vmem:[%s3345_s2 + $0x1a8] sm:$0xff]  ;;  %v2695_v13 = vld [vmem:[%s3345_s2 + $0x110] sm:$0xff]  ;;  %v2702_v37 = vld [vmem:[%s3345_s2 + $0x118] sm:$0xff] }
 0x170   :  { %v1725_v44 = vpop.eup %1724  ;;  %880 = vmatpush.msra.mxu1 %v2570_v58  ;;  %v2690_v12 = vld [vmem:[%s3345_s2 + $0x108] sm:$0xff]  ;;  %905 = vmatpush.msra.mxu2 %v2695_v13 }
 0x171   :  { %v2532_v45 = vadd.f32 %v610_v41, %v609_v40  ;;  %v607_v25 = vmul.f32 0.5, %v1725_v44  ;;  %925 = vmatpush.msra.mxu3 %v2702_v37  ;;  %v2709_v40 = vld [vmem:[%s3345_s2 + $0xe0] sm:$0xff]  ;;  %v2714_v41 = vld [vmem:[%s3345_s2 + $0xe8] sm:$0xff]  ;;  %v2719_v44 = vld [vmem:[%s3345_s2 + $0xf0] sm:$0xff] }
 0x172   :  { %881 = vmatpush.msra.mxu1 %v2594_v63  ;;  %866 = vmatpush.msra.mxu0 %v2709_v40 }
 0x173   :  { %1726 = vtanh.f32 %v2532_v45  ;;  %v608_v49 = vadd.f32 0.5, %v607_v25  ;;  %v2726_v25 = vld [vmem:[%s3345_s2 + $0xf8] sm:$0xff]  ;;  %906 = vmatpush.msra.mxu2 %v2719_v44 }
 0x174   :  { %882 = vmatpush.msra.mxu1 %v2618_v11  ;;  %926 = vmatpush.msra.mxu3 %v2726_v25 }
 0x176   :  { %883 = vmatpush.msra.mxu1 %v2642_v28  ;;  %927 = vmatpush.msra.mxu3 %v2750_v17 }
 0x178   :  { %884 = vmatpush.msra.mxu1 %v2666_v9  ;;  %928 = vmatpush.msra.mxu3 %v2774_v5 }
 0x179   :  { %v1727_v26 = vpop.eup %1726 }
 0x17a   :  { %v613_v50 = vmul.f32 %v1727_v26, %v608_v49  ;;  %885 = vmatpush.msra.mxu1 %v2690_v12  ;;  %v2733_v49 = vld [vmem:[%s3345_s2 + $0xc0] sm:$0xff]  ;;  %v2738_v26 = vld [vmem:[%s3345_s2 + $0xc8] sm:$0xff]  ;;  %929 = vmatpush.msra.mxu3 %v2798_v61 }
 0x17b   :  { %867 = vmatpush.msra.mxu0 %v2733_v49 }
 0x17c   :  { %1700 = vst [vmem:[%s3347_s4 + $0x8] sm:$0xff] %v613_v50  ;;  %703 = vmatmul.f32.vlgmr.msrb.gmra.mxu0 %v613_v50  ;;  %723 = vmatmul.f32.vlgmr.msrb.gmra.mxu1 %v613_v50 }
 0x17d   :  { %743 = vmatmul.f32.vlgmr.msrb.gmra.mxu2 %v613_v50  ;;  %763 = vmatmul.f32.vlgmr.msrb.gmra.mxu3 %v613_v50  ;;  %v2743_v50 = vld [vmem:[%s3345_s2 + $0xd0] sm:$0xff] }
 0x17e   :  { %886 = vmatpush.msra.mxu1 %v2714_v41  ;;  %907 = vmatpush.msra.mxu2 %v2743_v50 }
 0x17f   :  { %868 = vmatpush.msra.mxu0 %v2757_v16  ;;  %930 = vmatpush.msra.mxu3 %v2822_v52 }
 0x180   :  { %887 = vmatpush.msra.mxu1 %v2738_v26  ;;  %908 = vmatpush.msra.mxu2 %v2767_v34 }
 0x181   :  { %869 = vmatpush.msra.mxu0 %v2781_v4  ;;  %931 = vmatpush.msra.mxu3 %v2846_v43  ;;  %v2870_v43 = vld [vmem:[%s3345_s2 + $0x38] sm:$0xff] }
 0x182   :  { %888 = vmatpush.msra.mxu1 %v2762_v47  ;;  %909 = vmatpush.msra.mxu2 %v2791_v0  ;;  %3438 = vst [vmem:[#allocation41_spill] sm:$0xff] %v2870_v43 }
 0x183   :  { %870 = vmatpush.msra.mxu0 %v2805_v59  ;;  %932 = vmatpush.msra.mxu3 %v2870_v43  ;;  %v2894_v43 = vld [vmem:[%s3345_s2 + $0x18] sm:$0xff] }
 0x184   :  { %889 = vmatpush.msra.mxu1 %v2786_v1  ;;  %910 = vmatpush.msra.mxu2 %v2815_v55  ;;  %3442 = vst [vmem:[#allocation45_spill] sm:$0xff] %v2894_v43 }
 0x185   :  { %871 = vmatpush.msra.mxu0 %v2829_v51  ;;  %933 = vmatpush.msra.mxu3 %v2894_v43 }
 0x186   :  { %890 = vmatpush.msra.mxu1 %v2810_v56  ;;  %911 = vmatpush.msra.mxu2 %v2839_v46  ;;  %v2877_v46 = vld [vmem:[%s3345_s2] sm:$0xff] }
 0x187   :  { %872 = vmatpush.msra.mxu0 %v2853_v42  ;;  %3439 = vst [vmem:[#allocation42_spill] sm:$0xff] %v2877_v46  ;;  %v2882_v42 = vld [vmem:[%s3345_s2 + $0x8] sm:$0xff]  ;;  %1089 = vmatpush.msrb.mxu3 %v2524_v21 }
 0x188   :  { %891 = vmatpush.msra.mxu1 %v2834_v48  ;;  %912 = vmatpush.msra.mxu2 %v2863_v38  ;;  %3440 = vst [vmem:[#allocation43_spill] sm:$0xff] %v2882_v42 }
 0x189   :  { %873 = vmatpush.msra.mxu0 %v2877_v46  ;;  %1090 = vmatpush.msrb.mxu3 %v2558_v14 }
 0x18a   :  { %892 = vmatpush.msra.mxu1 %v2858_v39  ;;  %v2887_v39 = vld [vmem:[%s3345_s2 + $0x10] sm:$0xff] }
 0x18b   :  { %3441 = vst [vmem:[#allocation44_spill] sm:$0xff] %v2887_v39  ;;  %913 = vmatpush.msra.mxu2 %v2887_v39  ;;  %1029 = vmatpush.msrb.mxu0 %v2507_v2 }
 0x18c   :  { %893 = vmatpush.msra.mxu1 %v2882_v42  ;;  %1091 = vmatpush.msrb.mxu3 %v2582_v22 }
 0x18d   :  { %1069 = vmatpush.msrb.mxu2 %v2517_v6  ;;  %1030 = vmatpush.msrb.mxu0 %v2541_v53 }
 0x18e   :  { %1049 = vmatpush.msrb.mxu1 %v2512_v3  ;;  %1092 = vmatpush.msrb.mxu3 %v2606_v60 }
 0x18f   :  { %1070 = vmatpush.msrb.mxu2 %v2551_v57  ;;  %1031 = vmatpush.msrb.mxu0 %v2565_v20 }
 0x190   :  { %1050 = vmatpush.msrb.mxu1 %v2546_v54  ;;  %1093 = vmatpush.msrb.mxu3 %v2630_v24 }
 0x191   :  { %1071 = vmatpush.msrb.mxu2 %v2575_v15  ;;  %1032 = vmatpush.msrb.mxu0 %v2589_v62 }
 0x192   :  { %1051 = vmatpush.msrb.mxu1 %v2570_v58  ;;  %1094 = vmatpush.msrb.mxu3 %v2654_v32 }
 0x193   :  { %1072 = vmatpush.msrb.mxu2 %v2599_v7  ;;  %1033 = vmatpush.msrb.mxu0 %v2613_v8 }
 0x194   :  { %1052 = vmatpush.msrb.mxu1 %v2594_v63  ;;  %1095 = vmatpush.msrb.mxu3 %v2678_v10 }
 0x195   :  { %1073 = vmatpush.msrb.mxu2 %v2623_v23  ;;  %1034 = vmatpush.msrb.mxu0 %v2637_v27 }
 0x196   :  { %1053 = vmatpush.msrb.mxu1 %v2618_v11  ;;  %1096 = vmatpush.msrb.mxu3 %v2702_v37 }
 0x197   :  { %1074 = vmatpush.msrb.mxu2 %v2647_v31  ;;  %1035 = vmatpush.msrb.mxu0 %v2661_v36 }
 0x198   :  { %1054 = vmatpush.msrb.mxu1 %v2642_v28  ;;  %1097 = vmatpush.msrb.mxu3 %v2726_v25 }
 0x199   :  { %1075 = vmatpush.msrb.mxu2 %v2671_v18  ;;  %1036 = vmatpush.msrb.mxu0 %v2685_v19 }
 0x19a   :  { %1055 = vmatpush.msrb.mxu1 %v2666_v9  ;;  %1098 = vmatpush.msrb.mxu3 %v2750_v17 }
 0x19b   :  { %1076 = vmatpush.msrb.mxu2 %v2695_v13  ;;  %1037 = vmatpush.msrb.mxu0 %v2709_v40 }
 0x19c   :  { %1056 = vmatpush.msrb.mxu1 %v2690_v12  ;;  %1099 = vmatpush.msrb.mxu3 %v2774_v5 }
 0x19d   :  { %1077 = vmatpush.msrb.mxu2 %v2719_v44  ;;  %1038 = vmatpush.msrb.mxu0 %v2733_v49 }
 0x19e   :  { %1057 = vmatpush.msrb.mxu1 %v2714_v41  ;;  %1100 = vmatpush.msrb.mxu3 %v2798_v61 }
 0x19f   :  { %1078 = vmatpush.msrb.mxu2 %v2743_v50  ;;  %1039 = vmatpush.msrb.mxu0 %v2757_v16 }
 0x1a0   :  { %1058 = vmatpush.msrb.mxu1 %v2738_v26  ;;  %1101 = vmatpush.msrb.mxu3 %v2822_v52  ;;  %v3451_v52 = vld [vmem:[#allocation42_spill] sm:$0xff] }
 0x1a1   :  { %1079 = vmatpush.msrb.mxu2 %v2767_v34  ;;  %1040 = vmatpush.msrb.mxu0 %v2781_v4 }
 0x1a2   :  { %1059 = vmatpush.msrb.mxu1 %v2762_v47 }
 0x1a3   :  { %1080 = vmatpush.msrb.mxu2 %v2791_v0  ;;  %1041 = vmatpush.msrb.mxu0 %v2805_v59 }
 0x1a4   :  { %1060 = vmatpush.msrb.mxu1 %v2786_v1 }
 0x1a5   :  { %1081 = vmatpush.msrb.mxu2 %v2815_v55  ;;  %1042 = vmatpush.msrb.mxu0 %v2829_v51  ;;  %v3452_v51 = vld [vmem:[#allocation43_spill] sm:$0xff] }
 0x1a6   :  { %1061 = vmatpush.msrb.mxu1 %v2810_v56 }
 0x1f9   :  { %v704_v38 = vpop.f32.mrf.mxu0  ;;  %v724_v48 = vpop.f32.mrf.mxu1 }
 0x1fa   :  { %v705_v42 = vadd.f32 %v704_v38, %v2437_v29  ;;  %v725_v46 = vadd.f32 %v724_v48, %v2439_v30 }
 0x1fc   :  { %v767_v2 = vmul.f32 0.5, %v705_v42  ;;  %v771_v3 = vmul.f32 0.5, %v725_v46 }
 0x1fe   :  { %1728 = vtanh.f32 %v767_v2 }
 0x1ff   :  { %1730 = vtanh.f32 %v771_v3 }
 0x200   :  { %v744_v29 = vpop.f32.mrf.mxu2  ;;  %v764_v30 = vpop.f32.mrf.mxu3 }
 0x201   :  { %v745_v38 = vadd.f32 %v744_v29, %v2442_v33  ;;  %v765_v42 = vadd.f32 %v764_v30, %v2445_v35 }
 0x203   :  { %1732 = vtanh.f32 %v745_v38  ;;  %v776_v46 = vmul.f32 0.5, %v765_v42 }
 0x204   :  { %v1729_v48 = vpop.eup %1728 }
 0x205   :  { %v1731_v33 = vpop.eup %1730  ;;  %v769_v35 = vmul.f32 0.5, %v1729_v48  ;;  %1734 = vtanh.f32 %v776_v46 }
 0x206   :  { %v773_v2 = vmul.f32 0.5, %v1731_v33  ;;  %v3444_v33 = vld [vmem:[#allocation35_spill] sm:$0xff] }
 0x207   :  { %v770_v3 = vadd.f32 0.5, %v769_v35  ;;  %1062 = vmatpush.msrb.mxu1 %v3444_v33 }
 0x208   :  { %v774_v29 = vadd.f32 0.5, %v773_v2  ;;  %v3445_v2 = vld [vmem:[#allocation36_spill] sm:$0xff] }
 0x209   :  { %v1733_v30 = vpop.eup %1732  ;;  %1082 = vmatpush.msrb.mxu2 %v3445_v2 }
 0x20a   :  { %v780_v38 = vmul.f32 %v774_v29, %v2532_v45  ;;  %v781_v42 = vmul.f32 %v1733_v30, %v770_v3  ;;  %v3446_v3 = vld [vmem:[#allocation37_spill] sm:$0xff]  ;;  %v3447_v30 = vld [vmem:[#allocation38_spill] sm:$0xff] }
 0x20b   :  { %v1735_v46 = vpop.eup %1734  ;;  %1102 = vmatpush.msrb.mxu3 %v3446_v3  ;;  %1043 = vmatpush.msrb.mxu0 %v3447_v30 }
 0x20c   :  { %v2943_v48 = vadd.f32 %v781_v42, %v780_v38  ;;  %v778_v45 = vmul.f32 0.5, %v1735_v46  ;;  %v3448_v38 = vld [vmem:[#allocation39_spill] sm:$0xff]  ;;  %v3449_v46 = vld [vmem:[#allocation40_spill] sm:$0xff] }
 0x20d   :  { %1063 = vmatpush.msrb.mxu1 %v3448_v38  ;;  %1083 = vmatpush.msrb.mxu2 %v3449_v46 }
 0x20e   :  { %3443 = vst [vmem:[#allocation46_spill] sm:$0xff] %v2943_v48  ;;  %1736 = vtanh.f32 %v2943_v48  ;;  %v779_v35 = vadd.f32 0.5, %v778_v45  ;;  %v3450_v48 = vld [vmem:[#allocation41_spill] sm:$0xff]  ;;  %1044 = vmatpush.msrb.mxu0 %v3451_v52 }
 0x20f   :  { %1103 = vmatpush.msrb.mxu3 %v3450_v48  ;;  %1064 = vmatpush.msrb.mxu1 %v3452_v51  ;;  %v3453_v45 = vld [vmem:[#allocation25_spill] sm:$0xff] }
 0x210   :  { %1084 = vmatpush.msrb.mxu2 %v2887_v39 }
 0x211   :  { %1104 = vmatpush.msrb.mxu3 %v2894_v43 }
 0x214   :  { %v1737_v29 = vpop.eup %1736 }
 0x215   :  { %v784_v42 = vmul.f32 %v1737_v29, %v779_v35  ;;  %v3454_v35 = vld [vmem:[#allocation26_spill] sm:$0xff]  ;;  %v3455_v29 = vld [vmem:[#allocation33_spill] sm:$0xff] }
 0x217   :  { %1701 = vst [vmem:[%s3347_s4 + $0x10] sm:$0xff] %v784_v42  ;;  %874 = vmatmul.f32.vlgmr.msra.gmra.mxu0 %v784_v42  ;;  %894 = vmatmul.f32.vlgmr.msra.gmra.mxu1 %v784_v42 }
 0x218   :  { %914 = vmatmul.f32.vlgmr.msra.gmra.mxu2 %v784_v42  ;;  %934 = vmatmul.f32.vlgmr.msra.gmra.mxu3 %v784_v42  ;;  %v3456_v42 = vld [vmem:[#allocation34_spill] sm:$0xff] }
 0x219   :  { %1200 = vmatpush.msra.mxu0 %v3453_v45  ;;  %1220 = vmatpush.msra.mxu1 %v3454_v35 }
 0x21a   :  { %1240 = vmatpush.msra.mxu2 %v2517_v6  ;;  %1260 = vmatpush.msra.mxu3 %v2524_v21 }
 0x21b   :  { %1201 = vmatpush.msra.mxu0 %v2541_v53  ;;  %1221 = vmatpush.msra.mxu1 %v2546_v54 }
 0x21c   :  { %1241 = vmatpush.msra.mxu2 %v2551_v57  ;;  %1261 = vmatpush.msra.mxu3 %v2558_v14 }
 0x21d   :  { %1202 = vmatpush.msra.mxu0 %v2565_v20  ;;  %1222 = vmatpush.msra.mxu1 %v2570_v58 }
 0x21e   :  { %1242 = vmatpush.msra.mxu2 %v2575_v15  ;;  %1262 = vmatpush.msra.mxu3 %v2582_v22 }
 0x21f   :  { %1203 = vmatpush.msra.mxu0 %v2589_v62  ;;  %1223 = vmatpush.msra.mxu1 %v2594_v63 }
 0x220   :  { %1243 = vmatpush.msra.mxu2 %v2599_v7  ;;  %1263 = vmatpush.msra.mxu3 %v2606_v60 }
 0x221   :  { %1204 = vmatpush.msra.mxu0 %v2613_v8  ;;  %1224 = vmatpush.msra.mxu1 %v2618_v11 }
 0x222   :  { %1244 = vmatpush.msra.mxu2 %v2623_v23  ;;  %1264 = vmatpush.msra.mxu3 %v2630_v24 }
 0x223   :  { %1205 = vmatpush.msra.mxu0 %v2637_v27  ;;  %1225 = vmatpush.msra.mxu1 %v2642_v28 }
 0x224   :  { %1245 = vmatpush.msra.mxu2 %v2647_v31  ;;  %1265 = vmatpush.msra.mxu3 %v2654_v32 }
 0x225   :  { %1206 = vmatpush.msra.mxu0 %v2661_v36  ;;  %1226 = vmatpush.msra.mxu1 %v2666_v9 }
 0x226   :  { %1246 = vmatpush.msra.mxu2 %v2671_v18  ;;  %1266 = vmatpush.msra.mxu3 %v2678_v10 }
 0x227   :  { %1207 = vmatpush.msra.mxu0 %v2685_v19  ;;  %1227 = vmatpush.msra.mxu1 %v2690_v12 }
 0x228   :  { %1247 = vmatpush.msra.mxu2 %v2695_v13  ;;  %1267 = vmatpush.msra.mxu3 %v2702_v37 }
 0x229   :  { %1208 = vmatpush.msra.mxu0 %v2709_v40  ;;  %1228 = vmatpush.msra.mxu1 %v2714_v41 }
 0x22a   :  { %1248 = vmatpush.msra.mxu2 %v2719_v44  ;;  %1268 = vmatpush.msra.mxu3 %v2726_v25 }
 0x22b   :  { %1209 = vmatpush.msra.mxu0 %v2733_v49  ;;  %1229 = vmatpush.msra.mxu1 %v2738_v26 }
 0x22c   :  { %1249 = vmatpush.msra.mxu2 %v2743_v50  ;;  %1269 = vmatpush.msra.mxu3 %v2750_v17 }
 0x22d   :  { %1210 = vmatpush.msra.mxu0 %v2757_v16  ;;  %1230 = vmatpush.msra.mxu1 %v2762_v47 }
 0x22e   :  { %1250 = vmatpush.msra.mxu2 %v2767_v34  ;;  %1270 = vmatpush.msra.mxu3 %v2774_v5 }
 0x22f   :  { %1211 = vmatpush.msra.mxu0 %v2781_v4  ;;  %1231 = vmatpush.msra.mxu1 %v2786_v1 }
 0x230   :  { %1251 = vmatpush.msra.mxu2 %v2791_v0  ;;  %1271 = vmatpush.msra.mxu3 %v2798_v61 }
 0x231   :  { %1212 = vmatpush.msra.mxu0 %v2805_v59  ;;  %1232 = vmatpush.msra.mxu1 %v2810_v56  ;;  %v3459_v56 = vld [vmem:[#allocation7_spill] sm:$0xff]  ;;  %v3460_v59 = vld [vmem:[#allocation8_spill] sm:$0xff] }
 0x232   :  { %1252 = vmatpush.msra.mxu2 %v2815_v55  ;;  %1272 = vmatpush.msra.mxu3 %v3455_v29  ;;  %v3458_v29 = vld [vmem:[#allocation6_spill] sm:$0xff] }
 0x233   :  { %1213 = vmatpush.msra.mxu0 %v3456_v42  ;;  %1233 = vmatpush.msra.mxu1 %v3444_v33  ;;  %v3457_v42 = vld [vmem:[#allocation5_spill] sm:$0xff] }
 0x234   :  { %1253 = vmatpush.msra.mxu2 %v3445_v2  ;;  %1273 = vmatpush.msra.mxu3 %v3446_v3 }
 0x235   :  { %1214 = vmatpush.msra.mxu0 %v3447_v30  ;;  %1234 = vmatpush.msra.mxu1 %v3448_v38 }
 0x236   :  { %1254 = vmatpush.msra.mxu2 %v3449_v46  ;;  %1274 = vmatpush.msra.mxu3 %v3450_v48 }
 0x237   :  { %1215 = vmatpush.msra.mxu0 %v3451_v52  ;;  %1235 = vmatpush.msra.mxu1 %v3452_v51 }
 0x238   :  { %1255 = vmatpush.msra.mxu2 %v2887_v39  ;;  %1275 = vmatpush.msra.mxu3 %v2894_v43 }
 0x294   :  { %v875_v33 = vpop.f32.mrf.mxu0  ;;  %v895_v2 = vpop.f32.mrf.mxu1 }
 0x295   :  { %v876_v3 = vadd.f32 %v875_v33, %v3457_v42  ;;  %v896_v30 = vadd.f32 %v895_v2, %v3458_v29 }
 0x297   :  { %v938_v55 = vmul.f32 0.5, %v876_v3  ;;  %v942_v38 = vmul.f32 0.5, %v896_v30  ;;  %v3461_v3 = vld [vmem:[#allocation46_spill] sm:$0xff] }
 0x299   :  { %1738 = vtanh.f32 %v938_v55 }
 0x29a   :  { %1740 = vtanh.f32 %v942_v38 }
 0x29b   :  { %v915_v46 = vpop.f32.mrf.mxu2  ;;  %v935_v48 = vpop.f32.mrf.mxu3 }
 0x29c   :  { %v916_v52 = vadd.f32 %v915_v46, %v3459_v56  ;;  %v936_v51 = vadd.f32 %v935_v48, %v3460_v59  ;;  %v1531_v46 = vld [vmem:[%s3345_s2 + $0x1e0] sm:$0xff] }
 0x29e   :  { %1742 = vtanh.f32 %v916_v52  ;;  %v947_v39 = vmul.f32 0.5, %v936_v51 }
 0x29f   :  { %v1739_v61 = vpop.eup %1738 }
 0x2a0   :  { %v1741_v43 = vpop.eup %1740  ;;  %v940_v0 = vmul.f32 0.5, %v1739_v61  ;;  %1744 = vtanh.f32 %v947_v39  ;;  %v3462_v39 = vld [vmem:[#allocation27_spill] sm:$0xff]  ;;  %v3464_v61 = vld [vmem:[#allocation29_spill] sm:$0xff] }
 0x2a1   :  { %v944_v1 = vmul.f32 0.5, %v1741_v43  ;;  %v3463_v43 = vld [vmem:[#allocation28_spill] sm:$0xff] }
 0x2a2   :  { %v941_v33 = vadd.f32 0.5, %v940_v0  ;;  %v3465_v0 = vld [vmem:[#allocation30_spill] sm:$0xff] }
 0x2a3   :  { %v945_v42 = vadd.f32 0.5, %v944_v1  ;;  %v3466_v1 = vld [vmem:[#allocation31_spill] sm:$0xff] }
 0x2a4   :  { %v1743_v2 = vpop.eup %1742 }
 0x2a5   :  { %v951_v30 = vmul.f32 %v945_v42, %v3461_v3  ;;  %v952_v55 = vmul.f32 %v1743_v2, %v941_v33  ;;  %v1534_v2 = vld [vmem:[%s3345_s2 + $0x1f8] sm:$0xff]  ;;  %v3485_v3 = vld [vmem:[#allocation13_spill] sm:$0xff] }
 0x2a6   :  { %v1745_v38 = vpop.eup %1744 }
 0x2a7   :  { %v3042_v29 = vadd.f32 %v952_v55, %v951_v30  ;;  %v949_v56 = vmul.f32 0.5, %v1745_v38  ;;  %v3486_v55 = vld [vmem:[#allocation14_spill] sm:$0xff] }
 0x2a9   :  { %1746 = vtanh.f32 %v3042_v29  ;;  %v950_v59 = vadd.f32 0.5, %v949_v56 }
 0x2af   :  { %v1747_v52 = vpop.eup %1746 }
 0x2b0   :  { %v955_v51 = vmul.f32 %v1747_v52, %v950_v59 }
 0x2b2   :  { %1702 = vst [vmem:[%s3347_s4 + $0x18] sm:$0xff] %v955_v51  ;;  %1045 = vmatmul.f32.vlgmr.msrb.gmra.mxu0 %v955_v51  ;;  %1065 = vmatmul.f32.vlgmr.msrb.gmra.mxu1 %v955_v51 }
 0x2b3   :  { %1085 = vmatmul.f32.vlgmr.msrb.gmra.mxu2 %v955_v51  ;;  %1105 = vmatmul.f32.vlgmr.msrb.gmra.mxu3 %v955_v51  ;;  %v3487_v51 = vld [vmem:[#allocation15_spill] sm:$0xff] }
 0x2b4   :  { %1371 = vmatpush.msrb.mxu0 %v3453_v45  ;;  %1391 = vmatpush.msrb.mxu1 %v3454_v35  ;;  %v1532_v45 = vld [vmem:[%s3345_s2 + $0x1e8] sm:$0xff]  ;;  %v1533_v35 = vld [vmem:[%s3345_s2 + $0x1f0] sm:$0xff] }
 0x2b5   :  { %1411 = vmatpush.msrb.mxu2 %v2517_v6  ;;  %1431 = vmatpush.msrb.mxu3 %v2524_v21  ;;  %v3473_v6 = vld [vmem:[#allocation38_spill] sm:$0xff]  ;;  %v3474_v21 = vld [vmem:[#allocation39_spill] sm:$0xff] }
 0x2b6   :  { %1372 = vmatpush.msrb.mxu0 %v2541_v53  ;;  %1392 = vmatpush.msrb.mxu1 %v2546_v54  ;;  %v3475_v53 = vld [vmem:[#allocation40_spill] sm:$0xff]  ;;  %v3476_v54 = vld [vmem:[#allocation41_spill] sm:$0xff] }
 0x2b7   :  { %1412 = vmatpush.msrb.mxu2 %v2551_v57  ;;  %1432 = vmatpush.msrb.mxu3 %v2558_v14  ;;  %v3477_v57 = vld [vmem:[#allocation42_spill] sm:$0xff]  ;;  %v3478_v14 = vld [vmem:[#allocation43_spill] sm:$0xff] }
 0x2b8   :  { %1373 = vmatpush.msrb.mxu0 %v2565_v20  ;;  %1393 = vmatpush.msrb.mxu1 %v2570_v58  ;;  %v3479_v20 = vld [vmem:[#allocation44_spill] sm:$0xff]  ;;  %v3480_v58 = vld [vmem:[#allocation45_spill] sm:$0xff] }
 0x2b9   :  { %1413 = vmatpush.msrb.mxu2 %v2575_v15  ;;  %1433 = vmatpush.msrb.mxu3 %v2582_v22 }
 0x2ba   :  { %1374 = vmatpush.msrb.mxu0 %v2589_v62  ;;  %1394 = vmatpush.msrb.mxu1 %v2594_v63  ;;  %v3481_v62 = vld [vmem:[#allocation9_spill] sm:$0xff] }
 0x2bb   :  { %1414 = vmatpush.msrb.mxu2 %v2599_v7  ;;  %1434 = vmatpush.msrb.mxu3 %v2606_v60  ;;  %v3482_v7 = vld [vmem:[#allocation10_spill] sm:$0xff] }
 0x2bc   :  { %1375 = vmatpush.msrb.mxu0 %v2613_v8  ;;  %1395 = vmatpush.msrb.mxu1 %v2618_v11 }
 0x2bd   :  { %1415 = vmatpush.msrb.mxu2 %v2623_v23  ;;  %1435 = vmatpush.msrb.mxu3 %v2630_v24 }
 0x2be   :  { %1376 = vmatpush.msrb.mxu0 %v2637_v27  ;;  %1396 = vmatpush.msrb.mxu1 %v2642_v28  ;;  %v3483_v27 = vld [vmem:[#allocation11_spill] sm:$0xff] }
 0x2bf   :  { %1416 = vmatpush.msrb.mxu2 %v2647_v31  ;;  %1436 = vmatpush.msrb.mxu3 %v2654_v32  ;;  %v3484_v31 = vld [vmem:[#allocation12_spill] sm:$0xff] }
 0x2c0   :  { %1377 = vmatpush.msrb.mxu0 %v2661_v36  ;;  %1397 = vmatpush.msrb.mxu1 %v2666_v9 }
 0x2c1   :  { %1417 = vmatpush.msrb.mxu2 %v2671_v18  ;;  %1437 = vmatpush.msrb.mxu3 %v2678_v10 }
 0x2c2   :  { %1378 = vmatpush.msrb.mxu0 %v2685_v19  ;;  %1398 = vmatpush.msrb.mxu1 %v2690_v12 }
 0x2c3   :  { %1418 = vmatpush.msrb.mxu2 %v2695_v13  ;;  %1438 = vmatpush.msrb.mxu3 %v2702_v37 }
 0x2c4   :  { %1379 = vmatpush.msrb.mxu0 %v2709_v40  ;;  %1399 = vmatpush.msrb.mxu1 %v2714_v41 }
 0x2c5   :  { %1419 = vmatpush.msrb.mxu2 %v2719_v44  ;;  %1439 = vmatpush.msrb.mxu3 %v2726_v25 }
 0x2c6   :  { %1380 = vmatpush.msrb.mxu0 %v2733_v49  ;;  %1400 = vmatpush.msrb.mxu1 %v2738_v26 }
 0x2c7   :  { %1420 = vmatpush.msrb.mxu2 %v2743_v50  ;;  %1440 = vmatpush.msrb.mxu3 %v2750_v17  ;;  %v3467_v17 = vld [vmem:[#allocation32_spill] sm:$0xff] }
 0x2c8   :  { %1381 = vmatpush.msrb.mxu0 %v2757_v16  ;;  %1401 = vmatpush.msrb.mxu1 %v2762_v47  ;;  %v3468_v16 = vld [vmem:[#allocation33_spill] sm:$0xff]  ;;  %v3469_v47 = vld [vmem:[#allocation34_spill] sm:$0xff] }
 0x2c9   :  { %1421 = vmatpush.msrb.mxu2 %v2767_v34  ;;  %1441 = vmatpush.msrb.mxu3 %v2774_v5  ;;  %v3470_v34 = vld [vmem:[#allocation35_spill] sm:$0xff]  ;;  %v3471_v5 = vld [vmem:[#allocation36_spill] sm:$0xff] }
 0x2ca   :  { %1382 = vmatpush.msrb.mxu0 %v2781_v4  ;;  %1402 = vmatpush.msrb.mxu1 %v3462_v39  ;;  %v3472_v4 = vld [vmem:[#allocation37_spill] sm:$0xff] }
 0x2cb   :  { %1422 = vmatpush.msrb.mxu2 %v3463_v43  ;;  %1442 = vmatpush.msrb.mxu3 %v3464_v61  ;;  %v3488_v43 = vld [vmem:[#allocation16_spill] sm:$0xff] }
 0x2cc   :  { %1383 = vmatpush.msrb.mxu0 %v3465_v0  ;;  %1403 = vmatpush.msrb.mxu1 %v3466_v1 }
 0x2cd   :  { %1423 = vmatpush.msrb.mxu2 %v3467_v17  ;;  %1443 = vmatpush.msrb.mxu3 %v3468_v16 }
 0x2ce   :  { %1384 = vmatpush.msrb.mxu0 %v3469_v47  ;;  %1404 = vmatpush.msrb.mxu1 %v3470_v34 }
 0x2cf   :  { %1424 = vmatpush.msrb.mxu2 %v3471_v5  ;;  %1444 = vmatpush.msrb.mxu3 %v3472_v4 }
 0x2d0   :  { %1385 = vmatpush.msrb.mxu0 %v3473_v6  ;;  %1405 = vmatpush.msrb.mxu1 %v3474_v21 }
 0x2d1   :  { %1425 = vmatpush.msrb.mxu2 %v3475_v53  ;;  %1445 = vmatpush.msrb.mxu3 %v3476_v54 }
 0x2d2   :  { %1386 = vmatpush.msrb.mxu0 %v3477_v57  ;;  %1406 = vmatpush.msrb.mxu1 %v3478_v14 }
 0x2d3   :  { %1426 = vmatpush.msrb.mxu2 %v3479_v20  ;;  %1446 = vmatpush.msrb.mxu3 %v3480_v58 }
 0x32f   :  { %v1046_v15 = vpop.f32.mrf.mxu0  ;;  %v1066_v22 = vpop.f32.mrf.mxu1 }
 0x330   :  { %v1047_v63 = vadd.f32 %v1046_v15, %v3481_v62  ;;  %v1067_v60 = vadd.f32 %v1066_v22, %v3482_v7  ;;  %v1527_v15 = vld [vmem:[%s3345_s2 + $0x1c0] sm:$0xff]  ;;  %v1528_v22 = vld [vmem:[%s3345_s2 + $0x1c8] sm:$0xff]  ;;  %v1529_v62 = vld [vmem:[%s3345_s2 + $0x1d0] sm:$0xff] }
 0x331   :  { %v1523_v7 = vld [vmem:[%s3345_s2 + $0x1a0] sm:$0xff] }
 0x332   :  { %v1109_v8 = vmul.f32 0.5, %v1047_v63  ;;  %v1113_v11 = vmul.f32 0.5, %v1067_v60  ;;  %v1530_v63 = vld [vmem:[%s3345_s2 + $0x1d8] sm:$0xff]  ;;  %v1524_v60 = vld [vmem:[%s3345_s2 + $0x1a8] sm:$0xff] }
 0x334   :  { %1748 = vtanh.f32 %v1109_v8  ;;  %v1525_v8 = vld [vmem:[%s3345_s2 + $0x1b0] sm:$0xff] }
 0x335   :  { %1750 = vtanh.f32 %v1113_v11  ;;  %v1526_v11 = vld [vmem:[%s3345_s2 + $0x1b8] sm:$0xff] }
 0x336   :  { %v1086_v23 = vpop.f32.mrf.mxu2  ;;  %v1106_v24 = vpop.f32.mrf.mxu3 }
 0x337   :  { %v1087_v28 = vadd.f32 %v1086_v23, %v3483_v27  ;;  %v1107_v32 = vadd.f32 %v1106_v24, %v3484_v31  ;;  %v1519_v23 = vld [vmem:[%s3345_s2 + $0x180] sm:$0xff]  ;;  %v1520_v24 = vld [vmem:[%s3345_s2 + $0x188] sm:$0xff]  ;;  %v1521_v27 = vld [vmem:[%s3345_s2 + $0x190] sm:$0xff] }
 0x338   :  { %v1515_v31 = vld [vmem:[%s3345_s2 + $0x160] sm:$0xff] }
 0x339   :  { %1752 = vtanh.f32 %v1087_v28  ;;  %v1118_v36 = vmul.f32 0.5, %v1107_v32  ;;  %v1522_v28 = vld [vmem:[%s3345_s2 + $0x198] sm:$0xff]  ;;  %v1516_v32 = vld [vmem:[%s3345_s2 + $0x168] sm:$0xff] }
 0x33a   :  { %v1749_v9 = vpop.eup %1748 }
 0x33b   :  { %v1751_v18 = vpop.eup %1750  ;;  %v1111_v10 = vmul.f32 0.5, %v1749_v9  ;;  %1754 = vtanh.f32 %v1118_v36  ;;  %v1517_v36 = vld [vmem:[%s3345_s2 + $0x170] sm:$0xff]  ;;  %v1518_v9 = vld [vmem:[%s3345_s2 + $0x178] sm:$0xff] }
 0x33c   :  { %v1115_v19 = vmul.f32 0.5, %v1751_v18  ;;  %v1511_v18 = vld [vmem:[%s3345_s2 + $0x140] sm:$0xff] }
 0x33d   :  { %v1112_v12 = vadd.f32 0.5, %v1111_v10  ;;  %v1512_v10 = vld [vmem:[%s3345_s2 + $0x148] sm:$0xff] }
 0x33e   :  { %v1116_v13 = vadd.f32 0.5, %v1115_v19  ;;  %v1513_v19 = vld [vmem:[%s3345_s2 + $0x150] sm:$0xff] }
 0x33f   :  { %v1753_v37 = vpop.eup %1752 }
 0x340   :  { %v1122_v40 = vmul.f32 %v1116_v13, %v3042_v29  ;;  %v1123_v41 = vmul.f32 %v1753_v37, %v1112_v12  ;;  %v1514_v12 = vld [vmem:[%s3345_s2 + $0x158] sm:$0xff]  ;;  %v1507_v13 = vld [vmem:[%s3345_s2 + $0x120] sm:$0xff]  ;;  %v1508_v37 = vld [vmem:[%s3345_s2 + $0x128] sm:$0xff] }
 0x341   :  { %v1755_v44 = vpop.eup %1754 }
 0x342   :  { %v1124_v25 = vadd.f32 %v1123_v41, %v1122_v40  ;;  %v1120_v49 = vmul.f32 0.5, %v1755_v44  ;;  %v1509_v40 = vld [vmem:[%s3345_s2 + $0x130] sm:$0xff]  ;;  %v1510_v41 = vld [vmem:[%s3345_s2 + $0x138] sm:$0xff]  ;;  %v1503_v44 = vld [vmem:[%s3345_s2 + $0x100] sm:$0xff] }
 0x344   :  { %1756 = vtanh.f32 %v1124_v25  ;;  %v1121_v26 = vadd.f32 0.5, %v1120_v49  ;;  %v1505_v49 = vld [vmem:[%s3345_s2 + $0x110] sm:$0xff] }
 0x34a   :  { %v1757_v50 = vpop.eup %1756 }
 0x34b   :  { %v1126_v48 = vmul.f32 %v1757_v50, %v1121_v26  ;;  %v1506_v26 = vld [vmem:[%s3345_s2 + $0x118] sm:$0xff]  ;;  %v1499_v50 = vld [vmem:[%s3345_s2 + $0xe0] sm:$0xff] }
 0x34d   :  { %1703 = vst [vmem:[%s3347_s4 + $0x20] sm:$0xff] %v1126_v48  ;;  %1216 = vmatmul.f32.vlgmr.msra.gmra.mxu0 %v1126_v48  ;;  %1236 = vmatmul.f32.vlgmr.msra.gmra.mxu1 %v1126_v48 }
 0x34e   :  { %1256 = vmatmul.f32.vlgmr.msra.gmra.mxu2 %v1126_v48  ;;  %1276 = vmatmul.f32.vlgmr.msra.gmra.mxu3 %v1126_v48  ;;  %v1500_v48 = vld [vmem:[%s3345_s2 + $0xe8] sm:$0xff] }
 0x34f   :  { %1542 = vmatpush.msra.mxu0 %v1531_v46  ;;  %1562 = vmatpush.msra.mxu1 %v1532_v45  ;;  %v1501_v46 = vld [vmem:[%s3345_s2 + $0xf0] sm:$0xff]  ;;  %v1502_v45 = vld [vmem:[%s3345_s2 + $0xf8] sm:$0xff] }
 0x350   :  { %1582 = vmatpush.msra.mxu2 %v1533_v35  ;;  %1602 = vmatpush.msra.mxu3 %v1534_v2  ;;  %v1495_v35 = vld [vmem:[%s3345_s2 + $0xc0] sm:$0xff]  ;;  %v1498_v2 = vld [vmem:[%s3345_s2 + $0xd8] sm:$0xff] }
 0x351   :  { %1543 = vmatpush.msra.mxu0 %v1527_v15  ;;  %1563 = vmatpush.msra.mxu1 %v1528_v22  ;;  %v3490_v22 = vld [vmem:[#allocation18_spill] sm:$0xff] }
 0x352   :  { %1583 = vmatpush.msra.mxu2 %v1529_v62  ;;  %1603 = vmatpush.msra.mxu3 %v1530_v63 }
 0x353   :  { %1544 = vmatpush.msra.mxu0 %v1523_v7  ;;  %1564 = vmatpush.msra.mxu1 %v1524_v60 }
 0x354   :  { %1584 = vmatpush.msra.mxu2 %v1525_v8  ;;  %1604 = vmatpush.msra.mxu3 %v1526_v11  ;;  %v3491_v11 = vld [vmem:[#allocation19_spill] sm:$0xff] }
 0x355   :  { %1545 = vmatpush.msra.mxu0 %v1519_v23  ;;  %1565 = vmatpush.msra.mxu1 %v1520_v24  ;;  %v3492_v24 = vld [vmem:[#allocation20_spill] sm:$0xff] }
 0x356   :  { %1585 = vmatpush.msra.mxu2 %v1521_v27  ;;  %1605 = vmatpush.msra.mxu3 %v1522_v28 }
 0x357   :  { %1546 = vmatpush.msra.mxu0 %v1515_v31  ;;  %1566 = vmatpush.msra.mxu1 %v1516_v32 }
 0x358   :  { %1586 = vmatpush.msra.mxu2 %v1517_v36  ;;  %1606 = vmatpush.msra.mxu3 %v1518_v9 }
 0x359   :  { %1547 = vmatpush.msra.mxu0 %v1511_v18  ;;  %1567 = vmatpush.msra.mxu1 %v1512_v10 }
 0x35a   :  { %1587 = vmatpush.msra.mxu2 %v1513_v19  ;;  %1607 = vmatpush.msra.mxu3 %v1514_v12 }
 0x35b   :  { %1548 = vmatpush.msra.mxu0 %v1507_v13  ;;  %1568 = vmatpush.msra.mxu1 %v1508_v37 }
 0x35c   :  { %1588 = vmatpush.msra.mxu2 %v1509_v40  ;;  %1608 = vmatpush.msra.mxu3 %v1510_v41 }
 0x35d   :  { %1549 = vmatpush.msra.mxu0 %v1503_v44 }
 0x35e   :  { %1589 = vmatpush.msra.mxu2 %v1505_v49  ;;  %1609 = vmatpush.msra.mxu3 %v1506_v26 }
 0x35f   :  { %1550 = vmatpush.msra.mxu0 %v1499_v50 }
 0x360   :  { %1590 = vmatpush.msra.mxu2 %v1501_v46  ;;  %1610 = vmatpush.msra.mxu3 %v1502_v45  ;;  %v3494_v46 = vld [vmem:[#allocation22_spill] sm:$0xff] }
 0x361   :  { %1551 = vmatpush.msra.mxu0 %v1495_v35 }
 0x362   :  { %1611 = vmatpush.msra.mxu3 %v1498_v2 }
 0x3ca   :  { %v1217_v33 = vpop.f32.mrf.mxu0  ;;  %v1237_v42 = vpop.f32.mrf.mxu1 }
 0x3cb   :  { %v1218_v30 = vadd.f32 %v1217_v33, %v3485_v3  ;;  %v1238_v38 = vadd.f32 %v1237_v42, %v3486_v55  ;;  %v1496_v33 = vld [vmem:[%s3345_s2 + $0xc8] sm:$0xff]  ;;  %v1497_v42 = vld [vmem:[%s3345_s2 + $0xd0] sm:$0xff]  ;;  %v1491_v3 = vld [vmem:[%s3345_s2 + $0xa0] sm:$0xff] }
 0x3cc   :  { %1591 = vmatpush.msra.mxu2 %v1497_v42  ;;  %v1493_v55 = vld [vmem:[%s3345_s2 + $0xb0] sm:$0xff]  ;;  %1552 = vmatpush.msra.mxu0 %v1491_v3 }
 0x3cd   :  { %v1280_v29 = vmul.f32 0.5, %v1218_v30  ;;  %v1284_v56 = vmul.f32 0.5, %v1238_v38  ;;  %v1492_v30 = vld [vmem:[%s3345_s2 + $0xa8] sm:$0xff]  ;;  %v1494_v38 = vld [vmem:[%s3345_s2 + $0xb8] sm:$0xff]  ;;  %v3495_v3 = vld [vmem:[#allocation23_spill] sm:$0xff] }
 0x3ce   :  { %1592 = vmatpush.msra.mxu2 %v1493_v55  ;;  %1612 = vmatpush.msra.mxu3 %v1494_v38  ;;  %v3496_v55 = vld [vmem:[#allocation24_spill] sm:$0xff] }
 0x3cf   :  { %1758 = vtanh.f32 %v1280_v29  ;;  %v1487_v29 = vld [vmem:[%s3345_s2 + $0x80] sm:$0xff] }
 0x3d0   :  { %1760 = vtanh.f32 %v1284_v56  ;;  %v1488_v56 = vld [vmem:[%s3345_s2 + $0x88] sm:$0xff]  ;;  %1553 = vmatpush.msra.mxu0 %v1487_v29 }
 0x3d1   :  { %v1257_v59 = vpop.f32.mrf.mxu2  ;;  %v1277_v52 = vpop.f32.mrf.mxu3 }
 0x3d2   :  { %v1258_v39 = vadd.f32 %v1257_v59, %v3487_v51  ;;  %v1278_v61 = vadd.f32 %v1277_v52, %v3488_v43  ;;  %v1489_v59 = vld [vmem:[%s3345_s2 + $0x90] sm:$0xff]  ;;  %v1490_v52 = vld [vmem:[%s3345_s2 + $0x98] sm:$0xff]  ;;  %v1483_v51 = vld [vmem:[%s3345_s2 + $0x60] sm:$0xff] }
 0x3d3   :  { %1593 = vmatpush.msra.mxu2 %v1489_v59  ;;  %1613 = vmatpush.msra.mxu3 %v1490_v52  ;;  %v1485_v43 = vld [vmem:[%s3345_s2 + $0x70] sm:$0xff] }
 0x3d4   :  { %1762 = vtanh.f32 %v1258_v39  ;;  %v1289_v0 = vmul.f32 0.5, %v1278_v61  ;;  %v1484_v39 = vld [vmem:[%s3345_s2 + $0x68] sm:$0xff]  ;;  %1554 = vmatpush.msra.mxu0 %v1483_v51  ;;  %v1486_v61 = vld [vmem:[%s3345_s2 + $0x78] sm:$0xff] }
 0x3d5   :  { %v1759_v1 = vpop.eup %1758  ;;  %1594 = vmatpush.msra.mxu2 %v1485_v43  ;;  %1614 = vmatpush.msra.mxu3 %v1486_v61 }
 0x3d6   :  { %v1761_v17 = vpop.eup %1760  ;;  %v1282_v16 = vmul.f32 0.5, %v1759_v1  ;;  %1764 = vtanh.f32 %v1289_v0  ;;  %v1479_v0 = vld [vmem:[%s3345_s2 + $0x40] sm:$0xff]  ;;  %v1480_v1 = vld [vmem:[%s3345_s2 + $0x48] sm:$0xff] }
 0x3d7   :  { %v1286_v47 = vmul.f32 0.5, %v1761_v17  ;;  %v1481_v17 = vld [vmem:[%s3345_s2 + $0x50] sm:$0xff]  ;;  %1555 = vmatpush.msra.mxu0 %v1479_v0 }
 0x3d8   :  { %v1283_v34 = vadd.f32 0.5, %v1282_v16  ;;  %v1482_v16 = vld [vmem:[%s3345_s2 + $0x58] sm:$0xff]  ;;  %1595 = vmatpush.msra.mxu2 %v1481_v17 }
 0x3d9   :  { %v1287_v5 = vadd.f32 0.5, %v1286_v47  ;;  %1615 = vmatpush.msra.mxu3 %v1482_v16  ;;  %v1475_v47 = vld [vmem:[%s3345_s2 + $0x20] sm:$0xff] }
 0x3da   :  { %v1763_v4 = vpop.eup %1762  ;;  %1556 = vmatpush.msra.mxu0 %v1475_v47 }
 0x3db   :  { %v1293_v6 = vmul.f32 %v1287_v5, %v1124_v25  ;;  %v1294_v21 = vmul.f32 %v1763_v4, %v1283_v34  ;;  %v1504_v25 = vld [vmem:[%s3345_s2 + $0x108] sm:$0xff]  ;;  %v1477_v5 = vld [vmem:[%s3345_s2 + $0x30] sm:$0xff]  ;;  %v1478_v4 = vld [vmem:[%s3345_s2 + $0x38] sm:$0xff] }
 0x3dc   :  { %v1765_v53 = vpop.eup %1764  ;;  %1569 = vmatpush.msra.mxu1 %v1504_v25  ;;  %v1476_v34 = vld [vmem:[%s3345_s2 + $0x28] sm:$0xff]  ;;  %1596 = vmatpush.msra.mxu2 %v1477_v5 }
 0x3dd   :  { %v3136_v54 = vadd.f32 %v1294_v21, %v1293_v6  ;;  %v1291_v57 = vmul.f32 0.5, %v1765_v53  ;;  %1616 = vmatpush.msra.mxu3 %v1478_v4  ;;  %v1471_v6 = vld [vmem:[%s3345_s2] sm:$0xff]  ;;  %v1472_v21 = vld [vmem:[%s3345_s2 + $0x8] sm:$0xff]  ;;  %v1473_v53 = vld [vmem:[%s3345_s2 + $0x10] sm:$0xff] }
 0x3de   :  { %1570 = vmatpush.msra.mxu1 %v1500_v48  ;;  %1557 = vmatpush.msra.mxu0 %v1471_v6  ;;  %v3493_v48 = vld [vmem:[#allocation21_spill] sm:$0xff] }
 0x3df   :  { %1766 = vtanh.f32 %v3136_v54  ;;  %v1292_v14 = vadd.f32 0.5, %v1291_v57  ;;  %v1474_v57 = vld [vmem:[%s3345_s2 + $0x18] sm:$0xff]  ;;  %1597 = vmatpush.msra.mxu2 %v1473_v53 }
 0x3e0   :  { %1571 = vmatpush.msra.mxu1 %v1496_v33  ;;  %1617 = vmatpush.msra.mxu3 %v1474_v57 }
 0x3e2   :  { %1572 = vmatpush.msra.mxu1 %v1492_v30 }
 0x3e4   :  { %1573 = vmatpush.msra.mxu1 %v1488_v56 }
 0x3e5   :  { %v1767_v20 = vpop.eup %1766 }
 0x3e6   :  { %v1297_v58 = vmul.f32 %v1767_v20, %v1292_v14  ;;  %1574 = vmatpush.msra.mxu1 %v1484_v39 }
 0x3e8   :  { %1704 = vst [vmem:[%s3347_s4 + $0x28] sm:$0xff] %v1297_v58  ;;  %1387 = vmatmul.f32.vlgmr.msrb.gmra.mxu0 %v1297_v58  ;;  %1407 = vmatmul.f32.vlgmr.msrb.gmra.mxu1 %v1297_v58 }
 0x3e9   :  { %1427 = vmatmul.f32.vlgmr.msrb.gmra.mxu2 %v1297_v58  ;;  %1447 = vmatmul.f32.vlgmr.msrb.gmra.mxu3 %v1297_v58  ;;  %v3489_v58 = vld [vmem:[#allocation17_spill] sm:$0xff] }
 0x3ea   :  { %1575 = vmatpush.msra.mxu1 %v1480_v1 }
 0x3ec   :  { %1576 = vmatpush.msra.mxu1 %v1476_v34 }
 0x3ee   :  { %1577 = vmatpush.msra.mxu1 %v1472_v21 }
 0x465   :  { %v1388_v14 = vpop.f32.mrf.mxu0  ;;  %v1408_v20 = vpop.f32.mrf.mxu1 }
 0x466   :  { %v1389_v15 = vadd.f32 %v1388_v14, %v3489_v58  ;;  %v1409_v62 = vadd.f32 %v1408_v20, %v3490_v22 }
 0x468   :  { %v1451_v63 = vmul.f32 0.5, %v1389_v15  ;;  %v1455_v7 = vmul.f32 0.5, %v1409_v62 }
 0x46a   :  { %1768 = vtanh.f32 %v1451_v63 }
 0x46b   :  { %1770 = vtanh.f32 %v1455_v7 }
 0x46c   :  { %v1428_v60 = vpop.f32.mrf.mxu2  ;;  %v1448_v8 = vpop.f32.mrf.mxu3 }
 0x46d   :  { %v1429_v23 = vadd.f32 %v1428_v60, %v3491_v11  ;;  %v1449_v27 = vadd.f32 %v1448_v8, %v3492_v24 }
 0x46f   :  { %1772 = vtanh.f32 %v1429_v23  ;;  %v1460_v28 = vmul.f32 0.5, %v1449_v27 }
 0x470   :  { %v1769_v31 = vpop.eup %1768 }
 0x471   :  { %v1771_v32 = vpop.eup %1770  ;;  %v1453_v36 = vmul.f32 0.5, %v1769_v31  ;;  %1774 = vtanh.f32 %v1460_v28 }
 0x472   :  { %v1457_v9 = vmul.f32 0.5, %v1771_v32 }
 0x473   :  { %v1454_v18 = vadd.f32 0.5, %v1453_v36 }
 0x474   :  { %v1458_v10 = vadd.f32 0.5, %v1457_v9 }
 0x475   :  { %v1773_v19 = vpop.eup %1772 }
 0x476   :  { %v1464_v12 = vmul.f32 %v1458_v10, %v3136_v54  ;;  %v1465_v13 = vmul.f32 %v1773_v19, %v1454_v18 }
 0x477   :  { %v1775_v37 = vpop.eup %1774 }
 0x478   :  { %v1466_v40 = vadd.f32 %v1465_v13, %v1464_v12  ;;  %v1462_v41 = vmul.f32 0.5, %v1775_v37 }
 0x47a   :  { %1776 = vtanh.f32 %v1466_v40  ;;  %v1463_v44 = vadd.f32 0.5, %v1462_v41 }
 0x480   :  { %v1777_v25 = vpop.eup %1776 }
 0x481   :  { %v1468_v49 = vmul.f32 %v1777_v25, %v1463_v44 }
 0x483   :  { %1705 = vst [vmem:[%s3347_s4 + $0x30] sm:$0xff] %v1468_v49  ;;  %1558 = vmatmul.f32.vlgmr.msra.gmra.mxu0 %v1468_v49  ;;  %1578 = vmatmul.f32.vlgmr.msra.gmra.mxu1 %v1468_v49 }
 0x484   :  { %1598 = vmatmul.f32.vlgmr.msra.gmra.mxu2 %v1468_v49  ;;  %1618 = vmatmul.f32.vlgmr.msra.gmra.mxu3 %v1468_v49 }
 0x500   :  { %v1559_v26 = vpop.f32.mrf.mxu0  ;;  %v1579_v50 = vpop.f32.mrf.mxu1 }
 0x501   :  { %v1560_v54 = vadd.f32 %v1559_v26, %v3493_v48  ;;  %v1580_v45 = vadd.f32 %v1579_v50, %v3494_v46 }
 0x503   :  { %v1622_v35 = vmul.f32 0.5, %v1560_v54  ;;  %v1626_v33 = vmul.f32 0.5, %v1580_v45 }
 0x505   :  { %1778 = vtanh.f32 %v1622_v35 }
 0x506   :  { %1780 = vtanh.f32 %v1626_v33 }
 0x507   :  { %v1599_v42 = vpop.f32.mrf.mxu2  ;;  %v1619_v2 = vpop.f32.mrf.mxu3 }
 0x508   :  { %v1600_v30 = vadd.f32 %v1599_v42, %v3495_v3  ;;  %v1620_v38 = vadd.f32 %v1619_v2, %v3496_v55 }
 0x50a   :  { %1782 = vtanh.f32 %v1600_v30  ;;  %v1631_v29 = vmul.f32 0.5, %v1620_v38 }
 0x50b   :  { %v1779_v56 = vpop.eup %1778 }
 0x50c   :  { %v1781_v59 = vpop.eup %1780  ;;  %v1624_v52 = vmul.f32 0.5, %v1779_v56  ;;  %1784 = vtanh.f32 %v1631_v29 }
 0x50d   :  { %v1628_v51 = vmul.f32 0.5, %v1781_v59 }
 0x50e   :  { %v1625_v39 = vadd.f32 0.5, %v1624_v52 }
 0x50f   :  { %v1629_v43 = vadd.f32 0.5, %v1628_v51 }
 0x510   :  { %v1783_v61 = vpop.eup %1782 }
 0x511   :  { %v1635_v0 = vmul.f32 %v1629_v43, %v1466_v40  ;;  %v1636_v1 = vmul.f32 %v1783_v61, %v1625_v39 }
 0x512   :  { %v1785_v17 = vpop.eup %1784 }
 0x513   :  { %v1637_v16 = vadd.f32 %v1636_v1, %v1635_v0  ;;  %v1633_v47 = vmul.f32 0.5, %v1785_v17 }
 0x515   :  { %1786 = vtanh.f32 %v1637_v16  ;;  %1648 = vst [vmem:[%s3348_s6] sm:$0xff] %v1637_v16  ;;  %v1634_v34 = vadd.f32 0.5, %v1633_v47 }
 0x51b   :  { %v1787_v5 = vpop.eup %1786 }
 0x51c   :  { %v1639_v4 = vmul.f32 %v1787_v5, %v1634_v34 }
 0x51e   :  { %1706 = vst [vmem:[%s3347_s4 + $0x38] sm:$0xff] %v1639_v4 }
 0x51f   :  { %1647 = vst [vmem:[%s3349_s5] sm:$0xff] %v1639_v4 }

</bundles_post_ra>
